<compile_context>
chip_gen: v7x
topology: tpu7x:2x2x1
jax: 0.10.0
libtpu: 0.0.40
codegen_flags: <defaults>
</compile_context>

<pallas_src>
import functools
import numpy as np

import jax
import jax.numpy as jnp
from jax import lax
from jax.experimental import pallas as pl
from jax.experimental.pallas import tpu as pltpu


# ----------------------------------------------------------------------------
# In-kernel math helpers
# ----------------------------------------------------------------------------
def _erf(x):
    # nn.GELU() uses exact erf; Abramowitz&Stegun 7.1.26 (abs err < 1.5e-7),
    # well inside the 2e-3 test tolerance.  exp() goes to the EUP slot.
    a1, a2, a3, a4, a5 = (0.254829592, -0.284496736, 1.421413741,
                          -1.453152027, 1.061405429)
    p = 0.3275911
    ax = jnp.abs(x)
    t = 1.0 / (1.0 + p * ax)
    poly = ((((a5 * t + a4) * t + a3) * t + a2) * t + a1) * t
    y = 1.0 - poly * jnp.exp(-ax * ax)
    return jnp.where(x >= 0, y, -y)


def _gelu(x):
    return 0.5 * x * (1.0 + _erf(x * 0.7071067811865476))


# ----------------------------------------------------------------------------
# Kernel: one grid step == one batch element; everything is (D, H*W*C) in VMEM.
# ----------------------------------------------------------------------------
def _spatial_attention_kernel(x_ref, coef_ref, bias_ref, o_ref, *,
                              D, H, W, C, rows):
    L = H * W * C
    x = x_ref[0]                                   # (D, L)

    def crow(r):                                   # static row -> (1, L)
        return coef_ref[pl.ds(r, 1), :]

    def brow(r):
        return bias_ref[pl.ds(r, 1), :]

    def lane_roll(v, delta):                       # v[i] <- v[i + delta] (circular)
        if delta == 0:
            return v
        return pltpu.roll(v, shift=(-delta) % L, axis=1)

    def sub_roll(v, off):                          # shift along D (sublane axis)
        if off == 0:
            return v
        return pltpu.roll(v, shift=(-off) % D, axis=0)

    # Hoisted sublane iota + memoized 0/1 masks for D-axis shifts.
    iota_d = lax.broadcasted_iota(jnp.int32, (D, 1), 0)
    _dmask_cache = {}

    def dmask(off):
        if off not in _dmask_cache:
            m = jnp.logical_and(iota_d + off >= 0, iota_d + off < D)
            _dmask_cache[off] = m.astype(jnp.float32)
        return _dmask_cache[off]

    def pointwise(v, p):                           # 1x1x1 conv: VPU FMAs only
        r0 = rows["pw%d" % p]
        out = None
        for i, d in enumerate(range(-(C - 1), C)):
            term = lane_roll(v, d) * crow(r0 + i)
            out = term if out is None else out + term
        return out + brow(rows["pw%d_b" % p])

    def strip_lane(v, r0, K, stride, extent):      # depthwise strip along W or H
        pad = K // 2
        out = None
        for k in range(K):
            off = k - pad
            if abs(off) >= extent:                 # tap fully masked out
                continue
            term = lane_roll(v, off * stride) * crow(r0 + k)
            out = term if out is None else out + term
        return out

    def strip_d(v, r0, K):                         # depthwise strip along D
        pad = K // 2
        out = None
        for k in range(K):
            off = k - pad
            if abs(off) >= D:
                continue
            term = sub_roll(v, off) * crow(r0 + k)
            if off != 0:
                term = term * dmask(off)
            out = term if out is None else out + term
        return out

    def dw333(v):                                  # depthwise 3x3x3, padding 1
        r0 = rows["conv0"]
        out = None
        for kd in range(3):
            offd = kd - 1
            vd = sub_roll(v, offd)
            acc = None
            for kh in range(3):
                for kw in range(3):
                    delta = (kh - 1) * W * C + (kw - 1) * C
                    term = lane_roll(vd, delta) * crow(r0 + kd * 9 + kh * 3 + kw)
                    acc = term if acc is None else acc + term
            if offd != 0:
                acc = acc * dmask(offd)            # D-edge mask, shared by 9 taps
            out = acc if out is None else out + acc
        return out + brow(rows["conv0_b"])

    def branch(tag, K, a):                         # conv*_1 (W), conv*_2 (D), conv*_3 (H)
        a = strip_lane(a, rows[tag + "_w"], K, C, W) + brow(rows[tag + "_w_b"])
        a = strip_d(a, rows[tag + "_d"], K) + brow(rows[tag + "_d_b"])
        a = strip_lane(a, rows[tag + "_h"], K, W * C, H) + brow(rows[tag + "_h_b"])
        return a

    h = _gelu(pointwise(x, 0))                     # proj_1 + GELU; u == h
    attn = dw333(h)
    s = attn                                       # accumulate branches in place
    s = s + branch("b7", 7, attn)
    s = s + branch("b11", 11, attn)
    s = s + branch("b21", 21, attn)
    attn_out = pointwise(s, 1)                     # conv3 (1x1x1)
    out = pointwise(attn_out * h, 2) + x_ref[0]    # proj_2 + residual (re-read x)
    o_ref[0] = out.astype(o_ref.dtype)


# ----------------------------------------------------------------------------
# Host-side table builder: per-tap per-lane coefficient / bias vectors.
# ----------------------------------------------------------------------------
def _build_tables(P, D, H, W, C):
    L = H * W * C
    l = np.arange(L)
    c_l = l % C
    w_l = (l // C) % W
    h_l = l // (C * W)

    coef_rows, bias_rows, rows = [], [], {}

    def add_coef(name, rs):
        rows[name] = len(coef_rows)
        coef_rows.extend([np.asarray(r, np.float32) for r in rs])

    def add_bias(name, vec):
        rows[name + "_b"] = len(bias_rows)
        bias_rows.append(np.asarray(vec, np.float32))

    w0 = np.asarray(P["w0"], np.float32)           # (3,3,3,C)
    b0 = np.asarray(P["b0"], np.float32)           # (1,C)
    pws = np.asarray(P["pws"], np.float32)         # (3,C,C)  [ci, co]
    pbs = np.asarray(P["pbs"], np.float32)         # (3,C)

    # conv0: depthwise 3x3x3 (D-edge validity handled in-kernel per kd).
    r0 = []
    for kd in range(3):
        for kh in range(3):
            for kw in range(3):
                m = ((h_l + kh - 1 >= 0) & (h_l + kh - 1 < H) &
                     (w_l + kw - 1 >= 0) & (w_l + kw - 1 < W))
                r0.append(w0[kd, kh, kw, c_l] * m.astype(np.float32))
    add_coef("conv0", r0)
    add_bias("conv0", b0[0, c_l])

    def strip_rows(wk, axis):                      # wk: (K, C)
        K = wk.shape[0]
        pad = K // 2
        out = []
        for k in range(K):
            off = k - pad
            if axis == "w":
                m = ((w_l + off >= 0) & (w_l + off < W)).astype(np.float32)
            elif axis == "h":
                m = ((h_l + off >= 0) & (h_l + off < H)).astype(np.float32)
            else:                                  # "d": validity handled in-kernel
                m = np.ones(L, np.float32)
            out.append(wk[k, c_l] * m)
        return out

    for tag, K in (("b7", 7), ("b11", 11), ("b21", 21)):
        ws = np.asarray(P["ws%d" % K], np.float32)   # (3, K, C)
        bs = np.asarray(P["bs%d" % K], np.float32)   # (3, C)
        add_coef(tag + "_w", strip_rows(ws[0], "w"))   # (1,1,K) along W
        add_bias(tag + "_w", bs[0][c_l])
        add_coef(tag + "_d", strip_rows(ws[1], "d"))   # (K,1,1) along D
        add_bias(tag + "_d", bs[1][c_l])
        add_coef(tag + "_h", strip_rows(ws[2], "h"))   # (1,K,1) along H
        add_bias(tag + "_h", bs[2][c_l])

    # 1x1x1 convs as lane-delta taps: out[l] = sum_d x[l+d] * pw[c(l)+d, c(l)].
    for p in range(3):
        rs = []
        for d in range(-(C - 1), C):
            coefv = np.zeros(L, np.float32)
            ci = c_l + d
            valid = (ci >= 0) & (ci < C)
            coefv[valid] = pws[p][ci[valid], c_l[valid]]
            rs.append(coefv)
        add_coef("pw%d" % p, rs)
        add_bias("pw%d" % p, pbs[p][c_l])

    coef = jnp.asarray(np.stack(coef_rows, 0))     # (R, L)
    bias = jnp.asarray(np.stack(bias_rows, 0))     # (B, L)
    return coef, bias, rows


# ----------------------------------------------------------------------------
# Wrapper
# ----------------------------------------------------------------------------
def spatial_attention(x, P):
    N, D, H, W, C = x.shape
    L = H * W * C
    coef, bias, rows = _build_tables(P, D, H, W, C)
    x2 = x.reshape(N, D, L)                        # lane-dense kernel layout

    kernel = functools.partial(_spatial_attention_kernel,
                               D=D, H=H, W=W, C=C, rows=rows)

    out = pl.pallas_call(
        kernel,
        out_shape=jax.ShapeDtypeStruct((N, D, L), jnp.float32),
        grid=(N,),
        in_specs=[
            pl.BlockSpec((1, D, L), lambda n: (n, 0, 0)),
            pl.BlockSpec(coef.shape, lambda n: (0, 0)),
            pl.BlockSpec(bias.shape, lambda n: (0, 0)),
        ],
        out_specs=pl.BlockSpec((1, D, L), lambda n: (n, 0, 0)),
        compiler_params=pltpu.CompilerParams(
            dimension_semantics=("parallel",)),    # batch shards across TCs (v7x)
    )(x2, coef, bias)
    return out.reshape(N, D, H, W, C)


# ----------------------------------------------------------------------------
# Pure-JAX reference (XLA convs) for correctness check
# ----------------------------------------------------------------------------
def ref_forward(x, P):
    C = P["pws"].shape[1]
    dn = ("NDHWC", "DHWIO", "NDHWC")

    def dw(v, w_dhwc, b, pads):
        kd, kh, kw, c = w_dhwc.shape
        rhs = w_dhwc.reshape(kd, kh, kw, 1, c)
        y = jax.lax.conv_general_dilated(v, rhs, (1, 1, 1), pads,
                                         dimension_numbers=dn,
                                         feature_group_count=c)
        return y + b

    def pw(v, wt, b):
        rhs = wt.reshape(1, 1, 1, C, C)
        y = jax.lax.conv_general_dilated(v, rhs, (1, 1, 1),
                                         [(0, 0)] * 3, dimension_numbers=dn)
        return y + b

    def branch(ws, bs, a, K):
        p = K // 2
        a = dw(a, ws[0].reshape(1, 1, K, C), bs[0], [(0, 0), (0, 0), (p, p)])
        a = dw(a, ws[1].reshape(K, 1, 1, C), bs[1], [(p, p), (0, 0), (0, 0)])
        a = dw(a, ws[2].reshape(1, K, 1, C), bs[2], [(0, 0), (p, p), (0, 0)])
        return a

    shortcut = x
    h = pw(x, P["pws"][0], P["pbs"][0])
    h = jax.nn.gelu(h, approximate=False)
    u = h
    attn = dw(h, P["w0"], P["b0"][0], [(1, 1)] * 3)
    attn_sum = (attn
                + branch(P["ws7"], P["bs7"], attn, 7)
                + branch(P["ws11"], P["bs11"], attn, 11)
                + branch(P["ws21"], P["bs21"], attn, 21))
    attn_out = pw(attn_sum, P["pws"][1], P["pbs"][1])
    out = pw(attn_out * u, P["pws"][2], P["pbs"][2])
    return out + shortcut


# ----------------------------------------------------------------------------
if __name__ == "__main__":
    N, C, D, H, W = 2, 4, 8, 8, 8
    key = jax.random.PRNGKey(0)
    ks = jax.random.split(key, 16)

    def nrm(k, shape, s):
        return jax.random.normal(k, shape, jnp.float32) * s

    # Deterministic synthetic parameters (shapes follow the module's __init__,
    # stored in kernel layout: depthwise (kD,kH,kW,C), pointwise (C_in,C_out)).
    P = dict(
        w0=nrm(ks[0], (3, 3, 3, C), 0.15),    # conv0 depthwise 3x3x3
        b0=nrm(ks[1], (1, C), 0.05),
        ws7=nrm(ks[2], (3, 7, C), 0.20),      # conv0_1 / conv0_2 / conv0_3
        bs7=nrm(ks[3], (3, C), 0.05),
        ws11=nrm(ks[4], (3, 11, C), 0.15),    # conv1_1 / conv1_2 / conv1_3
        bs11=nrm(ks[5], (3, C), 0.05),
        ws21=nrm(ks[6], (3, 21, C), 0.10),    # conv2_1 / conv2_2 / conv2_3
        bs21=nrm(ks[7], (3, C), 0.05),
        pws=nrm(ks[8], (3, C, C), 0.30),      # proj_1, conv3, proj_2 (ci, co)
        pbs=nrm(ks[9], (3, C), 0.05),
    )

    x = nrm(ks[10], (N, D, H, W, C), 1.0)     # layout: NDHWC

    out = spatial_attention(x, P)
    jax.block_until_ready(out)

    ref = ref_forward(x, P)
    np.testing.assert_allclose(np.asarray(out), np.asarray(ref),
                               atol=2e-3, rtol=2e-3)
    print("KERNEL_OK")
</pallas_src>

<mosaic_0001>
module attributes {stable_mosaic.version = 11 : i64} {
  func.func @_spatial_attention_kernel(%arg0: i32, %arg1: memref<1x8x256xf32, #tpu.memory_space<vmem>>, %arg2: memref<165x256xf32, #tpu.memory_space<vmem>>, %arg3: memref<13x256xf32, #tpu.memory_space<vmem>>, %arg4: memref<1x8x256xf32, #tpu.memory_space<vmem>>) attributes {dimension_semantics = [#tpu.dimension_semantics<parallel>], iteration_bounds = array<i64: 2>, scalar_prefetch = 0 : i64, scratch_operands = 0 : i64, tpu.core_type = #tpu.core_type<tc>, window_params = [{transform_indices = @transform_0, window_bounds = array<i64: 1, 8, 256>}, {pipeline_mode = #tpu.pipeline_mode<synchronous>, transform_indices = @transform_1, window_bounds = array<i64: 165, 256>}, {pipeline_mode = #tpu.pipeline_mode<synchronous>, transform_indices = @transform_2, window_bounds = array<i64: 13, 256>}, {transform_indices = @transform_3, window_bounds = array<i64: 1, 8, 256>}]} {
    %c0 = arith.constant 0 : index
    %c0_0 = arith.constant 0 : index
    %c0_1 = arith.constant 0 : index
    %0 = vector.load %arg1[%c0, %c0_0, %c0_1] : memref<1x8x256xf32, #tpu.memory_space<vmem>>, vector<1x8x256xf32>
    %1 = vector.shape_cast %0 : vector<1x8x256xf32> to vector<8x256xf32>
    %2 = tpu.iota {dimensions = array<i32: 0>} : vector<8x1xi32>
    %c3_i32 = arith.constant 3 : i32
    %3 = tpu.dynamic_rotate %1 by %c3_i32 dim 1 : vector<8x256xf32>, i32 -> vector<8x256xf32>
    %c144 = arith.constant 144 : index
    %c0_2 = arith.constant 0 : index
    %4 = vector.load %arg2[%c144, %c0_2] : memref<165x256xf32, #tpu.memory_space<vmem>>, vector<1x256xf32>
    %5 = vector.broadcast %4 : vector<1x256xf32> to vector<8x256xf32>
    %6 = arith.mulf %3, %5 : vector<8x256xf32>
    %c2_i32 = arith.constant 2 : i32
    %7 = tpu.dynamic_rotate %1 by %c2_i32 dim 1 : vector<8x256xf32>, i32 -> vector<8x256xf32>
    %c145 = arith.constant 145 : index
    %c0_3 = arith.constant 0 : index
    %8 = vector.load %arg2[%c145, %c0_3] : memref<165x256xf32, #tpu.memory_space<vmem>>, vector<1x256xf32>
    %9 = vector.broadcast %8 : vector<1x256xf32> to vector<8x256xf32>
    %10 = arith.mulf %7, %9 : vector<8x256xf32>
    %11 = arith.addf %6, %10 : vector<8x256xf32>
    %c1_i32 = arith.constant 1 : i32
    %12 = tpu.dynamic_rotate %1 by %c1_i32 dim 1 : vector<8x256xf32>, i32 -> vector<8x256xf32>
    %c146 = arith.constant 146 : index
    %c0_4 = arith.constant 0 : index
    %13 = vector.load %arg2[%c146, %c0_4] : memref<165x256xf32, #tpu.memory_space<vmem>>, vector<1x256xf32>
    %14 = vector.broadcast %13 : vector<1x256xf32> to vector<8x256xf32>
    %15 = arith.mulf %12, %14 : vector<8x256xf32>
    %16 = arith.addf %11, %15 : vector<8x256xf32>
    %c147 = arith.constant 147 : index
    %c0_5 = arith.constant 0 : index
    %17 = vector.load %arg2[%c147, %c0_5] : memref<165x256xf32, #tpu.memory_space<vmem>>, vector<1x256xf32>
    %18 = vector.broadcast %17 : vector<1x256xf32> to vector<8x256xf32>
    %19 = arith.mulf %1, %18 : vector<8x256xf32>
    %20 = arith.addf %16, %19 : vector<8x256xf32>
    %c255_i32 = arith.constant 255 : i32
    %21 = tpu.dynamic_rotate %1 by %c255_i32 dim 1 : vector<8x256xf32>, i32 -> vector<8x256xf32>
    %c148 = arith.constant 148 : index
    %c0_6 = arith.constant 0 : index
    %22 = vector.load %arg2[%c148, %c0_6] : memref<165x256xf32, #tpu.memory_space<vmem>>, vector<1x256xf32>
    %23 = vector.broadcast %22 : vector<1x256xf32> to vector<8x256xf32>
    %24 = arith.mulf %21, %23 : vector<8x256xf32>
    %25 = arith.addf %20, %24 : vector<8x256xf32>
    %c254_i32 = arith.constant 254 : i32
    %26 = tpu.dynamic_rotate %1 by %c254_i32 dim 1 : vector<8x256xf32>, i32 -> vector<8x256xf32>
    %c149 = arith.constant 149 : index
    %c0_7 = arith.constant 0 : index
    %27 = vector.load %arg2[%c149, %c0_7] : memref<165x256xf32, #tpu.memory_space<vmem>>, vector<1x256xf32>
    %28 = vector.broadcast %27 : vector<1x256xf32> to vector<8x256xf32>
    %29 = arith.mulf %26, %28 : vector<8x256xf32>
    %30 = arith.addf %25, %29 : vector<8x256xf32>
    %c253_i32 = arith.constant 253 : i32
    %31 = tpu.dynamic_rotate %1 by %c253_i32 dim 1 : vector<8x256xf32>, i32 -> vector<8x256xf32>
    %c150 = arith.constant 150 : index
    %c0_8 = arith.constant 0 : index
    %32 = vector.load %arg2[%c150, %c0_8] : memref<165x256xf32, #tpu.memory_space<vmem>>, vector<1x256xf32>
    %33 = vector.broadcast %32 : vector<1x256xf32> to vector<8x256xf32>
    %34 = arith.mulf %31, %33 : vector<8x256xf32>
    %35 = arith.addf %30, %34 : vector<8x256xf32>
    %c10 = arith.constant 10 : index
    %c0_9 = arith.constant 0 : index
    %36 = vector.load %arg3[%c10, %c0_9] : memref<13x256xf32, #tpu.memory_space<vmem>>, vector<1x256xf32>
    %37 = vector.broadcast %36 : vector<1x256xf32> to vector<8x256xf32>
    %38 = arith.addf %35, %37 : vector<8x256xf32>
    %cst = arith.constant 5.000000e-01 : f32
    %39 = vector.broadcast %cst : f32 to vector<8x256xf32>
    %40 = arith.mulf %39, %38 : vector<8x256xf32>
    %cst_10 = arith.constant 0.707106769 : f32
    %41 = vector.broadcast %cst_10 : f32 to vector<8x256xf32>
    %42 = arith.mulf %38, %41 : vector<8x256xf32>
    %43 = math.absf %42 : vector<8x256xf32>
    %cst_11 = arith.constant 0.327591091 : f32
    %44 = vector.broadcast %cst_11 : f32 to vector<8x256xf32>
    %45 = arith.mulf %44, %43 : vector<8x256xf32>
    %cst_12 = arith.constant 1.000000e+00 : f32
    %46 = vector.broadcast %cst_12 : f32 to vector<8x256xf32>
    %47 = arith.addf %46, %45 : vector<8x256xf32>
    %cst_13 = arith.constant 1.000000e+00 : f32
    %48 = vector.broadcast %cst_13 : f32 to vector<8x256xf32>
    %49 = arith.divf %48, %47 : vector<8x256xf32>
    %cst_14 = arith.constant 1.06140542 : f32
    %50 = vector.broadcast %cst_14 : f32 to vector<8x256xf32>
    %51 = arith.mulf %50, %49 : vector<8x256xf32>
    %cst_15 = arith.constant -1.45315206 : f32
    %52 = vector.broadcast %cst_15 : f32 to vector<8x256xf32>
    %53 = arith.addf %51, %52 : vector<8x256xf32>
    %54 = arith.mulf %53, %49 : vector<8x256xf32>
    %cst_16 = arith.constant 1.42141378 : f32
    %55 = vector.broadcast %cst_16 : f32 to vector<8x256xf32>
    %56 = arith.addf %54, %55 : vector<8x256xf32>
    %57 = arith.mulf %56, %49 : vector<8x256xf32>
    %cst_17 = arith.constant -0.284496725 : f32
    %58 = vector.broadcast %cst_17 : f32 to vector<8x256xf32>
    %59 = arith.addf %57, %58 : vector<8x256xf32>
    %60 = arith.mulf %59, %49 : vector<8x256xf32>
    %cst_18 = arith.constant 0.254829586 : f32
    %61 = vector.broadcast %cst_18 : f32 to vector<8x256xf32>
    %62 = arith.addf %60, %61 : vector<8x256xf32>
    %63 = arith.mulf %62, %49 : vector<8x256xf32>
    %cst_19 = arith.constant 0.000000e+00 : f32
    %64 = vector.broadcast %cst_19 : f32 to vector<8x256xf32>
    %65 = arith.subf %64, %43 : vector<8x256xf32>
    %66 = arith.mulf %65, %43 : vector<8x256xf32>
    %67 = math.exp %66 : vector<8x256xf32>
    %68 = arith.mulf %63, %67 : vector<8x256xf32>
    %cst_20 = arith.constant 1.000000e+00 : f32
    %69 = vector.broadcast %cst_20 : f32 to vector<8x256xf32>
    %70 = arith.subf %69, %68 : vector<8x256xf32>
    %cst_21 = arith.constant 0.000000e+00 : f32
    %71 = vector.broadcast %cst_21 : f32 to vector<8x256xf32>
    %72 = arith.cmpf oge, %42, %71 : vector<8x256xf32>
    %cst_22 = arith.constant 0.000000e+00 : f32
    %73 = vector.broadcast %cst_22 : f32 to vector<8x256xf32>
    %74 = arith.subf %73, %70 : vector<8x256xf32>
    %75 = arith.select %72, %70, %74 : vector<8x256xi1>, vector<8x256xf32>
    %cst_23 = arith.constant 1.000000e+00 : f32
    %76 = vector.broadcast %cst_23 : f32 to vector<8x256xf32>
    %77 = arith.addf %76, %75 : vector<8x256xf32>
    %78 = arith.mulf %40, %77 : vector<8x256xf32>
    %c1_i32_24 = arith.constant 1 : i32
    %79 = tpu.dynamic_rotate %78 by %c1_i32_24 dim 0 : vector<8x256xf32>, i32 -> vector<8x256xf32>
    %c36_i32 = arith.constant 36 : i32
    %80 = tpu.dynamic_rotate %79 by %c36_i32 dim 1 : vector<8x256xf32>, i32 -> vector<8x256xf32>
    %c0_25 = arith.constant 0 : index
    %c0_26 = arith.constant 0 : index
    %81 = vector.load %arg2[%c0_25, %c0_26] : memref<165x256xf32, #tpu.memory_space<vmem>>, vector<1x256xf32>
    %82 = vector.broadcast %81 : vector<1x256xf32> to vector<8x256xf32>
    %83 = arith.mulf %80, %82 : vector<8x256xf32>
    %c32_i32 = arith.constant 32 : i32
    %84 = tpu.dynamic_rotate %79 by %c32_i32 dim 1 : vector<8x256xf32>, i32 -> vector<8x256xf32>
    %c1 = arith.constant 1 : index
    %c0_27 = arith.constant 0 : index
    %85 = vector.load %arg2[%c1, %c0_27] : memref<165x256xf32, #tpu.memory_space<vmem>>, vector<1x256xf32>
    %86 = vector.broadcast %85 : vector<1x256xf32> to vector<8x256xf32>
    %87 = arith.mulf %84, %86 : vector<8x256xf32>
    %88 = arith.addf %83, %87 : vector<8x256xf32>
    %c28_i32 = arith.constant 28 : i32
    %89 = tpu.dynamic_rotate %79 by %c28_i32 dim 1 : vector<8x256xf32>, i32 -> vector<8x256xf32>
    %c2 = arith.constant 2 : index
    %c0_28 = arith.constant 0 : index
    %90 = vector.load %arg2[%c2, %c0_28] : memref<165x256xf32, #tpu.memory_space<vmem>>, vector<1x256xf32>
    %91 = vector.broadcast %90 : vector<1x256xf32> to vector<8x256xf32>
    %92 = arith.mulf %89, %91 : vector<8x256xf32>
    %93 = arith.addf %88, %92 : vector<8x256xf32>
    %c4_i32 = arith.constant 4 : i32
    %94 = tpu.dynamic_rotate %79 by %c4_i32 dim 1 : vector<8x256xf32>, i32 -> vector<8x256xf32>
    %c3 = arith.constant 3 : index
    %c0_29 = arith.constant 0 : index
    %95 = vector.load %arg2[%c3, %c0_29] : memref<165x256xf32, #tpu.memory_space<vmem>>, vector<1x256xf32>
    %96 = vector.broadcast %95 : vector<1x256xf32> to vector<8x256xf32>
    %97 = arith.mulf %94, %96 : vector<8x256xf32>
    %98 = arith.addf %93, %97 : vector<8x256xf32>
    %c4 = arith.constant 4 : index
    %c0_30 = arith.constant 0 : index
    %99 = vector.load %arg2[%c4, %c0_30] : memref<165x256xf32, #tpu.memory_space<vmem>>, vector<1x256xf32>
    %100 = vector.broadcast %99 : vector<1x256xf32> to vector<8x256xf32>
    %101 = arith.mulf %79, %100 : vector<8x256xf32>
    %102 = arith.addf %98, %101 : vector<8x256xf32>
    %c252_i32 = arith.constant 252 : i32
    %103 = tpu.dynamic_rotate %79 by %c252_i32 dim 1 : vector<8x256xf32>, i32 -> vector<8x256xf32>
    %c5 = arith.constant 5 : index
    %c0_31 = arith.constant 0 : index
    %104 = vector.load %arg2[%c5, %c0_31] : memref<165x256xf32, #tpu.memory_space<vmem>>, vector<1x256xf32>
    %105 = vector.broadcast %104 : vector<1x256xf32> to vector<8x256xf32>
    %106 = arith.mulf %103, %105 : vector<8x256xf32>
    %107 = arith.addf %102, %106 : vector<8x256xf32>
    %c228_i32 = arith.constant 228 : i32
    %108 = tpu.dynamic_rotate %79 by %c228_i32 dim 1 : vector<8x256xf32>, i32 -> vector<8x256xf32>
    %c6 = arith.constant 6 : index
    %c0_32 = arith.constant 0 : index
    %109 = vector.load %arg2[%c6, %c0_32] : memref<165x256xf32, #tpu.memory_space<vmem>>, vector<1x256xf32>
    %110 = vector.broadcast %109 : vector<1x256xf32> to vector<8x256xf32>
    %111 = arith.mulf %108, %110 : vector<8x256xf32>
    %112 = arith.addf %107, %111 : vector<8x256xf32>
    %c224_i32 = arith.constant 224 : i32
    %113 = tpu.dynamic_rotate %79 by %c224_i32 dim 1 : vector<8x256xf32>, i32 -> vector<8x256xf32>
    %c7 = arith.constant 7 : index
    %c0_33 = arith.constant 0 : index
    %114 = vector.load %arg2[%c7, %c0_33] : memref<165x256xf32, #tpu.memory_space<vmem>>, vector<1x256xf32>
    %115 = vector.broadcast %114 : vector<1x256xf32> to vector<8x256xf32>
    %116 = arith.mulf %113, %115 : vector<8x256xf32>
    %117 = arith.addf %112, %116 : vector<8x256xf32>
    %c220_i32 = arith.constant 220 : i32
    %118 = tpu.dynamic_rotate %79 by %c220_i32 dim 1 : vector<8x256xf32>, i32 -> vector<8x256xf32>
    %c8 = arith.constant 8 : index
    %c0_34 = arith.constant 0 : index
    %119 = vector.load %arg2[%c8, %c0_34] : memref<165x256xf32, #tpu.memory_space<vmem>>, vector<1x256xf32>
    %120 = vector.broadcast %119 : vector<1x256xf32> to vector<8x256xf32>
    %121 = arith.mulf %118, %120 : vector<8x256xf32>
    %122 = arith.addf %117, %121 : vector<8x256xf32>
    %c-1_i32 = arith.constant -1 : i32
    %123 = vector.broadcast %c-1_i32 : i32 to vector<8x1xi32>
    %124 = arith.addi %2, %123 : vector<8x1xi32>
    %c0_i32 = arith.constant 0 : i32
    %125 = vector.broadcast %c0_i32 : i32 to vector<8x1xi32>
    %126 = arith.cmpi sge, %124, %125 : vector<8x1xi32>
    %c-1_i32_35 = arith.constant -1 : i32
    %127 = vector.broadcast %c-1_i32_35 : i32 to vector<8x1xi32>
    %128 = arith.addi %2, %127 : vector<8x1xi32>
    %c8_i32 = arith.constant 8 : i32
    %129 = vector.broadcast %c8_i32 : i32 to vector<8x1xi32>
    %130 = arith.cmpi slt, %128, %129 : vector<8x1xi32>
    %131 = arith.andi %126, %130 : vector<8x1xi1>
    %132 = arith.extui %131 : vector<8x1xi1> to vector<8x1xi32>
    %133 = arith.sitofp %132 : vector<8x1xi32> to vector<8x1xf32>
    %134 = vector.broadcast %133 : vector<8x1xf32> to vector<8x256xf32>
    %135 = arith.mulf %122, %134 : vector<8x256xf32>
    %c36_i32_36 = arith.constant 36 : i32
    %136 = tpu.dynamic_rotate %78 by %c36_i32_36 dim 1 : vector<8x256xf32>, i32 -> vector<8x256xf32>
    %c9 = arith.constant 9 : index
    %c0_37 = arith.constant 0 : index
    %137 = vector.load %arg2[%c9, %c0_37] : memref<165x256xf32, #tpu.memory_space<vmem>>, vector<1x256xf32>
    %138 = vector.broadcast %137 : vector<1x256xf32> to vector<8x256xf32>
    %139 = arith.mulf %136, %138 : vector<8x256xf32>
    %c32_i32_38 = arith.constant 32 : i32
    %140 = tpu.dynamic_rotate %78 by %c32_i32_38 dim 1 : vector<8x256xf32>, i32 -> vector<8x256xf32>
    %c10_39 = arith.constant 10 : index
    %c0_40 = arith.constant 0 : index
    %141 = vector.load %arg2[%c10_39, %c0_40] : memref<165x256xf32, #tpu.memory_space<vmem>>, vector<1x256xf32>
    %142 = vector.broadcast %141 : vector<1x256xf32> to vector<8x256xf32>
    %143 = arith.mulf %140, %142 : vector<8x256xf32>
    %144 = arith.addf %139, %143 : vector<8x256xf32>
    %c28_i32_41 = arith.constant 28 : i32
    %145 = tpu.dynamic_rotate %78 by %c28_i32_41 dim 1 : vector<8x256xf32>, i32 -> vector<8x256xf32>
    %c11 = arith.constant 11 : index
    %c0_42 = arith.constant 0 : index
    %146 = vector.load %arg2[%c11, %c0_42] : memref<165x256xf32, #tpu.memory_space<vmem>>, vector<1x256xf32>
    %147 = vector.broadcast %146 : vector<1x256xf32> to vector<8x256xf32>
    %148 = arith.mulf %145, %147 : vector<8x256xf32>
    %149 = arith.addf %144, %148 : vector<8x256xf32>
    %c4_i32_43 = arith.constant 4 : i32
    %150 = tpu.dynamic_rotate %78 by %c4_i32_43 dim 1 : vector<8x256xf32>, i32 -> vector<8x256xf32>
    %c12 = arith.constant 12 : index
    %c0_44 = arith.constant 0 : index
    %151 = vector.load %arg2[%c12, %c0_44] : memref<165x256xf32, #tpu.memory_space<vmem>>, vector<1x256xf32>
    %152 = vector.broadcast %151 : vector<1x256xf32> to vector<8x256xf32>
    %153 = arith.mulf %150, %152 : vector<8x256xf32>
    %154 = arith.addf %149, %153 : vector<8x256xf32>
    %c13 = arith.constant 13 : index
    %c0_45 = arith.constant 0 : index
    %155 = vector.load %arg2[%c13, %c0_45] : memref<165x256xf32, #tpu.memory_space<vmem>>, vector<1x256xf32>
    %156 = vector.broadcast %155 : vector<1x256xf32> to vector<8x256xf32>
    %157 = arith.mulf %78, %156 : vector<8x256xf32>
    %158 = arith.addf %154, %157 : vector<8x256xf32>
    %c252_i32_46 = arith.constant 252 : i32
    %159 = tpu.dynamic_rotate %78 by %c252_i32_46 dim 1 : vector<8x256xf32>, i32 -> vector<8x256xf32>
    %c14 = arith.constant 14 : index
    %c0_47 = arith.constant 0 : index
    %160 = vector.load %arg2[%c14, %c0_47] : memref<165x256xf32, #tpu.memory_space<vmem>>, vector<1x256xf32>
    %161 = vector.broadcast %160 : vector<1x256xf32> to vector<8x256xf32>
    %162 = arith.mulf %159, %161 : vector<8x256xf32>
    %163 = arith.addf %158, %162 : vector<8x256xf32>
    %c228_i32_48 = arith.constant 228 : i32
    %164 = tpu.dynamic_rotate %78 by %c228_i32_48 dim 1 : vector<8x256xf32>, i32 -> vector<8x256xf32>
    %c15 = arith.constant 15 : index
    %c0_49 = arith.constant 0 : index
    %165 = vector.load %arg2[%c15, %c0_49] : memref<165x256xf32, #tpu.memory_space<vmem>>, vector<1x256xf32>
    %166 = vector.broadcast %165 : vector<1x256xf32> to vector<8x256xf32>
    %167 = arith.mulf %164, %166 : vector<8x256xf32>
    %168 = arith.addf %163, %167 : vector<8x256xf32>
    %c224_i32_50 = arith.constant 224 : i32
    %169 = tpu.dynamic_rotate %78 by %c224_i32_50 dim 1 : vector<8x256xf32>, i32 -> vector<8x256xf32>
    %c16 = arith.constant 16 : index
    %c0_51 = arith.constant 0 : index
    %170 = vector.load %arg2[%c16, %c0_51] : memref<165x256xf32, #tpu.memory_space<vmem>>, vector<1x256xf32>
    %171 = vector.broadcast %170 : vector<1x256xf32> to vector<8x256xf32>
    %172 = arith.mulf %169, %171 : vector<8x256xf32>
    %173 = arith.addf %168, %172 : vector<8x256xf32>
    %c220_i32_52 = arith.constant 220 : i32
    %174 = tpu.dynamic_rotate %78 by %c220_i32_52 dim 1 : vector<8x256xf32>, i32 -> vector<8x256xf32>
    %c17 = arith.constant 17 : index
    %c0_53 = arith.constant 0 : index
    %175 = vector.load %arg2[%c17, %c0_53] : memref<165x256xf32, #tpu.memory_space<vmem>>, vector<1x256xf32>
    %176 = vector.broadcast %175 : vector<1x256xf32> to vector<8x256xf32>
    %177 = arith.mulf %174, %176 : vector<8x256xf32>
    %178 = arith.addf %173, %177 : vector<8x256xf32>
    %179 = arith.addf %135, %178 : vector<8x256xf32>
    %c7_i32 = arith.constant 7 : i32
    %180 = tpu.dynamic_rotate %78 by %c7_i32 dim 0 : vector<8x256xf32>, i32 -> vector<8x256xf32>
    %c36_i32_54 = arith.constant 36 : i32
    %181 = tpu.dynamic_rotate %180 by %c36_i32_54 dim 1 : vector<8x256xf32>, i32 -> vector<8x256xf32>
    %c18 = arith.constant 18 : index
    %c0_55 = arith.constant 0 : index
    %182 = vector.load %arg2[%c18, %c0_55] : memref<165x256xf32, #tpu.memory_space<vmem>>, vector<1x256xf32>
    %183 = vector.broadcast %182 : vector<1x256xf32> to vector<8x256xf32>
    %184 = arith.mulf %181, %183 : vector<8x256xf32>
    %c32_i32_56 = arith.constant 32 : i32
    %185 = tpu.dynamic_rotate %180 by %c32_i32_56 dim 1 : vector<8x256xf32>, i32 -> vector<8x256xf32>
    %c19 = arith.constant 19 : index
    %c0_57 = arith.constant 0 : index
    %186 = vector.load %arg2[%c19, %c0_57] : memref<165x256xf32, #tpu.memory_space<vmem>>, vector<1x256xf32>
    %187 = vector.broadcast %186 : vector<1x256xf32> to vector<8x256xf32>
    %188 = arith.mulf %185, %187 : vector<8x256xf32>
    %189 = arith.addf %184, %188 : vector<8x256xf32>
    %c28_i32_58 = arith.constant 28 : i32
    %190 = tpu.dynamic_rotate %180 by %c28_i32_58 dim 1 : vector<8x256xf32>, i32 -> vector<8x256xf32>
    %c20 = arith.constant 20 : index
    %c0_59 = arith.constant 0 : index
    %191 = vector.load %arg2[%c20, %c0_59] : memref<165x256xf32, #tpu.memory_space<vmem>>, vector<1x256xf32>
    %192 = vector.broadcast %191 : vector<1x256xf32> to vector<8x256xf32>
    %193 = arith.mulf %190, %192 : vector<8x256xf32>
    %194 = arith.addf %189, %193 : vector<8x256xf32>
    %c4_i32_60 = arith.constant 4 : i32
    %195 = tpu.dynamic_rotate %180 by %c4_i32_60 dim 1 : vector<8x256xf32>, i32 -> vector<8x256xf32>
    %c21 = arith.constant 21 : index
    %c0_61 = arith.constant 0 : index
    %196 = vector.load %arg2[%c21, %c0_61] : memref<165x256xf32, #tpu.memory_space<vmem>>, vector<1x256xf32>
    %197 = vector.broadcast %196 : vector<1x256xf32> to vector<8x256xf32>
    %198 = arith.mulf %195, %197 : vector<8x256xf32>
    %199 = arith.addf %194, %198 : vector<8x256xf32>
    %c22 = arith.constant 22 : index
    %c0_62 = arith.constant 0 : index
    %200 = vector.load %arg2[%c22, %c0_62] : memref<165x256xf32, #tpu.memory_space<vmem>>, vector<1x256xf32>
    %201 = vector.broadcast %200 : vector<1x256xf32> to vector<8x256xf32>
    %202 = arith.mulf %180, %201 : vector<8x256xf32>
    %203 = arith.addf %199, %202 : vector<8x256xf32>
    %c252_i32_63 = arith.constant 252 : i32
    %204 = tpu.dynamic_rotate %180 by %c252_i32_63 dim 1 : vector<8x256xf32>, i32 -> vector<8x256xf32>
    %c23 = arith.constant 23 : index
    %c0_64 = arith.constant 0 : index
    %205 = vector.load %arg2[%c23, %c0_64] : memref<165x256xf32, #tpu.memory_space<vmem>>, vector<1x256xf32>
    %206 = vector.broadcast %205 : vector<1x256xf32> to vector<8x256xf32>
    %207 = arith.mulf %204, %206 : vector<8x256xf32>
    %208 = arith.addf %203, %207 : vector<8x256xf32>
    %c228_i32_65 = arith.constant 228 : i32
    %209 = tpu.dynamic_rotate %180 by %c228_i32_65 dim 1 : vector<8x256xf32>, i32 -> vector<8x256xf32>
    %c24 = arith.constant 24 : index
    %c0_66 = arith.constant 0 : index
    %210 = vector.load %arg2[%c24, %c0_66] : memref<165x256xf32, #tpu.memory_space<vmem>>, vector<1x256xf32>
    %211 = vector.broadcast %210 : vector<1x256xf32> to vector<8x256xf32>
    %212 = arith.mulf %209, %211 : vector<8x256xf32>
    %213 = arith.addf %208, %212 : vector<8x256xf32>
    %c224_i32_67 = arith.constant 224 : i32
    %214 = tpu.dynamic_rotate %180 by %c224_i32_67 dim 1 : vector<8x256xf32>, i32 -> vector<8x256xf32>
    %c25 = arith.constant 25 : index
    %c0_68 = arith.constant 0 : index
    %215 = vector.load %arg2[%c25, %c0_68] : memref<165x256xf32, #tpu.memory_space<vmem>>, vector<1x256xf32>
    %216 = vector.broadcast %215 : vector<1x256xf32> to vector<8x256xf32>
    %217 = arith.mulf %214, %216 : vector<8x256xf32>
    %218 = arith.addf %213, %217 : vector<8x256xf32>
    %c220_i32_69 = arith.constant 220 : i32
    %219 = tpu.dynamic_rotate %180 by %c220_i32_69 dim 1 : vector<8x256xf32>, i32 -> vector<8x256xf32>
    %c26 = arith.constant 26 : index
    %c0_70 = arith.constant 0 : index
    %220 = vector.load %arg2[%c26, %c0_70] : memref<165x256xf32, #tpu.memory_space<vmem>>, vector<1x256xf32>
    %221 = vector.broadcast %220 : vector<1x256xf32> to vector<8x256xf32>
    %222 = arith.mulf %219, %221 : vector<8x256xf32>
    %223 = arith.addf %218, %222 : vector<8x256xf32>
    %c1_i32_71 = arith.constant 1 : i32
    %224 = vector.broadcast %c1_i32_71 : i32 to vector<8x1xi32>
    %225 = arith.addi %2, %224 : vector<8x1xi32>
    %c0_i32_72 = arith.constant 0 : i32
    %226 = vector.broadcast %c0_i32_72 : i32 to vector<8x1xi32>
    %227 = arith.cmpi sge, %225, %226 : vector<8x1xi32>
    %c1_i32_73 = arith.constant 1 : i32
    %228 = vector.broadcast %c1_i32_73 : i32 to vector<8x1xi32>
    %229 = arith.addi %2, %228 : vector<8x1xi32>
    %c8_i32_74 = arith.constant 8 : i32
    %230 = vector.broadcast %c8_i32_74 : i32 to vector<8x1xi32>
    %231 = arith.cmpi slt, %229, %230 : vector<8x1xi32>
    %232 = arith.andi %227, %231 : vector<8x1xi1>
    %233 = arith.extui %232 : vector<8x1xi1> to vector<8x1xi32>
    %234 = arith.sitofp %233 : vector<8x1xi32> to vector<8x1xf32>
    %235 = vector.broadcast %234 : vector<8x1xf32> to vector<8x256xf32>
    %236 = arith.mulf %223, %235 : vector<8x256xf32>
    %237 = arith.addf %179, %236 : vector<8x256xf32>
    %c0_75 = arith.constant 0 : index
    %c0_76 = arith.constant 0 : index
    %238 = vector.load %arg3[%c0_75, %c0_76] : memref<13x256xf32, #tpu.memory_space<vmem>>, vector<1x256xf32>
    %239 = vector.broadcast %238 : vector<1x256xf32> to vector<8x256xf32>
    %240 = arith.addf %237, %239 : vector<8x256xf32>
    %c12_i32 = arith.constant 12 : i32
    %241 = tpu.dynamic_rotate %240 by %c12_i32 dim 1 : vector<8x256xf32>, i32 -> vector<8x256xf32>
    %c27 = arith.constant 27 : index
    %c0_77 = arith.constant 0 : index
    %242 = vector.load %arg2[%c27, %c0_77] : memref<165x256xf32, #tpu.memory_space<vmem>>, vector<1x256xf32>
    %243 = vector.broadcast %242 : vector<1x256xf32> to vector<8x256xf32>
    %244 = arith.mulf %241, %243 : vector<8x256xf32>
    %c8_i32_78 = arith.constant 8 : i32
    %245 = tpu.dynamic_rotate %240 by %c8_i32_78 dim 1 : vector<8x256xf32>, i32 -> vector<8x256xf32>
    %c28 = arith.constant 28 : index
    %c0_79 = arith.constant 0 : index
    %246 = vector.load %arg2[%c28, %c0_79] : memref<165x256xf32, #tpu.memory_space<vmem>>, vector<1x256xf32>
    %247 = vector.broadcast %246 : vector<1x256xf32> to vector<8x256xf32>
    %248 = arith.mulf %245, %247 : vector<8x256xf32>
    %249 = arith.addf %244, %248 : vector<8x256xf32>
    %c4_i32_80 = arith.constant 4 : i32
    %250 = tpu.dynamic_rotate %240 by %c4_i32_80 dim 1 : vector<8x256xf32>, i32 -> vector<8x256xf32>
    %c29 = arith.constant 29 : index
    %c0_81 = arith.constant 0 : index
    %251 = vector.load %arg2[%c29, %c0_81] : memref<165x256xf32, #tpu.memory_space<vmem>>, vector<1x256xf32>
    %252 = vector.broadcast %251 : vector<1x256xf32> to vector<8x256xf32>
    %253 = arith.mulf %250, %252 : vector<8x256xf32>
    %254 = arith.addf %249, %253 : vector<8x256xf32>
    %c30 = arith.constant 30 : index
    %c0_82 = arith.constant 0 : index
    %255 = vector.load %arg2[%c30, %c0_82] : memref<165x256xf32, #tpu.memory_space<vmem>>, vector<1x256xf32>
    %256 = vector.broadcast %255 : vector<1x256xf32> to vector<8x256xf32>
    %257 = arith.mulf %240, %256 : vector<8x256xf32>
    %258 = arith.addf %254, %257 : vector<8x256xf32>
    %c252_i32_83 = arith.constant 252 : i32
    %259 = tpu.dynamic_rotate %240 by %c252_i32_83 dim 1 : vector<8x256xf32>, i32 -> vector<8x256xf32>
    %c31 = arith.constant 31 : index
    %c0_84 = arith.constant 0 : index
    %260 = vector.load %arg2[%c31, %c0_84] : memref<165x256xf32, #tpu.memory_space<vmem>>, vector<1x256xf32>
    %261 = vector.broadcast %260 : vector<1x256xf32> to vector<8x256xf32>
    %262 = arith.mulf %259, %261 : vector<8x256xf32>
    %263 = arith.addf %258, %262 : vector<8x256xf32>
    %c248_i32 = arith.constant 248 : i32
    %264 = tpu.dynamic_rotate %240 by %c248_i32 dim 1 : vector<8x256xf32>, i32 -> vector<8x256xf32>
    %c32 = arith.constant 32 : index
    %c0_85 = arith.constant 0 : index
    %265 = vector.load %arg2[%c32, %c0_85] : memref<165x256xf32, #tpu.memory_space<vmem>>, vector<1x256xf32>
    %266 = vector.broadcast %265 : vector<1x256xf32> to vector<8x256xf32>
    %267 = arith.mulf %264, %266 : vector<8x256xf32>
    %268 = arith.addf %263, %267 : vector<8x256xf32>
    %c244_i32 = arith.constant 244 : i32
    %269 = tpu.dynamic_rotate %240 by %c244_i32 dim 1 : vector<8x256xf32>, i32 -> vector<8x256xf32>
    %c33 = arith.constant 33 : index
    %c0_86 = arith.constant 0 : index
    %270 = vector.load %arg2[%c33, %c0_86] : memref<165x256xf32, #tpu.memory_space<vmem>>, vector<1x256xf32>
    %271 = vector.broadcast %270 : vector<1x256xf32> to vector<8x256xf32>
    %272 = arith.mulf %269, %271 : vector<8x256xf32>
    %273 = arith.addf %268, %272 : vector<8x256xf32>
    %c1_87 = arith.constant 1 : index
    %c0_88 = arith.constant 0 : index
    %274 = vector.load %arg3[%c1_87, %c0_88] : memref<13x256xf32, #tpu.memory_space<vmem>>, vector<1x256xf32>
    %275 = vector.broadcast %274 : vector<1x256xf32> to vector<8x256xf32>
    %276 = arith.addf %273, %275 : vector<8x256xf32>
    %c3_i32_89 = arith.constant 3 : i32
    %277 = tpu.dynamic_rotate %276 by %c3_i32_89 dim 0 : vector<8x256xf32>, i32 -> vector<8x256xf32>
    %c34 = arith.constant 34 : index
    %c0_90 = arith.constant 0 : index
    %278 = vector.load %arg2[%c34, %c0_90] : memref<165x256xf32, #tpu.memory_space<vmem>>, vector<1x256xf32>
    %279 = vector.broadcast %278 : vector<1x256xf32> to vector<8x256xf32>
    %280 = arith.mulf %277, %279 : vector<8x256xf32>
    %c-3_i32 = arith.constant -3 : i32
    %281 = vector.broadcast %c-3_i32 : i32 to vector<8x1xi32>
    %282 = arith.addi %2, %281 : vector<8x1xi32>
    %c0_i32_91 = arith.constant 0 : i32
    %283 = vector.broadcast %c0_i32_91 : i32 to vector<8x1xi32>
    %284 = arith.cmpi sge, %282, %283 : vector<8x1xi32>
    %c-3_i32_92 = arith.constant -3 : i32
    %285 = vector.broadcast %c-3_i32_92 : i32 to vector<8x1xi32>
    %286 = arith.addi %2, %285 : vector<8x1xi32>
    %c8_i32_93 = arith.constant 8 : i32
    %287 = vector.broadcast %c8_i32_93 : i32 to vector<8x1xi32>
    %288 = arith.cmpi slt, %286, %287 : vector<8x1xi32>
    %289 = arith.andi %284, %288 : vector<8x1xi1>
    %290 = arith.extui %289 : vector<8x1xi1> to vector<8x1xi32>
    %291 = arith.sitofp %290 : vector<8x1xi32> to vector<8x1xf32>
    %292 = vector.broadcast %291 : vector<8x1xf32> to vector<8x256xf32>
    %293 = arith.mulf %280, %292 : vector<8x256xf32>
    %c2_i32_94 = arith.constant 2 : i32
    %294 = tpu.dynamic_rotate %276 by %c2_i32_94 dim 0 : vector<8x256xf32>, i32 -> vector<8x256xf32>
    %c35 = arith.constant 35 : index
    %c0_95 = arith.constant 0 : index
    %295 = vector.load %arg2[%c35, %c0_95] : memref<165x256xf32, #tpu.memory_space<vmem>>, vector<1x256xf32>
    %296 = vector.broadcast %295 : vector<1x256xf32> to vector<8x256xf32>
    %297 = arith.mulf %294, %296 : vector<8x256xf32>
    %c-2_i32 = arith.constant -2 : i32
    %298 = vector.broadcast %c-2_i32 : i32 to vector<8x1xi32>
    %299 = arith.addi %2, %298 : vector<8x1xi32>
    %c0_i32_96 = arith.constant 0 : i32
    %300 = vector.broadcast %c0_i32_96 : i32 to vector<8x1xi32>
    %301 = arith.cmpi sge, %299, %300 : vector<8x1xi32>
    %c-2_i32_97 = arith.constant -2 : i32
    %302 = vector.broadcast %c-2_i32_97 : i32 to vector<8x1xi32>
    %303 = arith.addi %2, %302 : vector<8x1xi32>
    %c8_i32_98 = arith.constant 8 : i32
    %304 = vector.broadcast %c8_i32_98 : i32 to vector<8x1xi32>
    %305 = arith.cmpi slt, %303, %304 : vector<8x1xi32>
    %306 = arith.andi %301, %305 : vector<8x1xi1>
    %307 = arith.extui %306 : vector<8x1xi1> to vector<8x1xi32>
    %308 = arith.sitofp %307 : vector<8x1xi32> to vector<8x1xf32>
    %309 = vector.broadcast %308 : vector<8x1xf32> to vector<8x256xf32>
    %310 = arith.mulf %297, %309 : vector<8x256xf32>
    %311 = arith.addf %293, %310 : vector<8x256xf32>
    %c1_i32_99 = arith.constant 1 : i32
    %312 = tpu.dynamic_rotate %276 by %c1_i32_99 dim 0 : vector<8x256xf32>, i32 -> vector<8x256xf32>
    %c36 = arith.constant 36 : index
    %c0_100 = arith.constant 0 : index
    %313 = vector.load %arg2[%c36, %c0_100] : memref<165x256xf32, #tpu.memory_space<vmem>>, vector<1x256xf32>
    %314 = vector.broadcast %313 : vector<1x256xf32> to vector<8x256xf32>
    %315 = arith.mulf %312, %314 : vector<8x256xf32>
    %316 = vector.broadcast %133 : vector<8x1xf32> to vector<8x256xf32>
    %317 = arith.mulf %315, %316 : vector<8x256xf32>
    %318 = arith.addf %311, %317 : vector<8x256xf32>
    %c37 = arith.constant 37 : index
    %c0_101 = arith.constant 0 : index
    %319 = vector.load %arg2[%c37, %c0_101] : memref<165x256xf32, #tpu.memory_space<vmem>>, vector<1x256xf32>
    %320 = vector.broadcast %319 : vector<1x256xf32> to vector<8x256xf32>
    %321 = arith.mulf %276, %320 : vector<8x256xf32>
    %322 = arith.addf %318, %321 : vector<8x256xf32>
    %c7_i32_102 = arith.constant 7 : i32
    %323 = tpu.dynamic_rotate %276 by %c7_i32_102 dim 0 : vector<8x256xf32>, i32 -> vector<8x256xf32>
    %c38 = arith.constant 38 : index
    %c0_103 = arith.constant 0 : index
    %324 = vector.load %arg2[%c38, %c0_103] : memref<165x256xf32, #tpu.memory_space<vmem>>, vector<1x256xf32>
    %325 = vector.broadcast %324 : vector<1x256xf32> to vector<8x256xf32>
    %326 = arith.mulf %323, %325 : vector<8x256xf32>
    %327 = vector.broadcast %234 : vector<8x1xf32> to vector<8x256xf32>
    %328 = arith.mulf %326, %327 : vector<8x256xf32>
    %329 = arith.addf %322, %328 : vector<8x256xf32>
    %c6_i32 = arith.constant 6 : i32
    %330 = tpu.dynamic_rotate %276 by %c6_i32 dim 0 : vector<8x256xf32>, i32 -> vector<8x256xf32>
    %c39 = arith.constant 39 : index
    %c0_104 = arith.constant 0 : index
    %331 = vector.load %arg2[%c39, %c0_104] : memref<165x256xf32, #tpu.memory_space<vmem>>, vector<1x256xf32>
    %332 = vector.broadcast %331 : vector<1x256xf32> to vector<8x256xf32>
    %333 = arith.mulf %330, %332 : vector<8x256xf32>
    %c2_i32_105 = arith.constant 2 : i32
    %334 = vector.broadcast %c2_i32_105 : i32 to vector<8x1xi32>
    %335 = arith.addi %2, %334 : vector<8x1xi32>
    %c0_i32_106 = arith.constant 0 : i32
    %336 = vector.broadcast %c0_i32_106 : i32 to vector<8x1xi32>
    %337 = arith.cmpi sge, %335, %336 : vector<8x1xi32>
    %c2_i32_107 = arith.constant 2 : i32
    %338 = vector.broadcast %c2_i32_107 : i32 to vector<8x1xi32>
    %339 = arith.addi %2, %338 : vector<8x1xi32>
    %c8_i32_108 = arith.constant 8 : i32
    %340 = vector.broadcast %c8_i32_108 : i32 to vector<8x1xi32>
    %341 = arith.cmpi slt, %339, %340 : vector<8x1xi32>
    %342 = arith.andi %337, %341 : vector<8x1xi1>
    %343 = arith.extui %342 : vector<8x1xi1> to vector<8x1xi32>
    %344 = arith.sitofp %343 : vector<8x1xi32> to vector<8x1xf32>
    %345 = vector.broadcast %344 : vector<8x1xf32> to vector<8x256xf32>
    %346 = arith.mulf %333, %345 : vector<8x256xf32>
    %347 = arith.addf %329, %346 : vector<8x256xf32>
    %c5_i32 = arith.constant 5 : i32
    %348 = tpu.dynamic_rotate %276 by %c5_i32 dim 0 : vector<8x256xf32>, i32 -> vector<8x256xf32>
    %c40 = arith.constant 40 : index
    %c0_109 = arith.constant 0 : index
    %349 = vector.load %arg2[%c40, %c0_109] : memref<165x256xf32, #tpu.memory_space<vmem>>, vector<1x256xf32>
    %350 = vector.broadcast %349 : vector<1x256xf32> to vector<8x256xf32>
    %351 = arith.mulf %348, %350 : vector<8x256xf32>
    %c3_i32_110 = arith.constant 3 : i32
    %352 = vector.broadcast %c3_i32_110 : i32 to vector<8x1xi32>
    %353 = arith.addi %2, %352 : vector<8x1xi32>
    %c0_i32_111 = arith.constant 0 : i32
    %354 = vector.broadcast %c0_i32_111 : i32 to vector<8x1xi32>
    %355 = arith.cmpi sge, %353, %354 : vector<8x1xi32>
    %c3_i32_112 = arith.constant 3 : i32
    %356 = vector.broadcast %c3_i32_112 : i32 to vector<8x1xi32>
    %357 = arith.addi %2, %356 : vector<8x1xi32>
    %c8_i32_113 = arith.constant 8 : i32
    %358 = vector.broadcast %c8_i32_113 : i32 to vector<8x1xi32>
    %359 = arith.cmpi slt, %357, %358 : vector<8x1xi32>
    %360 = arith.andi %355, %359 : vector<8x1xi1>
    %361 = arith.extui %360 : vector<8x1xi1> to vector<8x1xi32>
    %362 = arith.sitofp %361 : vector<8x1xi32> to vector<8x1xf32>
    %363 = vector.broadcast %362 : vector<8x1xf32> to vector<8x256xf32>
    %364 = arith.mulf %351, %363 : vector<8x256xf32>
    %365 = arith.addf %347, %364 : vector<8x256xf32>
    %c2_114 = arith.constant 2 : index
    %c0_115 = arith.constant 0 : index
    %366 = vector.load %arg3[%c2_114, %c0_115] : memref<13x256xf32, #tpu.memory_space<vmem>>, vector<1x256xf32>
    %367 = vector.broadcast %366 : vector<1x256xf32> to vector<8x256xf32>
    %368 = arith.addf %365, %367 : vector<8x256xf32>
    %c96_i32 = arith.constant 96 : i32
    %369 = tpu.dynamic_rotate %368 by %c96_i32 dim 1 : vector<8x256xf32>, i32 -> vector<8x256xf32>
    %c41 = arith.constant 41 : index
    %c0_116 = arith.constant 0 : index
    %370 = vector.load %arg2[%c41, %c0_116] : memref<165x256xf32, #tpu.memory_space<vmem>>, vector<1x256xf32>
    %371 = vector.broadcast %370 : vector<1x256xf32> to vector<8x256xf32>
    %372 = arith.mulf %369, %371 : vector<8x256xf32>
    %c64_i32 = arith.constant 64 : i32
    %373 = tpu.dynamic_rotate %368 by %c64_i32 dim 1 : vector<8x256xf32>, i32 -> vector<8x256xf32>
    %c42 = arith.constant 42 : index
    %c0_117 = arith.constant 0 : index
    %374 = vector.load %arg2[%c42, %c0_117] : memref<165x256xf32, #tpu.memory_space<vmem>>, vector<1x256xf32>
    %375 = vector.broadcast %374 : vector<1x256xf32> to vector<8x256xf32>
    %376 = arith.mulf %373, %375 : vector<8x256xf32>
    %377 = arith.addf %372, %376 : vector<8x256xf32>
    %c32_i32_118 = arith.constant 32 : i32
    %378 = tpu.dynamic_rotate %368 by %c32_i32_118 dim 1 : vector<8x256xf32>, i32 -> vector<8x256xf32>
    %c43 = arith.constant 43 : index
    %c0_119 = arith.constant 0 : index
    %379 = vector.load %arg2[%c43, %c0_119] : memref<165x256xf32, #tpu.memory_space<vmem>>, vector<1x256xf32>
    %380 = vector.broadcast %379 : vector<1x256xf32> to vector<8x256xf32>
    %381 = arith.mulf %378, %380 : vector<8x256xf32>
    %382 = arith.addf %377, %381 : vector<8x256xf32>
    %c44 = arith.constant 44 : index
    %c0_120 = arith.constant 0 : index
    %383 = vector.load %arg2[%c44, %c0_120] : memref<165x256xf32, #tpu.memory_space<vmem>>, vector<1x256xf32>
    %384 = vector.broadcast %383 : vector<1x256xf32> to vector<8x256xf32>
    %385 = arith.mulf %368, %384 : vector<8x256xf32>
    %386 = arith.addf %382, %385 : vector<8x256xf32>
    %c224_i32_121 = arith.constant 224 : i32
    %387 = tpu.dynamic_rotate %368 by %c224_i32_121 dim 1 : vector<8x256xf32>, i32 -> vector<8x256xf32>
    %c45 = arith.constant 45 : index
    %c0_122 = arith.constant 0 : index
    %388 = vector.load %arg2[%c45, %c0_122] : memref<165x256xf32, #tpu.memory_space<vmem>>, vector<1x256xf32>
    %389 = vector.broadcast %388 : vector<1x256xf32> to vector<8x256xf32>
    %390 = arith.mulf %387, %389 : vector<8x256xf32>
    %391 = arith.addf %386, %390 : vector<8x256xf32>
    %c192_i32 = arith.constant 192 : i32
    %392 = tpu.dynamic_rotate %368 by %c192_i32 dim 1 : vector<8x256xf32>, i32 -> vector<8x256xf32>
    %c46 = arith.constant 46 : index
    %c0_123 = arith.constant 0 : index
    %393 = vector.load %arg2[%c46, %c0_123] : memref<165x256xf32, #tpu.memory_space<vmem>>, vector<1x256xf32>
    %394 = vector.broadcast %393 : vector<1x256xf32> to vector<8x256xf32>
    %395 = arith.mulf %392, %394 : vector<8x256xf32>
    %396 = arith.addf %391, %395 : vector<8x256xf32>
    %c160_i32 = arith.constant 160 : i32
    %397 = tpu.dynamic_rotate %368 by %c160_i32 dim 1 : vector<8x256xf32>, i32 -> vector<8x256xf32>
    %c47 = arith.constant 47 : index
    %c0_124 = arith.constant 0 : index
    %398 = vector.load %arg2[%c47, %c0_124] : memref<165x256xf32, #tpu.memory_space<vmem>>, vector<1x256xf32>
    %399 = vector.broadcast %398 : vector<1x256xf32> to vector<8x256xf32>
    %400 = arith.mulf %397, %399 : vector<8x256xf32>
    %401 = arith.addf %396, %400 : vector<8x256xf32>
    %c3_125 = arith.constant 3 : index
    %c0_126 = arith.constant 0 : index
    %402 = vector.load %arg3[%c3_125, %c0_126] : memref<13x256xf32, #tpu.memory_space<vmem>>, vector<1x256xf32>
    %403 = vector.broadcast %402 : vector<1x256xf32> to vector<8x256xf32>
    %404 = arith.addf %401, %403 : vector<8x256xf32>
    %405 = arith.addf %240, %404 : vector<8x256xf32>
    %c20_i32 = arith.constant 20 : i32
    %406 = tpu.dynamic_rotate %240 by %c20_i32 dim 1 : vector<8x256xf32>, i32 -> vector<8x256xf32>
    %c48 = arith.constant 48 : index
    %c0_127 = arith.constant 0 : index
    %407 = vector.load %arg2[%c48, %c0_127] : memref<165x256xf32, #tpu.memory_space<vmem>>, vector<1x256xf32>
    %408 = vector.broadcast %407 : vector<1x256xf32> to vector<8x256xf32>
    %409 = arith.mulf %406, %408 : vector<8x256xf32>
    %c16_i32 = arith.constant 16 : i32
    %410 = tpu.dynamic_rotate %240 by %c16_i32 dim 1 : vector<8x256xf32>, i32 -> vector<8x256xf32>
    %c49 = arith.constant 49 : index
    %c0_128 = arith.constant 0 : index
    %411 = vector.load %arg2[%c49, %c0_128] : memref<165x256xf32, #tpu.memory_space<vmem>>, vector<1x256xf32>
    %412 = vector.broadcast %411 : vector<1x256xf32> to vector<8x256xf32>
    %413 = arith.mulf %410, %412 : vector<8x256xf32>
    %414 = arith.addf %409, %413 : vector<8x256xf32>
    %c12_i32_129 = arith.constant 12 : i32
    %415 = tpu.dynamic_rotate %240 by %c12_i32_129 dim 1 : vector<8x256xf32>, i32 -> vector<8x256xf32>
    %c50 = arith.constant 50 : index
    %c0_130 = arith.constant 0 : index
    %416 = vector.load %arg2[%c50, %c0_130] : memref<165x256xf32, #tpu.memory_space<vmem>>, vector<1x256xf32>
    %417 = vector.broadcast %416 : vector<1x256xf32> to vector<8x256xf32>
    %418 = arith.mulf %415, %417 : vector<8x256xf32>
    %419 = arith.addf %414, %418 : vector<8x256xf32>
    %c8_i32_131 = arith.constant 8 : i32
    %420 = tpu.dynamic_rotate %240 by %c8_i32_131 dim 1 : vector<8x256xf32>, i32 -> vector<8x256xf32>
    %c51 = arith.constant 51 : index
    %c0_132 = arith.constant 0 : index
    %421 = vector.load %arg2[%c51, %c0_132] : memref<165x256xf32, #tpu.memory_space<vmem>>, vector<1x256xf32>
    %422 = vector.broadcast %421 : vector<1x256xf32> to vector<8x256xf32>
    %423 = arith.mulf %420, %422 : vector<8x256xf32>
    %424 = arith.addf %419, %423 : vector<8x256xf32>
    %c4_i32_133 = arith.constant 4 : i32
    %425 = tpu.dynamic_rotate %240 by %c4_i32_133 dim 1 : vector<8x256xf32>, i32 -> vector<8x256xf32>
    %c52 = arith.constant 52 : index
    %c0_134 = arith.constant 0 : index
    %426 = vector.load %arg2[%c52, %c0_134] : memref<165x256xf32, #tpu.memory_space<vmem>>, vector<1x256xf32>
    %427 = vector.broadcast %426 : vector<1x256xf32> to vector<8x256xf32>
    %428 = arith.mulf %425, %427 : vector<8x256xf32>
    %429 = arith.addf %424, %428 : vector<8x256xf32>
    %c53 = arith.constant 53 : index
    %c0_135 = arith.constant 0 : index
    %430 = vector.load %arg2[%c53, %c0_135] : memref<165x256xf32, #tpu.memory_space<vmem>>, vector<1x256xf32>
    %431 = vector.broadcast %430 : vector<1x256xf32> to vector<8x256xf32>
    %432 = arith.mulf %240, %431 : vector<8x256xf32>
    %433 = arith.addf %429, %432 : vector<8x256xf32>
    %c252_i32_136 = arith.constant 252 : i32
    %434 = tpu.dynamic_rotate %240 by %c252_i32_136 dim 1 : vector<8x256xf32>, i32 -> vector<8x256xf32>
    %c54 = arith.constant 54 : index
    %c0_137 = arith.constant 0 : index
    %435 = vector.load %arg2[%c54, %c0_137] : memref<165x256xf32, #tpu.memory_space<vmem>>, vector<1x256xf32>
    %436 = vector.broadcast %435 : vector<1x256xf32> to vector<8x256xf32>
    %437 = arith.mulf %434, %436 : vector<8x256xf32>
    %438 = arith.addf %433, %437 : vector<8x256xf32>
    %c248_i32_138 = arith.constant 248 : i32
    %439 = tpu.dynamic_rotate %240 by %c248_i32_138 dim 1 : vector<8x256xf32>, i32 -> vector<8x256xf32>
    %c55 = arith.constant 55 : index
    %c0_139 = arith.constant 0 : index
    %440 = vector.load %arg2[%c55, %c0_139] : memref<165x256xf32, #tpu.memory_space<vmem>>, vector<1x256xf32>
    %441 = vector.broadcast %440 : vector<1x256xf32> to vector<8x256xf32>
    %442 = arith.mulf %439, %441 : vector<8x256xf32>
    %443 = arith.addf %438, %442 : vector<8x256xf32>
    %c244_i32_140 = arith.constant 244 : i32
    %444 = tpu.dynamic_rotate %240 by %c244_i32_140 dim 1 : vector<8x256xf32>, i32 -> vector<8x256xf32>
    %c56 = arith.constant 56 : index
    %c0_141 = arith.constant 0 : index
    %445 = vector.load %arg2[%c56, %c0_141] : memref<165x256xf32, #tpu.memory_space<vmem>>, vector<1x256xf32>
    %446 = vector.broadcast %445 : vector<1x256xf32> to vector<8x256xf32>
    %447 = arith.mulf %444, %446 : vector<8x256xf32>
    %448 = arith.addf %443, %447 : vector<8x256xf32>
    %c240_i32 = arith.constant 240 : i32
    %449 = tpu.dynamic_rotate %240 by %c240_i32 dim 1 : vector<8x256xf32>, i32 -> vector<8x256xf32>
    %c57 = arith.constant 57 : index
    %c0_142 = arith.constant 0 : index
    %450 = vector.load %arg2[%c57, %c0_142] : memref<165x256xf32, #tpu.memory_space<vmem>>, vector<1x256xf32>
    %451 = vector.broadcast %450 : vector<1x256xf32> to vector<8x256xf32>
    %452 = arith.mulf %449, %451 : vector<8x256xf32>
    %453 = arith.addf %448, %452 : vector<8x256xf32>
    %c236_i32 = arith.constant 236 : i32
    %454 = tpu.dynamic_rotate %240 by %c236_i32 dim 1 : vector<8x256xf32>, i32 -> vector<8x256xf32>
    %c58 = arith.constant 58 : index
    %c0_143 = arith.constant 0 : index
    %455 = vector.load %arg2[%c58, %c0_143] : memref<165x256xf32, #tpu.memory_space<vmem>>, vector<1x256xf32>
    %456 = vector.broadcast %455 : vector<1x256xf32> to vector<8x256xf32>
    %457 = arith.mulf %454, %456 : vector<8x256xf32>
    %458 = arith.addf %453, %457 : vector<8x256xf32>
    %c4_144 = arith.constant 4 : index
    %c0_145 = arith.constant 0 : index
    %459 = vector.load %arg3[%c4_144, %c0_145] : memref<13x256xf32, #tpu.memory_space<vmem>>, vector<1x256xf32>
    %460 = vector.broadcast %459 : vector<1x256xf32> to vector<8x256xf32>
    %461 = arith.addf %458, %460 : vector<8x256xf32>
    %c5_i32_146 = arith.constant 5 : i32
    %462 = tpu.dynamic_rotate %461 by %c5_i32_146 dim 0 : vector<8x256xf32>, i32 -> vector<8x256xf32>
    %c59 = arith.constant 59 : index
    %c0_147 = arith.constant 0 : index
    %463 = vector.load %arg2[%c59, %c0_147] : memref<165x256xf32, #tpu.memory_space<vmem>>, vector<1x256xf32>
    %464 = vector.broadcast %463 : vector<1x256xf32> to vector<8x256xf32>
    %465 = arith.mulf %462, %464 : vector<8x256xf32>
    %c-5_i32 = arith.constant -5 : i32
    %466 = vector.broadcast %c-5_i32 : i32 to vector<8x1xi32>
    %467 = arith.addi %2, %466 : vector<8x1xi32>
    %c0_i32_148 = arith.constant 0 : i32
    %468 = vector.broadcast %c0_i32_148 : i32 to vector<8x1xi32>
    %469 = arith.cmpi sge, %467, %468 : vector<8x1xi32>
    %c-5_i32_149 = arith.constant -5 : i32
    %470 = vector.broadcast %c-5_i32_149 : i32 to vector<8x1xi32>
    %471 = arith.addi %2, %470 : vector<8x1xi32>
    %c8_i32_150 = arith.constant 8 : i32
    %472 = vector.broadcast %c8_i32_150 : i32 to vector<8x1xi32>
    %473 = arith.cmpi slt, %471, %472 : vector<8x1xi32>
    %474 = arith.andi %469, %473 : vector<8x1xi1>
    %475 = arith.extui %474 : vector<8x1xi1> to vector<8x1xi32>
    %476 = arith.sitofp %475 : vector<8x1xi32> to vector<8x1xf32>
    %477 = vector.broadcast %476 : vector<8x1xf32> to vector<8x256xf32>
    %478 = arith.mulf %465, %477 : vector<8x256xf32>
    %c4_i32_151 = arith.constant 4 : i32
    %479 = tpu.dynamic_rotate %461 by %c4_i32_151 dim 0 : vector<8x256xf32>, i32 -> vector<8x256xf32>
    %c60 = arith.constant 60 : index
    %c0_152 = arith.constant 0 : index
    %480 = vector.load %arg2[%c60, %c0_152] : memref<165x256xf32, #tpu.memory_space<vmem>>, vector<1x256xf32>
    %481 = vector.broadcast %480 : vector<1x256xf32> to vector<8x256xf32>
    %482 = arith.mulf %479, %481 : vector<8x256xf32>
    %c-4_i32 = arith.constant -4 : i32
    %483 = vector.broadcast %c-4_i32 : i32 to vector<8x1xi32>
    %484 = arith.addi %2, %483 : vector<8x1xi32>
    %c0_i32_153 = arith.constant 0 : i32
    %485 = vector.broadcast %c0_i32_153 : i32 to vector<8x1xi32>
    %486 = arith.cmpi sge, %484, %485 : vector<8x1xi32>
    %c-4_i32_154 = arith.constant -4 : i32
    %487 = vector.broadcast %c-4_i32_154 : i32 to vector<8x1xi32>
    %488 = arith.addi %2, %487 : vector<8x1xi32>
    %c8_i32_155 = arith.constant 8 : i32
    %489 = vector.broadcast %c8_i32_155 : i32 to vector<8x1xi32>
    %490 = arith.cmpi slt, %488, %489 : vector<8x1xi32>
    %491 = arith.andi %486, %490 : vector<8x1xi1>
    %492 = arith.extui %491 : vector<8x1xi1> to vector<8x1xi32>
    %493 = arith.sitofp %492 : vector<8x1xi32> to vector<8x1xf32>
    %494 = vector.broadcast %493 : vector<8x1xf32> to vector<8x256xf32>
    %495 = arith.mulf %482, %494 : vector<8x256xf32>
    %496 = arith.addf %478, %495 : vector<8x256xf32>
    %c3_i32_156 = arith.constant 3 : i32
    %497 = tpu.dynamic_rotate %461 by %c3_i32_156 dim 0 : vector<8x256xf32>, i32 -> vector<8x256xf32>
    %c61 = arith.constant 61 : index
    %c0_157 = arith.constant 0 : index
    %498 = vector.load %arg2[%c61, %c0_157] : memref<165x256xf32, #tpu.memory_space<vmem>>, vector<1x256xf32>
    %499 = vector.broadcast %498 : vector<1x256xf32> to vector<8x256xf32>
    %500 = arith.mulf %497, %499 : vector<8x256xf32>
    %501 = vector.broadcast %291 : vector<8x1xf32> to vector<8x256xf32>
    %502 = arith.mulf %500, %501 : vector<8x256xf32>
    %503 = arith.addf %496, %502 : vector<8x256xf32>
    %c2_i32_158 = arith.constant 2 : i32
    %504 = tpu.dynamic_rotate %461 by %c2_i32_158 dim 0 : vector<8x256xf32>, i32 -> vector<8x256xf32>
    %c62 = arith.constant 62 : index
    %c0_159 = arith.constant 0 : index
    %505 = vector.load %arg2[%c62, %c0_159] : memref<165x256xf32, #tpu.memory_space<vmem>>, vector<1x256xf32>
    %506 = vector.broadcast %505 : vector<1x256xf32> to vector<8x256xf32>
    %507 = arith.mulf %504, %506 : vector<8x256xf32>
    %508 = vector.broadcast %308 : vector<8x1xf32> to vector<8x256xf32>
    %509 = arith.mulf %507, %508 : vector<8x256xf32>
    %510 = arith.addf %503, %509 : vector<8x256xf32>
    %c1_i32_160 = arith.constant 1 : i32
    %511 = tpu.dynamic_rotate %461 by %c1_i32_160 dim 0 : vector<8x256xf32>, i32 -> vector<8x256xf32>
    %c63 = arith.constant 63 : index
    %c0_161 = arith.constant 0 : index
    %512 = vector.load %arg2[%c63, %c0_161] : memref<165x256xf32, #tpu.memory_space<vmem>>, vector<1x256xf32>
    %513 = vector.broadcast %512 : vector<1x256xf32> to vector<8x256xf32>
    %514 = arith.mulf %511, %513 : vector<8x256xf32>
    %515 = vector.broadcast %133 : vector<8x1xf32> to vector<8x256xf32>
    %516 = arith.mulf %514, %515 : vector<8x256xf32>
    %517 = arith.addf %510, %516 : vector<8x256xf32>
    %c64 = arith.constant 64 : index
    %c0_162 = arith.constant 0 : index
    %518 = vector.load %arg2[%c64, %c0_162] : memref<165x256xf32, #tpu.memory_space<vmem>>, vector<1x256xf32>
    %519 = vector.broadcast %518 : vector<1x256xf32> to vector<8x256xf32>
    %520 = arith.mulf %461, %519 : vector<8x256xf32>
    %521 = arith.addf %517, %520 : vector<8x256xf32>
    %c7_i32_163 = arith.constant 7 : i32
    %522 = tpu.dynamic_rotate %461 by %c7_i32_163 dim 0 : vector<8x256xf32>, i32 -> vector<8x256xf32>
    %c65 = arith.constant 65 : index
    %c0_164 = arith.constant 0 : index
    %523 = vector.load %arg2[%c65, %c0_164] : memref<165x256xf32, #tpu.memory_space<vmem>>, vector<1x256xf32>
    %524 = vector.broadcast %523 : vector<1x256xf32> to vector<8x256xf32>
    %525 = arith.mulf %522, %524 : vector<8x256xf32>
    %526 = vector.broadcast %234 : vector<8x1xf32> to vector<8x256xf32>
    %527 = arith.mulf %525, %526 : vector<8x256xf32>
    %528 = arith.addf %521, %527 : vector<8x256xf32>
    %c6_i32_165 = arith.constant 6 : i32
    %529 = tpu.dynamic_rotate %461 by %c6_i32_165 dim 0 : vector<8x256xf32>, i32 -> vector<8x256xf32>
    %c66 = arith.constant 66 : index
    %c0_166 = arith.constant 0 : index
    %530 = vector.load %arg2[%c66, %c0_166] : memref<165x256xf32, #tpu.memory_space<vmem>>, vector<1x256xf32>
    %531 = vector.broadcast %530 : vector<1x256xf32> to vector<8x256xf32>
    %532 = arith.mulf %529, %531 : vector<8x256xf32>
    %533 = vector.broadcast %344 : vector<8x1xf32> to vector<8x256xf32>
    %534 = arith.mulf %532, %533 : vector<8x256xf32>
    %535 = arith.addf %528, %534 : vector<8x256xf32>
    %c5_i32_167 = arith.constant 5 : i32
    %536 = tpu.dynamic_rotate %461 by %c5_i32_167 dim 0 : vector<8x256xf32>, i32 -> vector<8x256xf32>
    %c67 = arith.constant 67 : index
    %c0_168 = arith.constant 0 : index
    %537 = vector.load %arg2[%c67, %c0_168] : memref<165x256xf32, #tpu.memory_space<vmem>>, vector<1x256xf32>
    %538 = vector.broadcast %537 : vector<1x256xf32> to vector<8x256xf32>
    %539 = arith.mulf %536, %538 : vector<8x256xf32>
    %540 = vector.broadcast %362 : vector<8x1xf32> to vector<8x256xf32>
    %541 = arith.mulf %539, %540 : vector<8x256xf32>
    %542 = arith.addf %535, %541 : vector<8x256xf32>
    %c4_i32_169 = arith.constant 4 : i32
    %543 = tpu.dynamic_rotate %461 by %c4_i32_169 dim 0 : vector<8x256xf32>, i32 -> vector<8x256xf32>
    %c68 = arith.constant 68 : index
    %c0_170 = arith.constant 0 : index
    %544 = vector.load %arg2[%c68, %c0_170] : memref<165x256xf32, #tpu.memory_space<vmem>>, vector<1x256xf32>
    %545 = vector.broadcast %544 : vector<1x256xf32> to vector<8x256xf32>
    %546 = arith.mulf %543, %545 : vector<8x256xf32>
    %c4_i32_171 = arith.constant 4 : i32
    %547 = vector.broadcast %c4_i32_171 : i32 to vector<8x1xi32>
    %548 = arith.addi %2, %547 : vector<8x1xi32>
    %c0_i32_172 = arith.constant 0 : i32
    %549 = vector.broadcast %c0_i32_172 : i32 to vector<8x1xi32>
    %550 = arith.cmpi sge, %548, %549 : vector<8x1xi32>
    %c4_i32_173 = arith.constant 4 : i32
    %551 = vector.broadcast %c4_i32_173 : i32 to vector<8x1xi32>
    %552 = arith.addi %2, %551 : vector<8x1xi32>
    %c8_i32_174 = arith.constant 8 : i32
    %553 = vector.broadcast %c8_i32_174 : i32 to vector<8x1xi32>
    %554 = arith.cmpi slt, %552, %553 : vector<8x1xi32>
    %555 = arith.andi %550, %554 : vector<8x1xi1>
    %556 = arith.extui %555 : vector<8x1xi1> to vector<8x1xi32>
    %557 = arith.sitofp %556 : vector<8x1xi32> to vector<8x1xf32>
    %558 = vector.broadcast %557 : vector<8x1xf32> to vector<8x256xf32>
    %559 = arith.mulf %546, %558 : vector<8x256xf32>
    %560 = arith.addf %542, %559 : vector<8x256xf32>
    %c3_i32_175 = arith.constant 3 : i32
    %561 = tpu.dynamic_rotate %461 by %c3_i32_175 dim 0 : vector<8x256xf32>, i32 -> vector<8x256xf32>
    %c69 = arith.constant 69 : index
    %c0_176 = arith.constant 0 : index
    %562 = vector.load %arg2[%c69, %c0_176] : memref<165x256xf32, #tpu.memory_space<vmem>>, vector<1x256xf32>
    %563 = vector.broadcast %562 : vector<1x256xf32> to vector<8x256xf32>
    %564 = arith.mulf %561, %563 : vector<8x256xf32>
    %c5_i32_177 = arith.constant 5 : i32
    %565 = vector.broadcast %c5_i32_177 : i32 to vector<8x1xi32>
    %566 = arith.addi %2, %565 : vector<8x1xi32>
    %c0_i32_178 = arith.constant 0 : i32
    %567 = vector.broadcast %c0_i32_178 : i32 to vector<8x1xi32>
    %568 = arith.cmpi sge, %566, %567 : vector<8x1xi32>
    %c5_i32_179 = arith.constant 5 : i32
    %569 = vector.broadcast %c5_i32_179 : i32 to vector<8x1xi32>
    %570 = arith.addi %2, %569 : vector<8x1xi32>
    %c8_i32_180 = arith.constant 8 : i32
    %571 = vector.broadcast %c8_i32_180 : i32 to vector<8x1xi32>
    %572 = arith.cmpi slt, %570, %571 : vector<8x1xi32>
    %573 = arith.andi %568, %572 : vector<8x1xi1>
    %574 = arith.extui %573 : vector<8x1xi1> to vector<8x1xi32>
    %575 = arith.sitofp %574 : vector<8x1xi32> to vector<8x1xf32>
    %576 = vector.broadcast %575 : vector<8x1xf32> to vector<8x256xf32>
    %577 = arith.mulf %564, %576 : vector<8x256xf32>
    %578 = arith.addf %560, %577 : vector<8x256xf32>
    %c5_181 = arith.constant 5 : index
    %c0_182 = arith.constant 0 : index
    %579 = vector.load %arg3[%c5_181, %c0_182] : memref<13x256xf32, #tpu.memory_space<vmem>>, vector<1x256xf32>
    %580 = vector.broadcast %579 : vector<1x256xf32> to vector<8x256xf32>
    %581 = arith.addf %578, %580 : vector<8x256xf32>
    %c160_i32_183 = arith.constant 160 : i32
    %582 = tpu.dynamic_rotate %581 by %c160_i32_183 dim 1 : vector<8x256xf32>, i32 -> vector<8x256xf32>
    %c70 = arith.constant 70 : index
    %c0_184 = arith.constant 0 : index
    %583 = vector.load %arg2[%c70, %c0_184] : memref<165x256xf32, #tpu.memory_space<vmem>>, vector<1x256xf32>
    %584 = vector.broadcast %583 : vector<1x256xf32> to vector<8x256xf32>
    %585 = arith.mulf %582, %584 : vector<8x256xf32>
    %c128_i32 = arith.constant 128 : i32
    %586 = tpu.dynamic_rotate %581 by %c128_i32 dim 1 : vector<8x256xf32>, i32 -> vector<8x256xf32>
    %c71 = arith.constant 71 : index
    %c0_185 = arith.constant 0 : index
    %587 = vector.load %arg2[%c71, %c0_185] : memref<165x256xf32, #tpu.memory_space<vmem>>, vector<1x256xf32>
    %588 = vector.broadcast %587 : vector<1x256xf32> to vector<8x256xf32>
    %589 = arith.mulf %586, %588 : vector<8x256xf32>
    %590 = arith.addf %585, %589 : vector<8x256xf32>
    %c96_i32_186 = arith.constant 96 : i32
    %591 = tpu.dynamic_rotate %581 by %c96_i32_186 dim 1 : vector<8x256xf32>, i32 -> vector<8x256xf32>
    %c72 = arith.constant 72 : index
    %c0_187 = arith.constant 0 : index
    %592 = vector.load %arg2[%c72, %c0_187] : memref<165x256xf32, #tpu.memory_space<vmem>>, vector<1x256xf32>
    %593 = vector.broadcast %592 : vector<1x256xf32> to vector<8x256xf32>
    %594 = arith.mulf %591, %593 : vector<8x256xf32>
    %595 = arith.addf %590, %594 : vector<8x256xf32>
    %c64_i32_188 = arith.constant 64 : i32
    %596 = tpu.dynamic_rotate %581 by %c64_i32_188 dim 1 : vector<8x256xf32>, i32 -> vector<8x256xf32>
    %c73 = arith.constant 73 : index
    %c0_189 = arith.constant 0 : index
    %597 = vector.load %arg2[%c73, %c0_189] : memref<165x256xf32, #tpu.memory_space<vmem>>, vector<1x256xf32>
    %598 = vector.broadcast %597 : vector<1x256xf32> to vector<8x256xf32>
    %599 = arith.mulf %596, %598 : vector<8x256xf32>
    %600 = arith.addf %595, %599 : vector<8x256xf32>
    %c32_i32_190 = arith.constant 32 : i32
    %601 = tpu.dynamic_rotate %581 by %c32_i32_190 dim 1 : vector<8x256xf32>, i32 -> vector<8x256xf32>
    %c74 = arith.constant 74 : index
    %c0_191 = arith.constant 0 : index
    %602 = vector.load %arg2[%c74, %c0_191] : memref<165x256xf32, #tpu.memory_space<vmem>>, vector<1x256xf32>
    %603 = vector.broadcast %602 : vector<1x256xf32> to vector<8x256xf32>
    %604 = arith.mulf %601, %603 : vector<8x256xf32>
    %605 = arith.addf %600, %604 : vector<8x256xf32>
    %c75 = arith.constant 75 : index
    %c0_192 = arith.constant 0 : index
    %606 = vector.load %arg2[%c75, %c0_192] : memref<165x256xf32, #tpu.memory_space<vmem>>, vector<1x256xf32>
    %607 = vector.broadcast %606 : vector<1x256xf32> to vector<8x256xf32>
    %608 = arith.mulf %581, %607 : vector<8x256xf32>
    %609 = arith.addf %605, %608 : vector<8x256xf32>
    %c224_i32_193 = arith.constant 224 : i32
    %610 = tpu.dynamic_rotate %581 by %c224_i32_193 dim 1 : vector<8x256xf32>, i32 -> vector<8x256xf32>
    %c76 = arith.constant 76 : index
    %c0_194 = arith.constant 0 : index
    %611 = vector.load %arg2[%c76, %c0_194] : memref<165x256xf32, #tpu.memory_space<vmem>>, vector<1x256xf32>
    %612 = vector.broadcast %611 : vector<1x256xf32> to vector<8x256xf32>
    %613 = arith.mulf %610, %612 : vector<8x256xf32>
    %614 = arith.addf %609, %613 : vector<8x256xf32>
    %c192_i32_195 = arith.constant 192 : i32
    %615 = tpu.dynamic_rotate %581 by %c192_i32_195 dim 1 : vector<8x256xf32>, i32 -> vector<8x256xf32>
    %c77 = arith.constant 77 : index
    %c0_196 = arith.constant 0 : index
    %616 = vector.load %arg2[%c77, %c0_196] : memref<165x256xf32, #tpu.memory_space<vmem>>, vector<1x256xf32>
    %617 = vector.broadcast %616 : vector<1x256xf32> to vector<8x256xf32>
    %618 = arith.mulf %615, %617 : vector<8x256xf32>
    %619 = arith.addf %614, %618 : vector<8x256xf32>
    %c160_i32_197 = arith.constant 160 : i32
    %620 = tpu.dynamic_rotate %581 by %c160_i32_197 dim 1 : vector<8x256xf32>, i32 -> vector<8x256xf32>
    %c78 = arith.constant 78 : index
    %c0_198 = arith.constant 0 : index
    %621 = vector.load %arg2[%c78, %c0_198] : memref<165x256xf32, #tpu.memory_space<vmem>>, vector<1x256xf32>
    %622 = vector.broadcast %621 : vector<1x256xf32> to vector<8x256xf32>
    %623 = arith.mulf %620, %622 : vector<8x256xf32>
    %624 = arith.addf %619, %623 : vector<8x256xf32>
    %c128_i32_199 = arith.constant 128 : i32
    %625 = tpu.dynamic_rotate %581 by %c128_i32_199 dim 1 : vector<8x256xf32>, i32 -> vector<8x256xf32>
    %c79 = arith.constant 79 : index
    %c0_200 = arith.constant 0 : index
    %626 = vector.load %arg2[%c79, %c0_200] : memref<165x256xf32, #tpu.memory_space<vmem>>, vector<1x256xf32>
    %627 = vector.broadcast %626 : vector<1x256xf32> to vector<8x256xf32>
    %628 = arith.mulf %625, %627 : vector<8x256xf32>
    %629 = arith.addf %624, %628 : vector<8x256xf32>
    %c96_i32_201 = arith.constant 96 : i32
    %630 = tpu.dynamic_rotate %581 by %c96_i32_201 dim 1 : vector<8x256xf32>, i32 -> vector<8x256xf32>
    %c80 = arith.constant 80 : index
    %c0_202 = arith.constant 0 : index
    %631 = vector.load %arg2[%c80, %c0_202] : memref<165x256xf32, #tpu.memory_space<vmem>>, vector<1x256xf32>
    %632 = vector.broadcast %631 : vector<1x256xf32> to vector<8x256xf32>
    %633 = arith.mulf %630, %632 : vector<8x256xf32>
    %634 = arith.addf %629, %633 : vector<8x256xf32>
    %c6_203 = arith.constant 6 : index
    %c0_204 = arith.constant 0 : index
    %635 = vector.load %arg3[%c6_203, %c0_204] : memref<13x256xf32, #tpu.memory_space<vmem>>, vector<1x256xf32>
    %636 = vector.broadcast %635 : vector<1x256xf32> to vector<8x256xf32>
    %637 = arith.addf %634, %636 : vector<8x256xf32>
    %638 = arith.addf %405, %637 : vector<8x256xf32>
    %c28_i32_205 = arith.constant 28 : i32
    %639 = tpu.dynamic_rotate %240 by %c28_i32_205 dim 1 : vector<8x256xf32>, i32 -> vector<8x256xf32>
    %c84 = arith.constant 84 : index
    %c0_206 = arith.constant 0 : index
    %640 = vector.load %arg2[%c84, %c0_206] : memref<165x256xf32, #tpu.memory_space<vmem>>, vector<1x256xf32>
    %641 = vector.broadcast %640 : vector<1x256xf32> to vector<8x256xf32>
    %642 = arith.mulf %639, %641 : vector<8x256xf32>
    %c24_i32 = arith.constant 24 : i32
    %643 = tpu.dynamic_rotate %240 by %c24_i32 dim 1 : vector<8x256xf32>, i32 -> vector<8x256xf32>
    %c85 = arith.constant 85 : index
    %c0_207 = arith.constant 0 : index
    %644 = vector.load %arg2[%c85, %c0_207] : memref<165x256xf32, #tpu.memory_space<vmem>>, vector<1x256xf32>
    %645 = vector.broadcast %644 : vector<1x256xf32> to vector<8x256xf32>
    %646 = arith.mulf %643, %645 : vector<8x256xf32>
    %647 = arith.addf %642, %646 : vector<8x256xf32>
    %c20_i32_208 = arith.constant 20 : i32
    %648 = tpu.dynamic_rotate %240 by %c20_i32_208 dim 1 : vector<8x256xf32>, i32 -> vector<8x256xf32>
    %c86 = arith.constant 86 : index
    %c0_209 = arith.constant 0 : index
    %649 = vector.load %arg2[%c86, %c0_209] : memref<165x256xf32, #tpu.memory_space<vmem>>, vector<1x256xf32>
    %650 = vector.broadcast %649 : vector<1x256xf32> to vector<8x256xf32>
    %651 = arith.mulf %648, %650 : vector<8x256xf32>
    %652 = arith.addf %647, %651 : vector<8x256xf32>
    %c16_i32_210 = arith.constant 16 : i32
    %653 = tpu.dynamic_rotate %240 by %c16_i32_210 dim 1 : vector<8x256xf32>, i32 -> vector<8x256xf32>
    %c87 = arith.constant 87 : index
    %c0_211 = arith.constant 0 : index
    %654 = vector.load %arg2[%c87, %c0_211] : memref<165x256xf32, #tpu.memory_space<vmem>>, vector<1x256xf32>
    %655 = vector.broadcast %654 : vector<1x256xf32> to vector<8x256xf32>
    %656 = arith.mulf %653, %655 : vector<8x256xf32>
    %657 = arith.addf %652, %656 : vector<8x256xf32>
    %c12_i32_212 = arith.constant 12 : i32
    %658 = tpu.dynamic_rotate %240 by %c12_i32_212 dim 1 : vector<8x256xf32>, i32 -> vector<8x256xf32>
    %c88 = arith.constant 88 : index
    %c0_213 = arith.constant 0 : index
    %659 = vector.load %arg2[%c88, %c0_213] : memref<165x256xf32, #tpu.memory_space<vmem>>, vector<1x256xf32>
    %660 = vector.broadcast %659 : vector<1x256xf32> to vector<8x256xf32>
    %661 = arith.mulf %658, %660 : vector<8x256xf32>
    %662 = arith.addf %657, %661 : vector<8x256xf32>
    %c8_i32_214 = arith.constant 8 : i32
    %663 = tpu.dynamic_rotate %240 by %c8_i32_214 dim 1 : vector<8x256xf32>, i32 -> vector<8x256xf32>
    %c89 = arith.constant 89 : index
    %c0_215 = arith.constant 0 : index
    %664 = vector.load %arg2[%c89, %c0_215] : memref<165x256xf32, #tpu.memory_space<vmem>>, vector<1x256xf32>
    %665 = vector.broadcast %664 : vector<1x256xf32> to vector<8x256xf32>
    %666 = arith.mulf %663, %665 : vector<8x256xf32>
    %667 = arith.addf %662, %666 : vector<8x256xf32>
    %c4_i32_216 = arith.constant 4 : i32
    %668 = tpu.dynamic_rotate %240 by %c4_i32_216 dim 1 : vector<8x256xf32>, i32 -> vector<8x256xf32>
    %c90 = arith.constant 90 : index
    %c0_217 = arith.constant 0 : index
    %669 = vector.load %arg2[%c90, %c0_217] : memref<165x256xf32, #tpu.memory_space<vmem>>, vector<1x256xf32>
    %670 = vector.broadcast %669 : vector<1x256xf32> to vector<8x256xf32>
    %671 = arith.mulf %668, %670 : vector<8x256xf32>
    %672 = arith.addf %667, %671 : vector<8x256xf32>
    %c91 = arith.constant 91 : index
    %c0_218 = arith.constant 0 : index
    %673 = vector.load %arg2[%c91, %c0_218] : memref<165x256xf32, #tpu.memory_space<vmem>>, vector<1x256xf32>
    %674 = vector.broadcast %673 : vector<1x256xf32> to vector<8x256xf32>
    %675 = arith.mulf %240, %674 : vector<8x256xf32>
    %676 = arith.addf %672, %675 : vector<8x256xf32>
    %c252_i32_219 = arith.constant 252 : i32
    %677 = tpu.dynamic_rotate %240 by %c252_i32_219 dim 1 : vector<8x256xf32>, i32 -> vector<8x256xf32>
    %c92 = arith.constant 92 : index
    %c0_220 = arith.constant 0 : index
    %678 = vector.load %arg2[%c92, %c0_220] : memref<165x256xf32, #tpu.memory_space<vmem>>, vector<1x256xf32>
    %679 = vector.broadcast %678 : vector<1x256xf32> to vector<8x256xf32>
    %680 = arith.mulf %677, %679 : vector<8x256xf32>
    %681 = arith.addf %676, %680 : vector<8x256xf32>
    %c248_i32_221 = arith.constant 248 : i32
    %682 = tpu.dynamic_rotate %240 by %c248_i32_221 dim 1 : vector<8x256xf32>, i32 -> vector<8x256xf32>
    %c93 = arith.constant 93 : index
    %c0_222 = arith.constant 0 : index
    %683 = vector.load %arg2[%c93, %c0_222] : memref<165x256xf32, #tpu.memory_space<vmem>>, vector<1x256xf32>
    %684 = vector.broadcast %683 : vector<1x256xf32> to vector<8x256xf32>
    %685 = arith.mulf %682, %684 : vector<8x256xf32>
    %686 = arith.addf %681, %685 : vector<8x256xf32>
    %c244_i32_223 = arith.constant 244 : i32
    %687 = tpu.dynamic_rotate %240 by %c244_i32_223 dim 1 : vector<8x256xf32>, i32 -> vector<8x256xf32>
    %c94 = arith.constant 94 : index
    %c0_224 = arith.constant 0 : index
    %688 = vector.load %arg2[%c94, %c0_224] : memref<165x256xf32, #tpu.memory_space<vmem>>, vector<1x256xf32>
    %689 = vector.broadcast %688 : vector<1x256xf32> to vector<8x256xf32>
    %690 = arith.mulf %687, %689 : vector<8x256xf32>
    %691 = arith.addf %686, %690 : vector<8x256xf32>
    %c240_i32_225 = arith.constant 240 : i32
    %692 = tpu.dynamic_rotate %240 by %c240_i32_225 dim 1 : vector<8x256xf32>, i32 -> vector<8x256xf32>
    %c95 = arith.constant 95 : index
    %c0_226 = arith.constant 0 : index
    %693 = vector.load %arg2[%c95, %c0_226] : memref<165x256xf32, #tpu.memory_space<vmem>>, vector<1x256xf32>
    %694 = vector.broadcast %693 : vector<1x256xf32> to vector<8x256xf32>
    %695 = arith.mulf %692, %694 : vector<8x256xf32>
    %696 = arith.addf %691, %695 : vector<8x256xf32>
    %c236_i32_227 = arith.constant 236 : i32
    %697 = tpu.dynamic_rotate %240 by %c236_i32_227 dim 1 : vector<8x256xf32>, i32 -> vector<8x256xf32>
    %c96 = arith.constant 96 : index
    %c0_228 = arith.constant 0 : index
    %698 = vector.load %arg2[%c96, %c0_228] : memref<165x256xf32, #tpu.memory_space<vmem>>, vector<1x256xf32>
    %699 = vector.broadcast %698 : vector<1x256xf32> to vector<8x256xf32>
    %700 = arith.mulf %697, %699 : vector<8x256xf32>
    %701 = arith.addf %696, %700 : vector<8x256xf32>
    %c232_i32 = arith.constant 232 : i32
    %702 = tpu.dynamic_rotate %240 by %c232_i32 dim 1 : vector<8x256xf32>, i32 -> vector<8x256xf32>
    %c97 = arith.constant 97 : index
    %c0_229 = arith.constant 0 : index
    %703 = vector.load %arg2[%c97, %c0_229] : memref<165x256xf32, #tpu.memory_space<vmem>>, vector<1x256xf32>
    %704 = vector.broadcast %703 : vector<1x256xf32> to vector<8x256xf32>
    %705 = arith.mulf %702, %704 : vector<8x256xf32>
    %706 = arith.addf %701, %705 : vector<8x256xf32>
    %c228_i32_230 = arith.constant 228 : i32
    %707 = tpu.dynamic_rotate %240 by %c228_i32_230 dim 1 : vector<8x256xf32>, i32 -> vector<8x256xf32>
    %c98 = arith.constant 98 : index
    %c0_231 = arith.constant 0 : index
    %708 = vector.load %arg2[%c98, %c0_231] : memref<165x256xf32, #tpu.memory_space<vmem>>, vector<1x256xf32>
    %709 = vector.broadcast %708 : vector<1x256xf32> to vector<8x256xf32>
    %710 = arith.mulf %707, %709 : vector<8x256xf32>
    %711 = arith.addf %706, %710 : vector<8x256xf32>
    %c7_232 = arith.constant 7 : index
    %c0_233 = arith.constant 0 : index
    %712 = vector.load %arg3[%c7_232, %c0_233] : memref<13x256xf32, #tpu.memory_space<vmem>>, vector<1x256xf32>
    %713 = vector.broadcast %712 : vector<1x256xf32> to vector<8x256xf32>
    %714 = arith.addf %711, %713 : vector<8x256xf32>
    %c7_i32_234 = arith.constant 7 : i32
    %715 = tpu.dynamic_rotate %714 by %c7_i32_234 dim 0 : vector<8x256xf32>, i32 -> vector<8x256xf32>
    %c105 = arith.constant 105 : index
    %c0_235 = arith.constant 0 : index
    %716 = vector.load %arg2[%c105, %c0_235] : memref<165x256xf32, #tpu.memory_space<vmem>>, vector<1x256xf32>
    %717 = vector.broadcast %716 : vector<1x256xf32> to vector<8x256xf32>
    %718 = arith.mulf %715, %717 : vector<8x256xf32>
    %c-7_i32 = arith.constant -7 : i32
    %719 = vector.broadcast %c-7_i32 : i32 to vector<8x1xi32>
    %720 = arith.addi %2, %719 : vector<8x1xi32>
    %c0_i32_236 = arith.constant 0 : i32
    %721 = vector.broadcast %c0_i32_236 : i32 to vector<8x1xi32>
    %722 = arith.cmpi sge, %720, %721 : vector<8x1xi32>
    %c-7_i32_237 = arith.constant -7 : i32
    %723 = vector.broadcast %c-7_i32_237 : i32 to vector<8x1xi32>
    %724 = arith.addi %2, %723 : vector<8x1xi32>
    %c8_i32_238 = arith.constant 8 : i32
    %725 = vector.broadcast %c8_i32_238 : i32 to vector<8x1xi32>
    %726 = arith.cmpi slt, %724, %725 : vector<8x1xi32>
    %727 = arith.andi %722, %726 : vector<8x1xi1>
    %728 = arith.extui %727 : vector<8x1xi1> to vector<8x1xi32>
    %729 = arith.sitofp %728 : vector<8x1xi32> to vector<8x1xf32>
    %730 = vector.broadcast %729 : vector<8x1xf32> to vector<8x256xf32>
    %731 = arith.mulf %718, %730 : vector<8x256xf32>
    %c6_i32_239 = arith.constant 6 : i32
    %732 = tpu.dynamic_rotate %714 by %c6_i32_239 dim 0 : vector<8x256xf32>, i32 -> vector<8x256xf32>
    %c106 = arith.constant 106 : index
    %c0_240 = arith.constant 0 : index
    %733 = vector.load %arg2[%c106, %c0_240] : memref<165x256xf32, #tpu.memory_space<vmem>>, vector<1x256xf32>
    %734 = vector.broadcast %733 : vector<1x256xf32> to vector<8x256xf32>
    %735 = arith.mulf %732, %734 : vector<8x256xf32>
    %c-6_i32 = arith.constant -6 : i32
    %736 = vector.broadcast %c-6_i32 : i32 to vector<8x1xi32>
    %737 = arith.addi %2, %736 : vector<8x1xi32>
    %c0_i32_241 = arith.constant 0 : i32
    %738 = vector.broadcast %c0_i32_241 : i32 to vector<8x1xi32>
    %739 = arith.cmpi sge, %737, %738 : vector<8x1xi32>
    %c-6_i32_242 = arith.constant -6 : i32
    %740 = vector.broadcast %c-6_i32_242 : i32 to vector<8x1xi32>
    %741 = arith.addi %2, %740 : vector<8x1xi32>
    %c8_i32_243 = arith.constant 8 : i32
    %742 = vector.broadcast %c8_i32_243 : i32 to vector<8x1xi32>
    %743 = arith.cmpi slt, %741, %742 : vector<8x1xi32>
    %744 = arith.andi %739, %743 : vector<8x1xi1>
    %745 = arith.extui %744 : vector<8x1xi1> to vector<8x1xi32>
    %746 = arith.sitofp %745 : vector<8x1xi32> to vector<8x1xf32>
    %747 = vector.broadcast %746 : vector<8x1xf32> to vector<8x256xf32>
    %748 = arith.mulf %735, %747 : vector<8x256xf32>
    %749 = arith.addf %731, %748 : vector<8x256xf32>
    %c5_i32_244 = arith.constant 5 : i32
    %750 = tpu.dynamic_rotate %714 by %c5_i32_244 dim 0 : vector<8x256xf32>, i32 -> vector<8x256xf32>
    %c107 = arith.constant 107 : index
    %c0_245 = arith.constant 0 : index
    %751 = vector.load %arg2[%c107, %c0_245] : memref<165x256xf32, #tpu.memory_space<vmem>>, vector<1x256xf32>
    %752 = vector.broadcast %751 : vector<1x256xf32> to vector<8x256xf32>
    %753 = arith.mulf %750, %752 : vector<8x256xf32>
    %754 = vector.broadcast %476 : vector<8x1xf32> to vector<8x256xf32>
    %755 = arith.mulf %753, %754 : vector<8x256xf32>
    %756 = arith.addf %749, %755 : vector<8x256xf32>
    %c4_i32_246 = arith.constant 4 : i32
    %757 = tpu.dynamic_rotate %714 by %c4_i32_246 dim 0 : vector<8x256xf32>, i32 -> vector<8x256xf32>
    %c108 = arith.constant 108 : index
    %c0_247 = arith.constant 0 : index
    %758 = vector.load %arg2[%c108, %c0_247] : memref<165x256xf32, #tpu.memory_space<vmem>>, vector<1x256xf32>
    %759 = vector.broadcast %758 : vector<1x256xf32> to vector<8x256xf32>
    %760 = arith.mulf %757, %759 : vector<8x256xf32>
    %761 = vector.broadcast %493 : vector<8x1xf32> to vector<8x256xf32>
    %762 = arith.mulf %760, %761 : vector<8x256xf32>
    %763 = arith.addf %756, %762 : vector<8x256xf32>
    %c3_i32_248 = arith.constant 3 : i32
    %764 = tpu.dynamic_rotate %714 by %c3_i32_248 dim 0 : vector<8x256xf32>, i32 -> vector<8x256xf32>
    %c109 = arith.constant 109 : index
    %c0_249 = arith.constant 0 : index
    %765 = vector.load %arg2[%c109, %c0_249] : memref<165x256xf32, #tpu.memory_space<vmem>>, vector<1x256xf32>
    %766 = vector.broadcast %765 : vector<1x256xf32> to vector<8x256xf32>
    %767 = arith.mulf %764, %766 : vector<8x256xf32>
    %768 = vector.broadcast %291 : vector<8x1xf32> to vector<8x256xf32>
    %769 = arith.mulf %767, %768 : vector<8x256xf32>
    %770 = arith.addf %763, %769 : vector<8x256xf32>
    %c2_i32_250 = arith.constant 2 : i32
    %771 = tpu.dynamic_rotate %714 by %c2_i32_250 dim 0 : vector<8x256xf32>, i32 -> vector<8x256xf32>
    %c110 = arith.constant 110 : index
    %c0_251 = arith.constant 0 : index
    %772 = vector.load %arg2[%c110, %c0_251] : memref<165x256xf32, #tpu.memory_space<vmem>>, vector<1x256xf32>
    %773 = vector.broadcast %772 : vector<1x256xf32> to vector<8x256xf32>
    %774 = arith.mulf %771, %773 : vector<8x256xf32>
    %775 = vector.broadcast %308 : vector<8x1xf32> to vector<8x256xf32>
    %776 = arith.mulf %774, %775 : vector<8x256xf32>
    %777 = arith.addf %770, %776 : vector<8x256xf32>
    %c1_i32_252 = arith.constant 1 : i32
    %778 = tpu.dynamic_rotate %714 by %c1_i32_252 dim 0 : vector<8x256xf32>, i32 -> vector<8x256xf32>
    %c111 = arith.constant 111 : index
    %c0_253 = arith.constant 0 : index
    %779 = vector.load %arg2[%c111, %c0_253] : memref<165x256xf32, #tpu.memory_space<vmem>>, vector<1x256xf32>
    %780 = vector.broadcast %779 : vector<1x256xf32> to vector<8x256xf32>
    %781 = arith.mulf %778, %780 : vector<8x256xf32>
    %782 = vector.broadcast %133 : vector<8x1xf32> to vector<8x256xf32>
    %783 = arith.mulf %781, %782 : vector<8x256xf32>
    %784 = arith.addf %777, %783 : vector<8x256xf32>
    %c112 = arith.constant 112 : index
    %c0_254 = arith.constant 0 : index
    %785 = vector.load %arg2[%c112, %c0_254] : memref<165x256xf32, #tpu.memory_space<vmem>>, vector<1x256xf32>
    %786 = vector.broadcast %785 : vector<1x256xf32> to vector<8x256xf32>
    %787 = arith.mulf %714, %786 : vector<8x256xf32>
    %788 = arith.addf %784, %787 : vector<8x256xf32>
    %c7_i32_255 = arith.constant 7 : i32
    %789 = tpu.dynamic_rotate %714 by %c7_i32_255 dim 0 : vector<8x256xf32>, i32 -> vector<8x256xf32>
    %c113 = arith.constant 113 : index
    %c0_256 = arith.constant 0 : index
    %790 = vector.load %arg2[%c113, %c0_256] : memref<165x256xf32, #tpu.memory_space<vmem>>, vector<1x256xf32>
    %791 = vector.broadcast %790 : vector<1x256xf32> to vector<8x256xf32>
    %792 = arith.mulf %789, %791 : vector<8x256xf32>
    %793 = vector.broadcast %234 : vector<8x1xf32> to vector<8x256xf32>
    %794 = arith.mulf %792, %793 : vector<8x256xf32>
    %795 = arith.addf %788, %794 : vector<8x256xf32>
    %c6_i32_257 = arith.constant 6 : i32
    %796 = tpu.dynamic_rotate %714 by %c6_i32_257 dim 0 : vector<8x256xf32>, i32 -> vector<8x256xf32>
    %c114 = arith.constant 114 : index
    %c0_258 = arith.constant 0 : index
    %797 = vector.load %arg2[%c114, %c0_258] : memref<165x256xf32, #tpu.memory_space<vmem>>, vector<1x256xf32>
    %798 = vector.broadcast %797 : vector<1x256xf32> to vector<8x256xf32>
    %799 = arith.mulf %796, %798 : vector<8x256xf32>
    %800 = vector.broadcast %344 : vector<8x1xf32> to vector<8x256xf32>
    %801 = arith.mulf %799, %800 : vector<8x256xf32>
    %802 = arith.addf %795, %801 : vector<8x256xf32>
    %c5_i32_259 = arith.constant 5 : i32
    %803 = tpu.dynamic_rotate %714 by %c5_i32_259 dim 0 : vector<8x256xf32>, i32 -> vector<8x256xf32>
    %c115 = arith.constant 115 : index
    %c0_260 = arith.constant 0 : index
    %804 = vector.load %arg2[%c115, %c0_260] : memref<165x256xf32, #tpu.memory_space<vmem>>, vector<1x256xf32>
    %805 = vector.broadcast %804 : vector<1x256xf32> to vector<8x256xf32>
    %806 = arith.mulf %803, %805 : vector<8x256xf32>
    %807 = vector.broadcast %362 : vector<8x1xf32> to vector<8x256xf32>
    %808 = arith.mulf %806, %807 : vector<8x256xf32>
    %809 = arith.addf %802, %808 : vector<8x256xf32>
    %c4_i32_261 = arith.constant 4 : i32
    %810 = tpu.dynamic_rotate %714 by %c4_i32_261 dim 0 : vector<8x256xf32>, i32 -> vector<8x256xf32>
    %c116 = arith.constant 116 : index
    %c0_262 = arith.constant 0 : index
    %811 = vector.load %arg2[%c116, %c0_262] : memref<165x256xf32, #tpu.memory_space<vmem>>, vector<1x256xf32>
    %812 = vector.broadcast %811 : vector<1x256xf32> to vector<8x256xf32>
    %813 = arith.mulf %810, %812 : vector<8x256xf32>
    %814 = vector.broadcast %557 : vector<8x1xf32> to vector<8x256xf32>
    %815 = arith.mulf %813, %814 : vector<8x256xf32>
    %816 = arith.addf %809, %815 : vector<8x256xf32>
    %c3_i32_263 = arith.constant 3 : i32
    %817 = tpu.dynamic_rotate %714 by %c3_i32_263 dim 0 : vector<8x256xf32>, i32 -> vector<8x256xf32>
    %c117 = arith.constant 117 : index
    %c0_264 = arith.constant 0 : index
    %818 = vector.load %arg2[%c117, %c0_264] : memref<165x256xf32, #tpu.memory_space<vmem>>, vector<1x256xf32>
    %819 = vector.broadcast %818 : vector<1x256xf32> to vector<8x256xf32>
    %820 = arith.mulf %817, %819 : vector<8x256xf32>
    %821 = vector.broadcast %575 : vector<8x1xf32> to vector<8x256xf32>
    %822 = arith.mulf %820, %821 : vector<8x256xf32>
    %823 = arith.addf %816, %822 : vector<8x256xf32>
    %c2_i32_265 = arith.constant 2 : i32
    %824 = tpu.dynamic_rotate %714 by %c2_i32_265 dim 0 : vector<8x256xf32>, i32 -> vector<8x256xf32>
    %c118 = arith.constant 118 : index
    %c0_266 = arith.constant 0 : index
    %825 = vector.load %arg2[%c118, %c0_266] : memref<165x256xf32, #tpu.memory_space<vmem>>, vector<1x256xf32>
    %826 = vector.broadcast %825 : vector<1x256xf32> to vector<8x256xf32>
    %827 = arith.mulf %824, %826 : vector<8x256xf32>
    %c6_i32_267 = arith.constant 6 : i32
    %828 = vector.broadcast %c6_i32_267 : i32 to vector<8x1xi32>
    %829 = arith.addi %2, %828 : vector<8x1xi32>
    %c0_i32_268 = arith.constant 0 : i32
    %830 = vector.broadcast %c0_i32_268 : i32 to vector<8x1xi32>
    %831 = arith.cmpi sge, %829, %830 : vector<8x1xi32>
    %c6_i32_269 = arith.constant 6 : i32
    %832 = vector.broadcast %c6_i32_269 : i32 to vector<8x1xi32>
    %833 = arith.addi %2, %832 : vector<8x1xi32>
    %c8_i32_270 = arith.constant 8 : i32
    %834 = vector.broadcast %c8_i32_270 : i32 to vector<8x1xi32>
    %835 = arith.cmpi slt, %833, %834 : vector<8x1xi32>
    %836 = arith.andi %831, %835 : vector<8x1xi1>
    %837 = arith.extui %836 : vector<8x1xi1> to vector<8x1xi32>
    %838 = arith.sitofp %837 : vector<8x1xi32> to vector<8x1xf32>
    %839 = vector.broadcast %838 : vector<8x1xf32> to vector<8x256xf32>
    %840 = arith.mulf %827, %839 : vector<8x256xf32>
    %841 = arith.addf %823, %840 : vector<8x256xf32>
    %c1_i32_271 = arith.constant 1 : i32
    %842 = tpu.dynamic_rotate %714 by %c1_i32_271 dim 0 : vector<8x256xf32>, i32 -> vector<8x256xf32>
    %c119 = arith.constant 119 : index
    %c0_272 = arith.constant 0 : index
    %843 = vector.load %arg2[%c119, %c0_272] : memref<165x256xf32, #tpu.memory_space<vmem>>, vector<1x256xf32>
    %844 = vector.broadcast %843 : vector<1x256xf32> to vector<8x256xf32>
    %845 = arith.mulf %842, %844 : vector<8x256xf32>
    %c7_i32_273 = arith.constant 7 : i32
    %846 = vector.broadcast %c7_i32_273 : i32 to vector<8x1xi32>
    %847 = arith.addi %2, %846 : vector<8x1xi32>
    %c0_i32_274 = arith.constant 0 : i32
    %848 = vector.broadcast %c0_i32_274 : i32 to vector<8x1xi32>
    %849 = arith.cmpi sge, %847, %848 : vector<8x1xi32>
    %c7_i32_275 = arith.constant 7 : i32
    %850 = vector.broadcast %c7_i32_275 : i32 to vector<8x1xi32>
    %851 = arith.addi %2, %850 : vector<8x1xi32>
    %c8_i32_276 = arith.constant 8 : i32
    %852 = vector.broadcast %c8_i32_276 : i32 to vector<8x1xi32>
    %853 = arith.cmpi slt, %851, %852 : vector<8x1xi32>
    %854 = arith.andi %849, %853 : vector<8x1xi1>
    %855 = arith.extui %854 : vector<8x1xi1> to vector<8x1xi32>
    %856 = arith.sitofp %855 : vector<8x1xi32> to vector<8x1xf32>
    %857 = vector.broadcast %856 : vector<8x1xf32> to vector<8x256xf32>
    %858 = arith.mulf %845, %857 : vector<8x256xf32>
    %859 = arith.addf %841, %858 : vector<8x256xf32>
    %c8_277 = arith.constant 8 : index
    %c0_278 = arith.constant 0 : index
    %860 = vector.load %arg3[%c8_277, %c0_278] : memref<13x256xf32, #tpu.memory_space<vmem>>, vector<1x256xf32>
    %861 = vector.broadcast %860 : vector<1x256xf32> to vector<8x256xf32>
    %862 = arith.addf %859, %861 : vector<8x256xf32>
    %c224_i32_279 = arith.constant 224 : i32
    %863 = tpu.dynamic_rotate %862 by %c224_i32_279 dim 1 : vector<8x256xf32>, i32 -> vector<8x256xf32>
    %c126 = arith.constant 126 : index
    %c0_280 = arith.constant 0 : index
    %864 = vector.load %arg2[%c126, %c0_280] : memref<165x256xf32, #tpu.memory_space<vmem>>, vector<1x256xf32>
    %865 = vector.broadcast %864 : vector<1x256xf32> to vector<8x256xf32>
    %866 = arith.mulf %863, %865 : vector<8x256xf32>
    %c192_i32_281 = arith.constant 192 : i32
    %867 = tpu.dynamic_rotate %862 by %c192_i32_281 dim 1 : vector<8x256xf32>, i32 -> vector<8x256xf32>
    %c127 = arith.constant 127 : index
    %c0_282 = arith.constant 0 : index
    %868 = vector.load %arg2[%c127, %c0_282] : memref<165x256xf32, #tpu.memory_space<vmem>>, vector<1x256xf32>
    %869 = vector.broadcast %868 : vector<1x256xf32> to vector<8x256xf32>
    %870 = arith.mulf %867, %869 : vector<8x256xf32>
    %871 = arith.addf %866, %870 : vector<8x256xf32>
    %c160_i32_283 = arith.constant 160 : i32
    %872 = tpu.dynamic_rotate %862 by %c160_i32_283 dim 1 : vector<8x256xf32>, i32 -> vector<8x256xf32>
    %c128 = arith.constant 128 : index
    %c0_284 = arith.constant 0 : index
    %873 = vector.load %arg2[%c128, %c0_284] : memref<165x256xf32, #tpu.memory_space<vmem>>, vector<1x256xf32>
    %874 = vector.broadcast %873 : vector<1x256xf32> to vector<8x256xf32>
    %875 = arith.mulf %872, %874 : vector<8x256xf32>
    %876 = arith.addf %871, %875 : vector<8x256xf32>
    %c128_i32_285 = arith.constant 128 : i32
    %877 = tpu.dynamic_rotate %862 by %c128_i32_285 dim 1 : vector<8x256xf32>, i32 -> vector<8x256xf32>
    %c129 = arith.constant 129 : index
    %c0_286 = arith.constant 0 : index
    %878 = vector.load %arg2[%c129, %c0_286] : memref<165x256xf32, #tpu.memory_space<vmem>>, vector<1x256xf32>
    %879 = vector.broadcast %878 : vector<1x256xf32> to vector<8x256xf32>
    %880 = arith.mulf %877, %879 : vector<8x256xf32>
    %881 = arith.addf %876, %880 : vector<8x256xf32>
    %c96_i32_287 = arith.constant 96 : i32
    %882 = tpu.dynamic_rotate %862 by %c96_i32_287 dim 1 : vector<8x256xf32>, i32 -> vector<8x256xf32>
    %c130 = arith.constant 130 : index
    %c0_288 = arith.constant 0 : index
    %883 = vector.load %arg2[%c130, %c0_288] : memref<165x256xf32, #tpu.memory_space<vmem>>, vector<1x256xf32>
    %884 = vector.broadcast %883 : vector<1x256xf32> to vector<8x256xf32>
    %885 = arith.mulf %882, %884 : vector<8x256xf32>
    %886 = arith.addf %881, %885 : vector<8x256xf32>
    %c64_i32_289 = arith.constant 64 : i32
    %887 = tpu.dynamic_rotate %862 by %c64_i32_289 dim 1 : vector<8x256xf32>, i32 -> vector<8x256xf32>
    %c131 = arith.constant 131 : index
    %c0_290 = arith.constant 0 : index
    %888 = vector.load %arg2[%c131, %c0_290] : memref<165x256xf32, #tpu.memory_space<vmem>>, vector<1x256xf32>
    %889 = vector.broadcast %888 : vector<1x256xf32> to vector<8x256xf32>
    %890 = arith.mulf %887, %889 : vector<8x256xf32>
    %891 = arith.addf %886, %890 : vector<8x256xf32>
    %c32_i32_291 = arith.constant 32 : i32
    %892 = tpu.dynamic_rotate %862 by %c32_i32_291 dim 1 : vector<8x256xf32>, i32 -> vector<8x256xf32>
    %c132 = arith.constant 132 : index
    %c0_292 = arith.constant 0 : index
    %893 = vector.load %arg2[%c132, %c0_292] : memref<165x256xf32, #tpu.memory_space<vmem>>, vector<1x256xf32>
    %894 = vector.broadcast %893 : vector<1x256xf32> to vector<8x256xf32>
    %895 = arith.mulf %892, %894 : vector<8x256xf32>
    %896 = arith.addf %891, %895 : vector<8x256xf32>
    %c133 = arith.constant 133 : index
    %c0_293 = arith.constant 0 : index
    %897 = vector.load %arg2[%c133, %c0_293] : memref<165x256xf32, #tpu.memory_space<vmem>>, vector<1x256xf32>
    %898 = vector.broadcast %897 : vector<1x256xf32> to vector<8x256xf32>
    %899 = arith.mulf %862, %898 : vector<8x256xf32>
    %900 = arith.addf %896, %899 : vector<8x256xf32>
    %c224_i32_294 = arith.constant 224 : i32
    %901 = tpu.dynamic_rotate %862 by %c224_i32_294 dim 1 : vector<8x256xf32>, i32 -> vector<8x256xf32>
    %c134 = arith.constant 134 : index
    %c0_295 = arith.constant 0 : index
    %902 = vector.load %arg2[%c134, %c0_295] : memref<165x256xf32, #tpu.memory_space<vmem>>, vector<1x256xf32>
    %903 = vector.broadcast %902 : vector<1x256xf32> to vector<8x256xf32>
    %904 = arith.mulf %901, %903 : vector<8x256xf32>
    %905 = arith.addf %900, %904 : vector<8x256xf32>
    %c192_i32_296 = arith.constant 192 : i32
    %906 = tpu.dynamic_rotate %862 by %c192_i32_296 dim 1 : vector<8x256xf32>, i32 -> vector<8x256xf32>
    %c135 = arith.constant 135 : index
    %c0_297 = arith.constant 0 : index
    %907 = vector.load %arg2[%c135, %c0_297] : memref<165x256xf32, #tpu.memory_space<vmem>>, vector<1x256xf32>
    %908 = vector.broadcast %907 : vector<1x256xf32> to vector<8x256xf32>
    %909 = arith.mulf %906, %908 : vector<8x256xf32>
    %910 = arith.addf %905, %909 : vector<8x256xf32>
    %c160_i32_298 = arith.constant 160 : i32
    %911 = tpu.dynamic_rotate %862 by %c160_i32_298 dim 1 : vector<8x256xf32>, i32 -> vector<8x256xf32>
    %c136 = arith.constant 136 : index
    %c0_299 = arith.constant 0 : index
    %912 = vector.load %arg2[%c136, %c0_299] : memref<165x256xf32, #tpu.memory_space<vmem>>, vector<1x256xf32>
    %913 = vector.broadcast %912 : vector<1x256xf32> to vector<8x256xf32>
    %914 = arith.mulf %911, %913 : vector<8x256xf32>
    %915 = arith.addf %910, %914 : vector<8x256xf32>
    %c128_i32_300 = arith.constant 128 : i32
    %916 = tpu.dynamic_rotate %862 by %c128_i32_300 dim 1 : vector<8x256xf32>, i32 -> vector<8x256xf32>
    %c137 = arith.constant 137 : index
    %c0_301 = arith.constant 0 : index
    %917 = vector.load %arg2[%c137, %c0_301] : memref<165x256xf32, #tpu.memory_space<vmem>>, vector<1x256xf32>
    %918 = vector.broadcast %917 : vector<1x256xf32> to vector<8x256xf32>
    %919 = arith.mulf %916, %918 : vector<8x256xf32>
    %920 = arith.addf %915, %919 : vector<8x256xf32>
    %c96_i32_302 = arith.constant 96 : i32
    %921 = tpu.dynamic_rotate %862 by %c96_i32_302 dim 1 : vector<8x256xf32>, i32 -> vector<8x256xf32>
    %c138 = arith.constant 138 : index
    %c0_303 = arith.constant 0 : index
    %922 = vector.load %arg2[%c138, %c0_303] : memref<165x256xf32, #tpu.memory_space<vmem>>, vector<1x256xf32>
    %923 = vector.broadcast %922 : vector<1x256xf32> to vector<8x256xf32>
    %924 = arith.mulf %921, %923 : vector<8x256xf32>
    %925 = arith.addf %920, %924 : vector<8x256xf32>
    %c64_i32_304 = arith.constant 64 : i32
    %926 = tpu.dynamic_rotate %862 by %c64_i32_304 dim 1 : vector<8x256xf32>, i32 -> vector<8x256xf32>
    %c139 = arith.constant 139 : index
    %c0_305 = arith.constant 0 : index
    %927 = vector.load %arg2[%c139, %c0_305] : memref<165x256xf32, #tpu.memory_space<vmem>>, vector<1x256xf32>
    %928 = vector.broadcast %927 : vector<1x256xf32> to vector<8x256xf32>
    %929 = arith.mulf %926, %928 : vector<8x256xf32>
    %930 = arith.addf %925, %929 : vector<8x256xf32>
    %c32_i32_306 = arith.constant 32 : i32
    %931 = tpu.dynamic_rotate %862 by %c32_i32_306 dim 1 : vector<8x256xf32>, i32 -> vector<8x256xf32>
    %c140 = arith.constant 140 : index
    %c0_307 = arith.constant 0 : index
    %932 = vector.load %arg2[%c140, %c0_307] : memref<165x256xf32, #tpu.memory_space<vmem>>, vector<1x256xf32>
    %933 = vector.broadcast %932 : vector<1x256xf32> to vector<8x256xf32>
    %934 = arith.mulf %931, %933 : vector<8x256xf32>
    %935 = arith.addf %930, %934 : vector<8x256xf32>
    %c9_308 = arith.constant 9 : index
    %c0_309 = arith.constant 0 : index
    %936 = vector.load %arg3[%c9_308, %c0_309] : memref<13x256xf32, #tpu.memory_space<vmem>>, vector<1x256xf32>
    %937 = vector.broadcast %936 : vector<1x256xf32> to vector<8x256xf32>
    %938 = arith.addf %935, %937 : vector<8x256xf32>
    %939 = arith.addf %638, %938 : vector<8x256xf32>
    %c3_i32_310 = arith.constant 3 : i32
    %940 = tpu.dynamic_rotate %939 by %c3_i32_310 dim 1 : vector<8x256xf32>, i32 -> vector<8x256xf32>
    %c151 = arith.constant 151 : index
    %c0_311 = arith.constant 0 : index
    %941 = vector.load %arg2[%c151, %c0_311] : memref<165x256xf32, #tpu.memory_space<vmem>>, vector<1x256xf32>
    %942 = vector.broadcast %941 : vector<1x256xf32> to vector<8x256xf32>
    %943 = arith.mulf %940, %942 : vector<8x256xf32>
    %c2_i32_312 = arith.constant 2 : i32
    %944 = tpu.dynamic_rotate %939 by %c2_i32_312 dim 1 : vector<8x256xf32>, i32 -> vector<8x256xf32>
    %c152 = arith.constant 152 : index
    %c0_313 = arith.constant 0 : index
    %945 = vector.load %arg2[%c152, %c0_313] : memref<165x256xf32, #tpu.memory_space<vmem>>, vector<1x256xf32>
    %946 = vector.broadcast %945 : vector<1x256xf32> to vector<8x256xf32>
    %947 = arith.mulf %944, %946 : vector<8x256xf32>
    %948 = arith.addf %943, %947 : vector<8x256xf32>
    %c1_i32_314 = arith.constant 1 : i32
    %949 = tpu.dynamic_rotate %939 by %c1_i32_314 dim 1 : vector<8x256xf32>, i32 -> vector<8x256xf32>
    %c153 = arith.constant 153 : index
    %c0_315 = arith.constant 0 : index
    %950 = vector.load %arg2[%c153, %c0_315] : memref<165x256xf32, #tpu.memory_space<vmem>>, vector<1x256xf32>
    %951 = vector.broadcast %950 : vector<1x256xf32> to vector<8x256xf32>
    %952 = arith.mulf %949, %951 : vector<8x256xf32>
    %953 = arith.addf %948, %952 : vector<8x256xf32>
    %c154 = arith.constant 154 : index
    %c0_316 = arith.constant 0 : index
    %954 = vector.load %arg2[%c154, %c0_316] : memref<165x256xf32, #tpu.memory_space<vmem>>, vector<1x256xf32>
    %955 = vector.broadcast %954 : vector<1x256xf32> to vector<8x256xf32>
    %956 = arith.mulf %939, %955 : vector<8x256xf32>
    %957 = arith.addf %953, %956 : vector<8x256xf32>
    %c255_i32_317 = arith.constant 255 : i32
    %958 = tpu.dynamic_rotate %939 by %c255_i32_317 dim 1 : vector<8x256xf32>, i32 -> vector<8x256xf32>
    %c155 = arith.constant 155 : index
    %c0_318 = arith.constant 0 : index
    %959 = vector.load %arg2[%c155, %c0_318] : memref<165x256xf32, #tpu.memory_space<vmem>>, vector<1x256xf32>
    %960 = vector.broadcast %959 : vector<1x256xf32> to vector<8x256xf32>
    %961 = arith.mulf %958, %960 : vector<8x256xf32>
    %962 = arith.addf %957, %961 : vector<8x256xf32>
    %c254_i32_319 = arith.constant 254 : i32
    %963 = tpu.dynamic_rotate %939 by %c254_i32_319 dim 1 : vector<8x256xf32>, i32 -> vector<8x256xf32>
    %c156 = arith.constant 156 : index
    %c0_320 = arith.constant 0 : index
    %964 = vector.load %arg2[%c156, %c0_320] : memref<165x256xf32, #tpu.memory_space<vmem>>, vector<1x256xf32>
    %965 = vector.broadcast %964 : vector<1x256xf32> to vector<8x256xf32>
    %966 = arith.mulf %963, %965 : vector<8x256xf32>
    %967 = arith.addf %962, %966 : vector<8x256xf32>
    %c253_i32_321 = arith.constant 253 : i32
    %968 = tpu.dynamic_rotate %939 by %c253_i32_321 dim 1 : vector<8x256xf32>, i32 -> vector<8x256xf32>
    %c157 = arith.constant 157 : index
    %c0_322 = arith.constant 0 : index
    %969 = vector.load %arg2[%c157, %c0_322] : memref<165x256xf32, #tpu.memory_space<vmem>>, vector<1x256xf32>
    %970 = vector.broadcast %969 : vector<1x256xf32> to vector<8x256xf32>
    %971 = arith.mulf %968, %970 : vector<8x256xf32>
    %972 = arith.addf %967, %971 : vector<8x256xf32>
    %c11_323 = arith.constant 11 : index
    %c0_324 = arith.constant 0 : index
    %973 = vector.load %arg3[%c11_323, %c0_324] : memref<13x256xf32, #tpu.memory_space<vmem>>, vector<1x256xf32>
    %974 = vector.broadcast %973 : vector<1x256xf32> to vector<8x256xf32>
    %975 = arith.addf %972, %974 : vector<8x256xf32>
    %976 = arith.mulf %975, %78 : vector<8x256xf32>
    %c3_i32_325 = arith.constant 3 : i32
    %977 = tpu.dynamic_rotate %976 by %c3_i32_325 dim 1 : vector<8x256xf32>, i32 -> vector<8x256xf32>
    %c158 = arith.constant 158 : index
    %c0_326 = arith.constant 0 : index
    %978 = vector.load %arg2[%c158, %c0_326] : memref<165x256xf32, #tpu.memory_space<vmem>>, vector<1x256xf32>
    %979 = vector.broadcast %978 : vector<1x256xf32> to vector<8x256xf32>
    %980 = arith.mulf %977, %979 : vector<8x256xf32>
    %c2_i32_327 = arith.constant 2 : i32
    %981 = tpu.dynamic_rotate %976 by %c2_i32_327 dim 1 : vector<8x256xf32>, i32 -> vector<8x256xf32>
    %c159 = arith.constant 159 : index
    %c0_328 = arith.constant 0 : index
    %982 = vector.load %arg2[%c159, %c0_328] : memref<165x256xf32, #tpu.memory_space<vmem>>, vector<1x256xf32>
    %983 = vector.broadcast %982 : vector<1x256xf32> to vector<8x256xf32>
    %984 = arith.mulf %981, %983 : vector<8x256xf32>
    %985 = arith.addf %980, %984 : vector<8x256xf32>
    %c1_i32_329 = arith.constant 1 : i32
    %986 = tpu.dynamic_rotate %976 by %c1_i32_329 dim 1 : vector<8x256xf32>, i32 -> vector<8x256xf32>
    %c160 = arith.constant 160 : index
    %c0_330 = arith.constant 0 : index
    %987 = vector.load %arg2[%c160, %c0_330] : memref<165x256xf32, #tpu.memory_space<vmem>>, vector<1x256xf32>
    %988 = vector.broadcast %987 : vector<1x256xf32> to vector<8x256xf32>
    %989 = arith.mulf %986, %988 : vector<8x256xf32>
    %990 = arith.addf %985, %989 : vector<8x256xf32>
    %c161 = arith.constant 161 : index
    %c0_331 = arith.constant 0 : index
    %991 = vector.load %arg2[%c161, %c0_331] : memref<165x256xf32, #tpu.memory_space<vmem>>, vector<1x256xf32>
    %992 = vector.broadcast %991 : vector<1x256xf32> to vector<8x256xf32>
    %993 = arith.mulf %976, %992 : vector<8x256xf32>
    %994 = arith.addf %990, %993 : vector<8x256xf32>
    %c255_i32_332 = arith.constant 255 : i32
    %995 = tpu.dynamic_rotate %976 by %c255_i32_332 dim 1 : vector<8x256xf32>, i32 -> vector<8x256xf32>
    %c162 = arith.constant 162 : index
    %c0_333 = arith.constant 0 : index
    %996 = vector.load %arg2[%c162, %c0_333] : memref<165x256xf32, #tpu.memory_space<vmem>>, vector<1x256xf32>
    %997 = vector.broadcast %996 : vector<1x256xf32> to vector<8x256xf32>
    %998 = arith.mulf %995, %997 : vector<8x256xf32>
    %999 = arith.addf %994, %998 : vector<8x256xf32>
    %c254_i32_334 = arith.constant 254 : i32
    %1000 = tpu.dynamic_rotate %976 by %c254_i32_334 dim 1 : vector<8x256xf32>, i32 -> vector<8x256xf32>
    %c163 = arith.constant 163 : index
    %c0_335 = arith.constant 0 : index
    %1001 = vector.load %arg2[%c163, %c0_335] : memref<165x256xf32, #tpu.memory_space<vmem>>, vector<1x256xf32>
    %1002 = vector.broadcast %1001 : vector<1x256xf32> to vector<8x256xf32>
    %1003 = arith.mulf %1000, %1002 : vector<8x256xf32>
    %1004 = arith.addf %999, %1003 : vector<8x256xf32>
    %c253_i32_336 = arith.constant 253 : i32
    %1005 = tpu.dynamic_rotate %976 by %c253_i32_336 dim 1 : vector<8x256xf32>, i32 -> vector<8x256xf32>
    %c164 = arith.constant 164 : index
    %c0_337 = arith.constant 0 : index
    %1006 = vector.load %arg2[%c164, %c0_337] : memref<165x256xf32, #tpu.memory_space<vmem>>, vector<1x256xf32>
    %1007 = vector.broadcast %1006 : vector<1x256xf32> to vector<8x256xf32>
    %1008 = arith.mulf %1005, %1007 : vector<8x256xf32>
    %1009 = arith.addf %1004, %1008 : vector<8x256xf32>
    %c12_338 = arith.constant 12 : index
    %c0_339 = arith.constant 0 : index
    %1010 = vector.load %arg3[%c12_338, %c0_339] : memref<13x256xf32, #tpu.memory_space<vmem>>, vector<1x256xf32>
    %1011 = vector.broadcast %1010 : vector<1x256xf32> to vector<8x256xf32>
    %1012 = arith.addf %1009, %1011 : vector<8x256xf32>
    %c0_340 = arith.constant 0 : index
    %c0_341 = arith.constant 0 : index
    %c0_342 = arith.constant 0 : index
    %1013 = vector.load %arg1[%c0_340, %c0_341, %c0_342] : memref<1x8x256xf32, #tpu.memory_space<vmem>>, vector<1x8x256xf32>
    %1014 = vector.shape_cast %1013 : vector<1x8x256xf32> to vector<8x256xf32>
    %1015 = arith.addf %1012, %1014 : vector<8x256xf32>
    %c0_343 = arith.constant 0 : index
    %c0_344 = arith.constant 0 : index
    %c0_345 = arith.constant 0 : index
    %1016 = vector.load %arg4[%c0_343, %c0_344, %c0_345] : memref<1x8x256xf32, #tpu.memory_space<vmem>>, vector<1x8x256xf32>
    %1017 = vector.shape_cast %1016 : vector<1x8x256xf32> to vector<8x256xf32>
    %1018 = vector.shape_cast %1015 : vector<8x256xf32> to vector<1x8x256xf32>
    tpu.vector_store %arg4[%c0_343, %c0_344, %c0_345], %1018 {strides = array<i32>} : memref<1x8x256xf32, #tpu.memory_space<vmem>>, vector<1x8x256xf32>,
    return
  }
  func.func @transform_0(%arg0: i32) -> (i32, i32, i32) {
    %c0_i32 = arith.constant 0 : i32
    %c0_i32_0 = arith.constant 0 : i32
    %c0_i32_1 = arith.constant 0 : i32
    return %arg0, %c0_i32, %c0_i32_0 : i32, i32, i32
  }
  func.func @transform_1(%arg0: i32) -> (i32, i32) {
    %c0_i32 = arith.constant 0 : i32
    %c0_i32_0 = arith.constant 0 : i32
    %c0_i32_1 = arith.constant 0 : i32
    return %c0_i32, %c0_i32_0 : i32, i32
  }
  func.func @transform_2(%arg0: i32) -> (i32, i32) {
    %c0_i32 = arith.constant 0 : i32
    %c0_i32_0 = arith.constant 0 : i32
    %c0_i32_1 = arith.constant 0 : i32
    return %c0_i32, %c0_i32_0 : i32, i32
  }
  func.func @transform_3(%arg0: i32) -> (i32, i32, i32) {
    %c0_i32 = arith.constant 0 : i32
    %c0_i32_0 = arith.constant 0 : i32
    %c0_i32_1 = arith.constant 0 : i32
    return %arg0, %c0_i32, %c0_i32_0 : i32, i32, i32
  }
}

</mosaic_0001>

<bundles_post_ra>
// kernel: tpu_custom_call.1
= control target key start
LH: loop header
LB: loop body
LE: loop exit
PB: predicated region body
PF: predicated region fallthrough
CT: control target
= control target key end

     0   :  { %8 = vsyncpa [#allocation3], 0  ;;  %s6671_s0 = inlined_call_operand.hbm [shape: f32[2,8,256], index: 0, kind: input, shape index: {}]   ;;  %s6672_s1 = inlined_call_operand.hbm [shape: f32[165,256], index: 1, kind: input, shape index: {}]   ;;  %s6673_s2 = inlined_call_operand.hbm [shape: f32[13,256], index: 2, kind: input, shape index: {}]   ;;  %s6674_s3 = inlined_call_operand.hbm [shape: f32[2,8,256], index: 3, kind: output, shape index: {}]  }
   0x1   :  { %10 = vsyncpa [#allocation3 + $0x1], 0 }
   0x2   :  { %11 = vsyncpa [#allocation6], 0 }
   0x3   :  { %12 = vsyncpa [#allocation4], 0 }
   0x4   :  { %14 = vsyncpa [#allocation4 + $0x1], 0  ;;  %s4014_s12 = smov 0   ;;  %s4016_s13 = smov 0  }
   0x5   :  { %s4018_s14 = smov 0   ;;  %s4020_s15 = smov 0  }
   0x6 LB: > { %s4035_s16 = sadd.s32 4294967295, %s3960_s15   ;;  %s3665_s17 = sadd.s32 4294967294, %s3960_s15   ;;  %s3960_s15 = sphi %s4020_s15, %s7121_s15   ;;  %s3956_s14 = sphi %s4018_s14, %s7120_s14   ;;  %s3952_s13 = sphi %s4016_s13, %s7119_s13   ;;  %s3948_s12 = sphi %s4014_s12, %s7118_s12  }
   0x7   : > { %p40_p0 = scmp.ne.s32.totalorder %s3952_s13, %s3948_s12  ;;  %p6675_p1 = scmp.eq.s32.totalorder %s4035_s16, 0 }
   0x8   : > { %p112_p3 = scmp.eq.s32.totalorder %s3665_s17, 1  ;;  %p3666_p5 = scmp.ge.s32.totalorder %s3960_s15, 1 }
   0x9   : > { %p4044_p4 = por %p6675_p1, %p40_p0  ;;  %p119_p7 = scmp.lt.s32.totalorder %s3960_s15, 3 }
   0xa   : > { %p4049_p6 = por %p112_p3, %p40_p0  ;;  %s3962_s21 = smov [#allocation5]  }
   0xb   : > { %s6778_s18 = scalar_select %p4044_p4, 1, 0 }
   0xc   : > { %s6779_s19 = scalar_select %p4049_p6, 1, 0 }
   0xd   : > { %p4054_p8 = pnand %p3666_p5, %p119_p7  ;;  %s131_s22 = sshll.u32 %s3962_s21, 4  ;;  %s4058_s22 = int_to_ptr.vmem [resolvable:$true] %s131_s22 }
   0xe   : > { %s3963_s24 = smov [#allocation7]   ;;  %s3804_s28 = scalar_lea.hbm %s6672_s1, 5376 }
   0xf   : > { %p3711_p9 = pneg %p4054_p8  ;;  %s144_s25 = sshll.u32 %s3963_s24, 4  ;;  %s4069_s25 = int_to_ptr.vmem [resolvable:$true] %s144_s25 }
  0x10   : > { %p3805_p12 = scmp.ne.s32.totalorder %s6672_s1, %s3804_s28  ;;  %p3811_p5 = scmp.lt.u32.totalorder %s3804_s28, %s6672_s1 }
  0x11   : > { %p4065_p11 = pnand %p3711_p9, %p6675_p1 }
  0x13   : > { %p3806_p13 = pneg %p4065_p11 }
  0x15   : > { %p3807_p0 = pnand %p3806_p13, %p3805_p12 }
  0x17   : > { %p3808_p3 = pneg %p3807_p0 }
  0x19   : > { %p3813_p7 = pnand %p3811_p5, %p3808_p3 }
  0x1b   : > { %3816 = shalt.err (!%p3813_p7)
}
  0x1c   : > { %s3817_s6 = scalar_lea.vmem %s4058_s22, 5376  ;;  %p3825_p2 = scmp.lt.s32.totalorder %s4058_s22, %s4058_s22 }
  0x1d   : > { %p3818_p9 = scmp.ne.s32.totalorder %s4058_s22, %s3817_s6  ;;  %p3826_p12 = scmp.lt.s32.totalorder %s3817_s6, %s3817_s6 }
  0x1f   : > { %p3820_p10 = pnand %p3818_p9, %p3806_p13  ;;  %p3827_p0 = por %p3826_p12, %p3825_p2 }
  0x21   : > { %p3821_p1 = pneg %p3820_p10 }
  0x23   : > { %p3828_p6 = pnand %p3827_p0, %p3821_p1 }
  0x25   : > { %3831 = shalt.err (!%p3828_p6)
}
  0x26   : > { %s3964_s7 = smov 256   ;;  %s3965_s8 = smov 16  }
  0x27   : > { %3714 = dma.hbm_to_vmem [thread:$0]  (!%p4065_p11), %s6672_s1, 5376, %s4058_s22, [#allocation6], %s3964_s7, %s3964_s7, %s3965_s8  }
  0x28   : > { %s3832_s21 = scalar_lea.hbm %s6673_s2, 512 }
  0x29   : > { %p3833_p2 = scmp.ne.s32.totalorder %s6673_s2, %s3832_s21  ;;  %p3839_p10 = scmp.lt.u32.totalorder %s3832_s21, %s6673_s2 }
  0x2b   : > { %p3835_p1 = pnand %p3833_p2, %p3806_p13 }
  0x2d   : > { %p3836_p6 = pneg %p3835_p1 }
  0x2f   : > { %p3841_p3 = pnand %p3839_p10, %p3836_p6 }
  0x31   : > { %3844 = shalt.err (!%p3841_p3)
}
  0x32   : > { %s3845_s22 = scalar_lea.vmem %s4069_s25, 512  ;;  %p3853_p12 = scmp.lt.s32.totalorder %s4069_s25, %s4069_s25 }
  0x33   : > { %p3846_p5 = scmp.ne.s32.totalorder %s4069_s25, %s3845_s22  ;;  %p3854_p0 = scmp.lt.s32.totalorder %s3845_s22, %s3845_s22 }
  0x35   : > { %p3848_p7 = pnand %p3846_p5, %p3806_p13  ;;  %p3855_p2 = por %p3854_p0, %p3853_p12 }
  0x37   : > { %p3849_p9 = pneg %p3848_p7 }
  0x39   : > { %p3856_p1 = pnand %p3855_p2, %p3849_p9 }
  0x3b   : > { %3859 = shalt.err (!%p3856_p1)
}
  0x3c   : > { %3717 = dma.hbm_to_vmem [thread:$0]  (!%p4065_p11), %s6673_s2, 512, %s4069_s25, [#allocation6], %s3964_s7, %s3964_s7, %s3965_s8  }
  0x3d   : > { %s4124_s4 = sadd.s32 1, %s3960_s15   ;;  %s27_s23 = sadd.s32 1, %s3956_s14 }
  0x3e   : > { %s24_s5 = ssub.s32 %s3960_s15, %s4124_s4  ;;  %p34_p13 = scmp.ne.s32.totalorder %s3956_s14, %s3952_s13 }
  0x3f   : > { %p25_p6 = scmp.eq.s32.totalorder %s24_s5, 0  ;;  %p35_p10 = scmp.eq.s32.totalorder %s3960_s15, 0 }
  0x40   : > { %p6782_p3 = scmp.eq.s32.totalorder %s4035_s16, 1  ;;  %p3728_p7 = scmp.lt.s32.totalorder %s3960_s15, 2 }
  0x41   : > { %s4140_s9 = scalar_select %p25_p6, %s3956_s14, %s27_s23  }
  0x42   : > { %p4134_p5 = por %p6782_p3, %p34_p13  ;;  %p36_p9 = por %p35_p10, %p34_p13 }
  0x43   : > { %s158_s10 = sand.u32 1, %s3956_s14   ;;  %s3697_s25 = sshll.u32 %s3960_s15, 8 }
  0x44   : > { %s6783_s6 = scalar_select %p4134_p5, 1, 0 }
  0x45   : > { %s3670_s11 = sshll.u32 %s158_s10, 4  ;;  %s4147_s17 = scalar_lea.hbm %s6671_s0, %s3697_s25 }
  0x46   : > { %s162_s21 = scalar_lea.vmem [#allocation2], %s3670_s11  ;;  %p4151_p11 = pnand %p3728_p7, %p36_p9 }
  0x47   : > { %s170_s24 = sshll.u32 %s162_s21, 4  ;;  %s159_s27 = scalar_lea.sflag [#allocation3], %s158_s10  ;;  %s4149_s24 = int_to_ptr.vmem [resolvable:$true] %s170_s24 }
  0x48   : > { %s3860_s28 = scalar_lea.hbm %s4147_s17, 256  ;;  %p3862_p0 = pneg %p4151_p11 }
  0x49   : > { %p3861_p12 = scmp.ne.s32.totalorder %s4147_s17, %s3860_s28  ;;  %s3865_s30 = scalar_lea.hbm %s6671_s0, 512 }
  0x4a   : > { %p3866_p13 = scmp.lt.u32.totalorder %s4147_s17, %s6671_s0  ;;  %p3867_p6 = scmp.lt.u32.totalorder %s3865_s30, %s3860_s28 }
  0x4b   : > { %p3863_p2 = pnand %p3862_p0, %p3861_p12  ;;  %p3869_p3 = scmp.lt.u32.totalorder %s3860_s28, %s4147_s17 }
  0x4c   : > { %p3868_p10 = por %p3867_p6, %p3866_p13 }
  0x4d   : > { %p3864_p1 = pneg %p3863_p2 }
  0x4e   : > { %p3870_p7 = por %p3869_p3, %p3868_p10 }
  0x50   : > { %p3871_p9 = pnand %p3870_p7, %p3864_p1 }
  0x52   : > { %3874 = shalt.err (!%p3871_p9)
}
  0x53   : > { %s3875_s10 = scalar_lea.vmem %s4149_s24, 256  ;;  %s3966_s11 = smov [#allocation2]  }
  0x54   : > { %p3876_p12 = scmp.ne.s32.totalorder %s4149_s24, %s3875_s10  ;;  %s3880_s25 = sshll.u32 %s3966_s11, 4  ;;  %s3881_s25 = int_to_ptr.vmem [resolvable:$false] %s3880_s25 }
  0x55   : > { %s3882_s7 = scalar_lea.vmem %s3881_s25, 512  ;;  %p3883_p4 = scmp.lt.s32.totalorder %s4149_s24, %s3881_s25 }
  0x56   : > { %p3878_p2 = pnand %p3876_p12, %p3862_p0  ;;  %p3884_p13 = scmp.lt.s32.totalorder %s3882_s7, %s3875_s10 }
  0x58   : > { %p3879_p5 = pneg %p3878_p2  ;;  %p3885_p6 = por %p3884_p13, %p3883_p4 }
  0x5a   : > { %p3886_p10 = pnand %p3885_p6, %p3879_p5 }
  0x5c   : > { %3889 = shalt.err (!%p3886_p10)
}
  0x5d   : > { %3721 = dma.hbm_to_vmem [thread:$0]  (!%p4151_p11), %s4147_s17, 256, %s4149_s24, %s159_s27  }
  0x5e   : > { %179 = sbr.rel (%p4054_p8) target bundleno = 1236 (0x4d4), region = 32 }
  0x65   : > { %s4183_s8 = sand.u32 1, %s3952_s13   ;;  %p6785_p4 = scmp.ne.s32.totalorder %s6778_s18, 0 }
  0x66   : > { %s6686_s21 = sshll.u32 %s4183_s8, 4  ;;  %s182_s28 = scalar_lea.sflag [#allocation3], %s4183_s8 }
  0x67   : > { %s4189_s22 = scalar_lea.vmem [#allocation2], %s6686_s21 }
  0x68   : > { %3935 = dma.done.wait (%p6785_p4), %s182_s28, 256  }
  0x69   : > { %3937 = vsyncadd (%p6785_p4), %s182_s28, 4294967040  ;;  %p6786_p5 = scmp.eq.s32.totalorder %s4035_s16, 0 }
  0x6b   : > { %3939 = dma.done.wait (%p6786_p5), [#allocation6], 5888   ;;  %p6787_p8 = pmov %p6786_p5 }
  0x6c   : > { %v4200_v0 = vld [vmem:[%s4189_s22] sm:$0xff]  ;;  %s3967_s20 = smov 2   ;;  %s3968_s17 = smov 3   ;;  %v4207_v1 = vld [vmem:[%s4189_s22 + $0x8] sm:$0xff]  ;;  %v218_v2 = vlaneseq }
  0x6d   : > { %3941 = vsyncadd (%p6787_p8), [#allocation6], 4294961408  ;;  %244 = vrot.lane.b32.xlu1 %v4200_v0, %s3967_s20  ;;  %220 = vrot.lane.b32.xlu0 %v4200_v0, %s3968_s17  ;;  %s3969_s18 = smov 1   ;;  %s3970_s24 = smov 127  }
  0x6e   : > { %s3971_s26 = smov 126   ;;  %s3972_s27 = smov 125   ;;  %v4229_v3 = vshrl.u32 %v218_v2, 7  ;;  %v4231_v4 = vand.u32 127, %v218_v2 }
  0x6f   : > { %v252_v7 = vld [vmem:[#allocation5 + $0x121] ss:$8 sm:$0x3]  ;;  %v230_v8 = vld [vmem:[#allocation5 + $0x120] ss:$8 sm:$0x3] }
  0x70   : > { %6788 = vst [vmem:[#allocation12_spill] sm:$0xff] %v4229_v3  ;;  %6789 = vst [vmem:[#allocation13_spill] sm:$0xff] %v4231_v4  ;;  %v4234_v5 = vsub.s32 0, %v4229_v3  ;;  %v4237_v6 = vsub.s32 1, %v4229_v3  ;;  %vm248_vm0 = vcmp.lt.s32.totalorder %v4231_v4, 2  ;;  %vm226_vm1 = vcmp.lt.s32.totalorder %v4231_v4, 3 }
  0x71   : > { %246 = vrot.lane.b32.xlu1 %v4207_v1, %s3967_s20  ;;  %222 = vrot.lane.b32.xlu0 %v4207_v1, %s3968_s17  ;;  %v276_v11 = vld [vmem:[#allocation5 + $0x122] ss:$8 sm:$0x3]  ;;  %vm272_vm2 = vcmp.lt.s32.totalorder %v4231_v4, 1  ;;  %vm6747_vm3 = vcmp.lt.s32.totalorder %v4231_v4, 127  ;;  %vm6717_vm4 = vcmp.lt.s32.totalorder %v4231_v4, 126 }
  0x72   : > { %v257_v12 = vrot.slane %v252_v7, %v4234_v5  ;;  %v261_v13 = vrot.slane %v252_v7, %v4237_v6  ;;  %v235_v14 = vrot.slane %v230_v8, %v4234_v5  ;;  %v239_v15 = vrot.slane %v230_v8, %v4237_v6  ;;  %v293_v24 = vld [vmem:[#allocation5 + $0x123] ss:$8 sm:$0x3]  ;;  %v317_v33 = vld [vmem:[#allocation5 + $0x124] ss:$8 sm:$0x3] }
  0x73   : > { %v281_v18 = vrot.slane %v276_v11, %v4234_v5  ;;  %v285_v19 = vrot.slane %v276_v11, %v4237_v6  ;;  %v298_v31 = vrot.slane %v293_v24, %v4234_v5  ;;  %v302_v32 = vrot.slane %v293_v24, %v4237_v6  ;;  %v341_v42 = vld [vmem:[#allocation5 + $0x125] ss:$8 sm:$0x3]  ;;  %v365_v53 = vld [vmem:[#allocation5 + $0x126] ss:$8 sm:$0x3] }
  0x74   : > { %v322_v40 = vrot.slane %v317_v33, %v4234_v5  ;;  %v326_v41 = vrot.slane %v317_v33, %v4237_v6  ;;  %v346_v51 = vrot.slane %v341_v42, %v4234_v5  ;;  %v350_v52 = vrot.slane %v341_v42, %v4237_v6  ;;  %v382_v2 = vld [vmem:[#allocation7 + $0x12] ss:$8 sm:$0x3]  ;;  %s3973_s29 = smov 36   ;;  %s3974_s30 = smov 32  }
  0x75   : > { %270 = vrot.lane.b32.xlu1 %v4207_v1, %s3969_s18  ;;  %268 = vrot.lane.b32.xlu0 %v4200_v0, %s3969_s18  ;;  %v306_v46 = vmul.f32 %v302_v32, %v4207_v1  ;;  %v305_v48 = vmul.f32 %v298_v31, %v4200_v0  ;;  %vm6687_vm5 = vcmp.lt.s32.totalorder %v4231_v4, 125  ;;  %v387_v11 = vrot.slane %v382_v2, %v4234_v5  ;;  %s3975_s23 = smov 28   ;;  %s3976_s5 = smov 4  }
  0x76   : > { %s3977_s10 = smov 124   ;;  %s3978_s11 = smov 100   ;;  %vm456_vm8 = vcmp.lt.s32.totalorder %v4231_v4, 36  ;;  %vm477_vm9 = vcmp.lt.s32.totalorder %v4231_v4, 32  ;;  %vm501_vm10 = vcmp.lt.s32.totalorder %v4231_v4, 28  ;;  %vm525_vm11 = vcmp.lt.s32.totalorder %v4231_v4, 4 }
  0x77   : > { %s3979_s25 = smov 96   ;;  %s3980_s7 = smov 92   ;;  %vm566_vm12 = vcmp.lt.s32.totalorder %v4231_v4, 124  ;;  %vm590_vm13 = vcmp.lt.s32.totalorder %v4231_v4, 100  ;;  %vm614_vm15 = vcmp.lt.s32.totalorder %v4231_v4, 96 }
  0x78   : > { %s3982_s28 = smov 24   ;;  %s3985_s21 = smov 12  }
  0x79   : > { %311 = vrot.lane.b32.xlu1 %v4207_v1, %s3970_s24  ;;  %309 = vrot.lane.b32.xlu0 %v4200_v0, %s3970_s24  ;;  %p7115_p0 = scmp.ne.s32.totalorder %s6783_s6, 0 }
  0x7d   : > { %335 = vrot.lane.b32.xlu1 %v4207_v1, %s3971_s26  ;;  %333 = vrot.lane.b32.xlu0 %v4200_v0, %s3971_s26 }
  0x81   : > { %359 = vrot.lane.b32.xlu1 %v4207_v1, %s3972_s27  ;;  %357 = vrot.lane.b32.xlu0 %v4200_v0, %s3972_s27  ;;  %v370_v0 = vrot.slane %v365_v53, %v4234_v5  ;;  %v374_v1 = vrot.slane %v365_v53, %v4237_v6 }
  0xdf   : > { %v245_v9 = vpop.permute.xlu1 %244  ;;  %v221_v10 = vpop.permute.xlu0 %220 }
  0xe3   : > { %v247_v16 = vpop.permute.xlu1 %246  ;;  %v223_v17 = vpop.permute.xlu0 %222 }
  0xe4   : > { %v249_v20 = vsel %vm248_vm0, %v245_v9, %v247_v16  ;;  %v250_v21 = vsel %vm248_vm0, %v247_v16, %v245_v9  ;;  %v227_v22 = vsel %vm226_vm1, %v221_v10, %v223_v17  ;;  %v228_v23 = vsel %vm226_vm1, %v223_v17, %v221_v10 }
  0xe5   : > { %v264_v25 = vmul.f32 %v257_v12, %v250_v21  ;;  %v265_v26 = vmul.f32 %v261_v13, %v249_v20  ;;  %v242_v27 = vmul.f32 %v235_v14, %v228_v23  ;;  %v243_v28 = vmul.f32 %v239_v15, %v227_v22 }
  0xe6   : > { %v391_v12 = vrot.slane %v382_v2, %v4237_v6 }
  0xe7   : > { %v271_v29 = vpop.permute.xlu1 %270  ;;  %v269_v30 = vpop.permute.xlu0 %268  ;;  %v266_v36 = vadd.f32 %v264_v25, %v242_v27  ;;  %v267_v37 = vadd.f32 %v265_v26, %v243_v28 }
  0xe8   : > { %v273_v34 = vsel %vm272_vm2, %v269_v30, %v271_v29  ;;  %v274_v35 = vsel %vm272_vm2, %v271_v29, %v269_v30 }
  0xe9   : > { %v288_v38 = vmul.f32 %v281_v18, %v274_v35  ;;  %v289_v39 = vmul.f32 %v285_v19, %v273_v34 }
  0xeb   : > { %v290_v43 = vadd.f32 %v288_v38, %v266_v36  ;;  %v291_v44 = vadd.f32 %v289_v39, %v267_v37  ;;  %v312_v45 = vpop.permute.xlu1 %311  ;;  %v310_v47 = vpop.permute.xlu0 %309 }
  0xec   : > { %v314_v49 = vsel %vm6747_vm3, %v310_v47, %v312_v45  ;;  %v315_v50 = vsel %vm6747_vm3, %v312_v45, %v310_v47  ;;  %vm1118_vm3 = vcmp.lt.s32.totalorder %v4231_v4, 8 }
  0xed   : > { %v308_v54 = vadd.f32 %v306_v46, %v291_v44  ;;  %v307_v55 = vadd.f32 %v305_v48, %v290_v43  ;;  %v329_v56 = vmul.f32 %v322_v40, %v314_v49  ;;  %v330_v57 = vmul.f32 %v326_v41, %v315_v50 }
  0xef   : > { %v336_v58 = vpop.permute.xlu1 %335  ;;  %v334_v59 = vpop.permute.xlu0 %333  ;;  %v331_v7 = vadd.f32 %v329_v56, %v307_v55  ;;  %v332_v8 = vadd.f32 %v330_v57, %v308_v54 }
  0xf0   : > { %v338_v60 = vsel %vm6717_vm4, %v334_v59, %v336_v58  ;;  %v339_v61 = vsel %vm6717_vm4, %v336_v58, %v334_v59  ;;  %vm1623_vm4 = vcmp.lt.s32.totalorder %v4231_v4, 16 }
  0xf1   : > { %v353_v62 = vmul.f32 %v346_v51, %v338_v60  ;;  %v354_v63 = vmul.f32 %v350_v52, %v339_v61 }
  0xf3   : > { %v360_v9 = vpop.permute.xlu1 %359  ;;  %v358_v10 = vpop.permute.xlu0 %357  ;;  %v355_v15 = vadd.f32 %v353_v62, %v331_v7  ;;  %v356_v16 = vadd.f32 %v354_v63, %v332_v8 }
  0xf4   : > { %v362_v13 = vsel %vm6687_vm5, %v358_v10, %v360_v9  ;;  %v363_v14 = vsel %vm6687_vm5, %v360_v9, %v358_v10 }
  0xf5   : > { %v377_v17 = vmul.f32 %v370_v0, %v362_v13  ;;  %v378_v18 = vmul.f32 %v374_v1, %v363_v14 }
  0xf7   : > { %v379_v19 = vadd.f32 %v377_v17, %v355_v15  ;;  %v380_v20 = vadd.f32 %v378_v18, %v356_v16 }
  0xf9   : > { %v394_v21 = vadd.f32 %v387_v11, %v379_v19  ;;  %v395_v22 = vadd.f32 %v391_v12, %v380_v20 }
  0xfb   : > { %v398_v23 = vmul.f32 0.70710677, %v394_v21  ;;  %v399_v24 = vmul.f32 0.70710677, %v395_v22  ;;  %v396_v2 = vmul.f32 0.5, %v394_v21  ;;  %v397_v9 = vmul.f32 0.5, %v395_v22 }
  0xfd   : > { %v400_v25 = vand.u32 2147483647, %v398_v23  ;;  %v401_v26 = vand.u32 2147483647, %v399_v24  ;;  %vm440_vm6 = vcmp.ge.f32.partialorder %v398_v23, 0.0  ;;  %vm441_vm7 = vcmp.ge.f32.partialorder %v399_v24, 0.0 }
  0xff   : > { %v402_v27 = vmul.f32 0.3275911, %v400_v25  ;;  %v403_v28 = vmul.f32 0.3275911, %v401_v26  ;;  %v428_v31 = vsub.f32 0.0, %v400_v25  ;;  %v429_v32 = vsub.f32 0.0, %v401_v26 }
 0x101   : > { %v404_v29 = vadd.f32 1.0, %v402_v27  ;;  %v405_v30 = vadd.f32 1.0, %v403_v28  ;;  %v430_v34 = vmul.f32 %v428_v31, %v400_v25  ;;  %v431_v37 = vmul.f32 %v429_v32, %v401_v26 }
 0x103   : > { %3794 = vrcp.f32 %v404_v29  ;;  %v432_v41 = vmul.f32 1.442695, %v430_v34  ;;  %v434_v43 = vmul.f32 1.442695, %v431_v37 }
 0x104   : > { %3796 = vrcp.f32 %v405_v30  ;;  %v757_v37 = vld [vmem:[#allocation5 + $0x15] ss:$8 sm:$0x3] }
 0x105   : > { %3798 = vpow2.f32 %v432_v41  ;;  %v4441_v41 = vld [vmem:[#allocation5 + $0x11] ss:$8 sm:$0x3] }
 0x106   : > { %3800 = vpow2.f32 %v434_v43  ;;  %v4445_v43 = vld [vmem:[#allocation5 + $0x12] ss:$8 sm:$0x3] }
 0x10d   : > { %v3795_v33 = vpop.eup %3794 }
 0x10e   : > { %v3797_v35 = vpop.eup %3796  ;;  %v410_v36 = vmul.f32 1.0614054, %v3795_v33 }
 0x10f   : > { %v411_v38 = vmul.f32 1.0614054, %v3797_v35  ;;  %v3799_v56 = vpop.eup %3798 }
 0x110   : > { %v412_v39 = vadd.f32 -1.4531521, %v410_v36  ;;  %v3801_v58 = vpop.eup %3800 }
 0x111   : > { %v413_v40 = vadd.f32 -1.4531521, %v411_v38 }
 0x112   : > { %v414_v42 = vmul.f32 %v3795_v33, %v412_v39  ;;  %v546_v39 = vld [vmem:[#allocation5 + $0x4] ss:$8 sm:$0x3] }
 0x113   : > { %v415_v44 = vmul.f32 %v3797_v35, %v413_v40  ;;  %v960_v40 = vld [vmem:[#allocation5 + $0x26] ss:$8 sm:$0x3] }
 0x114   : > { %v416_v45 = vadd.f32 1.4214138, %v414_v42 }
 0x115   : > { %v417_v46 = vadd.f32 1.4214138, %v415_v44  ;;  %v762_v44 = vrot.slane %v757_v37, %v4234_v5 }
 0x116   : > { %v418_v47 = vmul.f32 %v3795_v33, %v416_v45  ;;  %v4448_v45 = vld [vmem:[#allocation5 + $0x13] ss:$8 sm:$0x3] }
 0x117   : > { %v419_v48 = vmul.f32 %v3797_v35, %v417_v46  ;;  %v4450_v46 = vld [vmem:[#allocation5 + $0x14] ss:$8 sm:$0x3] }
 0x118   : > { %v420_v49 = vadd.f32 -0.28449672, %v418_v47  ;;  %v766_v47 = vrot.slane %v757_v37, %v4237_v6  ;;  %v4537_v37 = vld [vmem:[#allocation5 + $0x23] ss:$8 sm:$0x3] }
 0x119   : > { %v421_v50 = vadd.f32 -0.28449672, %v419_v48  ;;  %v551_v48 = vrot.slane %v546_v39, %v4234_v5 }
 0x11a   : > { %v422_v51 = vmul.f32 %v3795_v33, %v420_v49  ;;  %v555_v49 = vrot.slane %v546_v39, %v4237_v6  ;;  %v4504_v39 = vld [vmem:[#allocation5 + $0x1] ss:$8 sm:$0x3] }
 0x11b   : > { %v423_v52 = vmul.f32 %v3797_v35, %v421_v50  ;;  %v965_v50 = vrot.slane %v960_v40, %v4234_v5 }
 0x11c   : > { %v424_v53 = vadd.f32 0.2548296, %v422_v51  ;;  %v4598_v51 = vld [vmem:[#allocation5 + $0x5] ss:$8 sm:$0x3] }
 0x11d   : > { %v425_v54 = vadd.f32 0.2548296, %v423_v52 }
 0x11e   : > { %v426_v55 = vmul.f32 %v3795_v33, %v424_v53 }
 0x11f   : > { %v427_v57 = vmul.f32 %v3797_v35, %v425_v54  ;;  %v969_v54 = vrot.slane %v960_v40, %v4237_v6  ;;  %v4506_v40 = vld [vmem:[#allocation5 + $0x2] ss:$8 sm:$0x3] }
 0x120   : > { %v436_v59 = vmul.f32 %v3799_v56, %v426_v55  ;;  %v699_v55 = vrot.slane %v4445_v43, %v4234_v5  ;;  %v4469_v56 = vld [vmem:[#allocation5 + $0x16] ss:$8 sm:$0x3] }
 0x121   : > { %v437_v60 = vmul.f32 %v3801_v58, %v427_v57  ;;  %v703_v58 = vrot.slane %v4445_v43, %v4237_v6 }
 0x122   : > { %v438_v61 = vsub.f32 1.0, %v436_v59 }
 0x123   : > { %v439_v62 = vsub.f32 1.0, %v437_v60 }
 0x124   : > { %v442_v63 = vsub.f32 0.0, %v438_v61 }
 0x125   : > { %v443_v0 = vsub.f32 0.0, %v439_v62 }
 0x126   : > { %v444_v1 = vsel %vm440_vm6, %v438_v61, %v442_v63  ;;  %v4483_v63 = vld [vmem:[#allocation5 + $0x20] ss:$8 sm:$0x3]  ;;  %vm638_vm6 = vcmp.lt.s32.totalorder %v4231_v4, 92 }
 0x127   : > { %v445_v7 = vsel %vm441_vm7, %v439_v62, %v443_v0  ;;  %v446_v8 = vadd.f32 1.0, %v444_v1  ;;  %v4481_v62 = vld [vmem:[#allocation5 + $0x17] ss:$8 sm:$0x3] }
 0x128   : > { %v447_v10 = vadd.f32 1.0, %v445_v7  ;;  %v4493_v7 = vld [vmem:[#allocation5 + $0x21] ss:$8 sm:$0x3] }
 0x129   : > { %v4287_v11 = vmul.f32 %v446_v8, %v396_v2  ;;  %6792 = vst [vmem:[#allocation16_spill] sm:$0xff] %v4493_v7  ;;  %v4495_v8 = vld [vmem:[#allocation5] ss:$8 sm:$0x3] }
 0x12a   : > { %v4289_v12 = vmul.f32 %v447_v10, %v397_v9  ;;  %v4522_v10 = vld [vmem:[#allocation5 + $0x22] ss:$8 sm:$0x3] }
 0x12b   : > { %6790 = vst [vmem:[#allocation14_spill] sm:$0xff] %v4287_v11  ;;  %666 = vrot.lane.b32.xlu0 %v4287_v11, %s3973_s29  ;;  %v4324_v13 = vrot.slane %v4287_v11, 7  ;;  %v4342_v15 = vrot.slane %v4287_v11, 1  ;;  %v4491_v2 = vmul.f32 %v762_v44, %v4287_v11 }
 0x12c   : > { %6791 = vst [vmem:[#allocation15_spill] sm:$0xff] %v4289_v12  ;;  %668 = vrot.lane.b32.xlu1 %v4289_v12, %s3973_s29  ;;  %v4327_v14 = vrot.slane %v4289_v12, 7  ;;  %v4345_v16 = vrot.slane %v4289_v12, 1  ;;  %v4488_v1 = vmul.f32 %v766_v47, %v4289_v12 }
 0x12d   : > { %v4498_v9 = vmul.f32 %v551_v48, %v4324_v13  ;;  %v4514_v47 = vmul.f32 %v965_v50, %v4342_v15  ;;  %v4539_v48 = vld [vmem:[#allocation5 + $0x3] ss:$8 sm:$0x3] }
 0x12e   : > { %v4511_v44 = vmul.f32 %v555_v49, %v4327_v14  ;;  %v4527_v61 = vmul.f32 %v969_v54, %v4345_v16  ;;  %v4563_v54 = vld [vmem:[#allocation5 + $0x24] ss:$8 sm:$0x3] }
 0x12f   : > { %687 = vrot.lane.b32.xlu0 %v4287_v11, %s3974_s30  ;;  %6793 = vst [vmem:[#allocation17_spill] sm:$0xff] %v4514_v47  ;;  %v4629_v47 = vld [vmem:[#allocation5 + $0x27] ss:$8 sm:$0x3] }
 0x130   : > { %689 = vrot.lane.b32.xlu1 %v4289_v12, %s3974_s30  ;;  %6794 = vst [vmem:[#allocation18_spill] sm:$0xff] %v4527_v61  ;;  %v4627_v61 = vld [vmem:[#allocation5 + $0x6] ss:$8 sm:$0x3] }
 0x133   : > { %710 = vrot.lane.b32.xlu0 %v4287_v11, %s3975_s23 }
 0x134   : > { %712 = vrot.lane.b32.xlu1 %v4289_v12, %s3975_s23 }
 0x137   : > { %733 = vrot.lane.b32.xlu0 %v4287_v11, %s3976_s5 }
 0x138   : > { %735 = vrot.lane.b32.xlu1 %v4289_v12, %s3976_s5 }
 0x13b   : > { %773 = vrot.lane.b32.xlu0 %v4287_v11, %s3977_s10 }
 0x13c   : > { %775 = vrot.lane.b32.xlu1 %v4289_v12, %s3977_s10 }
 0x13f   : > { %796 = vrot.lane.b32.xlu0 %v4287_v11, %s3978_s11 }
 0x140   : > { %798 = vrot.lane.b32.xlu1 %v4289_v12, %s3978_s11 }
 0x143   : > { %819 = vrot.lane.b32.xlu0 %v4287_v11, %s3979_s25 }
 0x144   : > { %821 = vrot.lane.b32.xlu1 %v4289_v12, %s3979_s25 }
 0x147   : > { %842 = vrot.lane.b32.xlu0 %v4287_v11, %s3980_s7  ;;  %v6797_v11 = vrot.slane %v4448_v45, %v4234_v5 }
 0x148   : > { %844 = vrot.lane.b32.xlu1 %v4289_v12, %s3980_s7 }
 0x14b   : > { %452 = vrot.lane.b32.xlu0 %v4324_v13, %s3973_s29 }
 0x14c   : > { %454 = vrot.lane.b32.xlu1 %v4327_v14, %s3973_s29 }
 0x14f   : > { %473 = vrot.lane.b32.xlu0 %v4324_v13, %s3974_s30 }
 0x150   : > { %475 = vrot.lane.b32.xlu1 %v4327_v14, %s3974_s30 }
 0x153   : > { %497 = vrot.lane.b32.xlu0 %v4324_v13, %s3975_s23 }
 0x154   : > { %499 = vrot.lane.b32.xlu1 %v4327_v14, %s3975_s23 }
 0x157   : > { %869 = vrot.lane.b32.xlu0 %v4342_v15, %s3973_s29 }
 0x158   : > { %871 = vrot.lane.b32.xlu1 %v4345_v16, %s3973_s29  ;;  %s3983_s29 = smov 20  }
 0x15b   : > { %890 = vrot.lane.b32.xlu0 %v4342_v15, %s3974_s30 }
 0x15c   : > { %892 = vrot.lane.b32.xlu1 %v4345_v16, %s3974_s30 }
 0x15f   : > { %521 = vrot.lane.b32.xlu0 %v4324_v13, %s3976_s5 }
 0x160   : > { %523 = vrot.lane.b32.xlu1 %v4327_v14, %s3976_s5 }
 0x163   : > { %913 = vrot.lane.b32.xlu0 %v4342_v15, %s3975_s23 }
 0x164   : > { %915 = vrot.lane.b32.xlu1 %v4345_v16, %s3975_s23 }
 0x167   : > { %936 = vrot.lane.b32.xlu0 %v4342_v15, %s3976_s5 }
 0x168   : > { %938 = vrot.lane.b32.xlu1 %v4345_v16, %s3976_s5 }
 0x16b   : > { %562 = vrot.lane.b32.xlu0 %v4324_v13, %s3977_s10 }
 0x16c   : > { %564 = vrot.lane.b32.xlu1 %v4327_v14, %s3977_s10 }
 0x16f   : > { %586 = vrot.lane.b32.xlu0 %v4324_v13, %s3978_s11 }
 0x170   : > { %588 = vrot.lane.b32.xlu1 %v4327_v14, %s3978_s11 }
 0x173   : > { %976 = vrot.lane.b32.xlu0 %v4342_v15, %s3977_s10 }
 0x174   : > { %978 = vrot.lane.b32.xlu1 %v4345_v16, %s3977_s10 }
 0x177   : > { %610 = vrot.lane.b32.xlu0 %v4324_v13, %s3979_s25 }
 0x178   : > { %612 = vrot.lane.b32.xlu1 %v4327_v14, %s3979_s25 }
 0x17b   : > { %999 = vrot.lane.b32.xlu0 %v4342_v15, %s3978_s11 }
 0x17c   : > { %1001 = vrot.lane.b32.xlu1 %v4345_v16, %s3978_s11 }
 0x17f   : > { %634 = vrot.lane.b32.xlu0 %v4324_v13, %s3980_s7 }
 0x180   : > { %636 = vrot.lane.b32.xlu1 %v4327_v14, %s3980_s7 }
 0x183   : > { %1022 = vrot.lane.b32.xlu0 %v4342_v15, %s3979_s25 }
 0x184   : > { %1024 = vrot.lane.b32.xlu1 %v4345_v16, %s3979_s25 }
 0x187   : > { %1045 = vrot.lane.b32.xlu0 %v4342_v15, %s3980_s7 }
 0x188   : > { %1047 = vrot.lane.b32.xlu1 %v4345_v16, %s3980_s7  ;;  %s3984_s7 = smov 16  }
 0x19d   : > { %v4399_v17 = vpop.permute.xlu0 %666 }
 0x19e   : > { %v4401_v18 = vpop.permute.xlu1 %668 }
 0x19f   : > { %v670_v50 = vsel %vm456_vm8, %v4399_v17, %v4401_v18  ;;  %v671_v15 = vsel %vm456_vm8, %v4401_v18, %v4399_v17  ;;  %v4596_v18 = vld [vmem:[#allocation5 + $0x25] ss:$8 sm:$0x3]  ;;  %v6796_v17 = vrot.slane %v4441_v41, %v4237_v6 }
 0x1a1   : > { %v4403_v19 = vpop.permute.xlu0 %687  ;;  %v686_v52 = vmul.f32 %v6796_v17, %v670_v50 }
 0x1a2   : > { %v4405_v20 = vpop.permute.xlu1 %689 }
 0x1a3   : > { %v691_v49 = vsel %vm477_vm9, %v4403_v19, %v4405_v20  ;;  %v692_v13 = vsel %vm477_vm9, %v4405_v20, %v4403_v19 }
 0x1a4   : > { %v706_v20 = vmul.f32 %v699_v55, %v692_v13  ;;  %v707_v16 = vmul.f32 %v703_v58, %v691_v49  ;;  %v658_v58 = vadd.s32 4294967295, %v4229_v3  ;;  %v6795_v13 = vrot.slane %v4441_v41, %v4234_v5  ;;  %v4648_v41 = vld [vmem:[#allocation5 + $0x30] ss:$8 sm:$0x3] }
 0x1a5   : > { %v4407_v21 = vpop.permute.xlu0 %710 }
 0x1a6   : > { %v4409_v22 = vpop.permute.xlu1 %712  ;;  %v685_v49 = vmul.f32 %v6795_v13, %v671_v15  ;;  %v6800_v13 = vrot.slane %v4450_v46, %v4237_v6  ;;  %v4646_v15 = vld [vmem:[#allocation5 + $0x7] ss:$8 sm:$0x3]  ;;  %vm659_vm14 = vcmp.ge.s32.totalorder %v658_v58, 0 }
 0x1a7   : > { %v714_v59 = vsel %vm501_vm10, %v4407_v21, %v4409_v22  ;;  %v715_v60 = vsel %vm501_vm10, %v4409_v22, %v4407_v21 }
 0x1a8   : > { %v729_v7 = vmul.f32 %v6797_v11, %v715_v60  ;;  %v6799_v60 = vrot.slane %v4450_v46, %v4234_v5  ;;  %v4660_v46 = vld [vmem:[#allocation5 + $0x10] ss:$8 sm:$0x3] }
 0x1a9   : > { %v4411_v23 = vpop.permute.xlu0 %733 }
 0x1aa   : > { %v4413_v24 = vpop.permute.xlu1 %735 }
 0x1ab   : > { %v737_v12 = vsel %vm525_vm11, %v4411_v23, %v4413_v24  ;;  %v738_v21 = vsel %vm525_vm11, %v4413_v24, %v4411_v23  ;;  %v6798_v23 = vrot.slane %v4448_v45, %v4237_v6  ;;  %v708_v45 = vadd.f32 %v706_v20, %v685_v49 }
 0x1ac   : > { %v752_v17 = vmul.f32 %v6799_v60, %v738_v21 }
 0x1ad   : > { %v4415_v25 = vpop.permute.xlu0 %773  ;;  %v730_v24 = vmul.f32 %v6798_v23, %v714_v59  ;;  %v709_v59 = vadd.f32 %v707_v16, %v686_v52  ;;  %v753_v23 = vmul.f32 %v6800_v13, %v737_v12  ;;  %v731_v21 = vadd.f32 %v729_v7, %v708_v45  ;;  %v4664_v13 = vld [vmem:[#allocation5 + $0x31] ss:$8 sm:$0x3] }
 0x1ae   : > { %v4417_v26 = vpop.permute.xlu1 %775  ;;  %v6682_v12 = vmov 0.0  }
 0x1af   : > { %v732_v49 = vadd.f32 %v730_v24, %v709_v59  ;;  %v754_v11 = vadd.f32 %v752_v17, %v731_v21  ;;  %v4687_v17 = vsel %vm659_vm14, 1.0, %v6682_v12  ;;  %v777_v21 = vsel %vm566_vm12, %v4415_v25, %v4417_v26 }
 0x1b0   : > { %6801 = vst [vmem:[#allocation19_spill] sm:$0xff] %v4687_v17 }
 0x1b1   : > { %v4419_v27 = vpop.permute.xlu0 %796  ;;  %v755_v7 = vadd.f32 %v753_v23, %v732_v49  ;;  %v6802_v23 = vrot.slane %v4504_v39, %v4234_v5  ;;  %v771_v52 = vadd.f32 %v4491_v2, %v754_v11  ;;  %v6806_v2 = vrot.slane %v4469_v56, %v4234_v5 }
 0x1b2   : > { %v4421_v28 = vpop.permute.xlu1 %798 }
 0x1b3   : > { %v792_v11 = vmul.f32 %v6806_v2, %v777_v21  ;;  %v6811_v2 = vrot.slane %v4539_v48, %v4237_v6 }
 0x1b5   : > { %v4423_v29 = vpop.permute.xlu0 %819 }
 0x1b6   : > { %v4425_v30 = vpop.permute.xlu1 %821 }
 0x1b9   : > { %v4427_v31 = vpop.permute.xlu0 %842 }
 0x1ba   : > { %v4429_v32 = vpop.permute.xlu1 %844 }
 0x1bd   : > { %v4431_v33 = vpop.permute.xlu0 %452 }
 0x1be   : > { %v4433_v34 = vpop.permute.xlu1 %454 }
 0x1bf   : > { %v458_v49 = vsel %vm456_vm8, %v4433_v34, %v4431_v33 }
 0x1c1   : > { %v4435_v35 = vpop.permute.xlu0 %473 }
 0x1c2   : > { %v4437_v36 = vpop.permute.xlu1 %475 }
 0x1c3   : > { %v478_v58 = vsel %vm477_vm9, %v4435_v35, %v4437_v36  ;;  %v479_v24 = vsel %vm477_vm9, %v4437_v36, %v4435_v35  ;;  %v778_v35 = vsel %vm566_vm12, %v4417_v26, %v4415_v25  ;;  %v457_v36 = vsel %vm456_vm8, %v4431_v33, %v4433_v34 }
 0x1c4   : > { %v493_v16 = vmul.f32 %v6802_v23, %v479_v24  ;;  %v6803_v25 = vrot.slane %v4504_v39, %v4237_v6  ;;  %v772_v34 = vadd.f32 %v4488_v1, %v755_v7  ;;  %v4727_v39 = vadd.s32 1, %v4229_v3  ;;  %v4755_v3 = vld [vmem:[#allocation5 + $0x32] ss:$8 sm:$0x3] }
 0x1c5   : > { %v4439_v38 = vpop.permute.xlu0 %497  ;;  %v6807_v7 = vrot.slane %v4469_v56, %v4237_v6  ;;  %v801_v56 = vsel %vm590_vm13, %v4421_v28, %v4419_v27 }
 0x1c6   : > { %v4443_v42 = vpop.permute.xlu1 %499  ;;  %v494_v26 = vmul.f32 %v6803_v25, %v478_v58  ;;  %v6804_v58 = vrot.slane %v4495_v8, %v4234_v5  ;;  %v6805_v25 = vrot.slane %v4495_v8, %v4237_v6  ;;  %vm1070_vm7 = vcmp.lt.s32.totalorder %v4727_v39, 8 }
 0x1c7   : > { %v502_v59 = vsel %vm501_vm10, %v4439_v38, %v4443_v42  ;;  %v503_v33 = vsel %vm501_vm10, %v4443_v42, %v4439_v38  ;;  %v793_v8 = vmul.f32 %v6807_v7, %v778_v35  ;;  %v6810_v35 = vrot.slane %v4539_v48, %v4234_v5 }
 0x1c8   : > { %v471_v23 = vmul.f32 %v6804_v58, %v458_v49  ;;  %v472_v20 = vmul.f32 %v6805_v25, %v457_v36  ;;  %v6808_v36 = vrot.slane %v4506_v40, %v4234_v5  ;;  %v6809_v58 = vrot.slane %v4506_v40, %v4237_v6 }
 0x1c9   : > { %v4461_v53 = vpop.permute.xlu0 %869  ;;  %v795_v48 = vadd.f32 %v793_v8, %v772_v34  ;;  %v6812_v7 = vrot.slane %v4481_v62, %v4234_v5  ;;  %v6816_v34 = vrot.slane %v4522_v10, %v4234_v5  ;;  %v6817_v8 = vrot.slane %v4522_v10, %v4237_v6 }
 0x1ca   : > { %v4471_v57 = vpop.permute.xlu1 %871  ;;  %v517_v49 = vmul.f32 %v6808_v36, %v503_v33  ;;  %v518_v25 = vmul.f32 %v6809_v58, %v502_v59  ;;  %v496_v21 = vadd.f32 %v494_v26, %v472_v20  ;;  %v794_v26 = vadd.f32 %v792_v11, %v771_v52 }
 0x1cb   : > { %v874_v20 = vsel %vm456_vm8, %v4471_v57, %v4461_v53  ;;  %v6813_v58 = vrot.slane %v4481_v62, %v4237_v6 }
 0x1cc   : > { %v888_v11 = vmul.f32 %v6816_v34, %v874_v20 }
 0x1cd   : > { %v4508_v43 = vpop.permute.xlu0 %890 }
 0x1ce   : > { %v4524_v0 = vpop.permute.xlu1 %892 }
 0x1cf   : > { %v894_v40 = vsel %vm477_vm9, %v4508_v43, %v4524_v0  ;;  %v895_v59 = vsel %vm477_vm9, %v4524_v0, %v4508_v43  ;;  %v1057_v0 = vrot.slane %v4755_v3, %v4234_v5  ;;  %v1061_v43 = vrot.slane %v4755_v3, %v4237_v6 }
 0x1d1   : > { %v4561_v14 = vpop.permute.xlu0 %521 }
 0x1d2   : > { %v4571_v19 = vpop.permute.xlu1 %523 }
 0x1d3   : > { %v526_v38 = vsel %vm525_vm11, %v4561_v14, %v4571_v19  ;;  %v527_v42 = vsel %vm525_vm11, %v4571_v19, %v4561_v14  ;;  %v800_v14 = vsel %vm590_vm13, %v4419_v27, %v4421_v28  ;;  %v495_v19 = vadd.f32 %v493_v16, %v471_v23 }
 0x1d4   : > { %v541_v33 = vmul.f32 %v6810_v35, %v527_v42  ;;  %v542_v27 = vmul.f32 %v6811_v2, %v526_v38  ;;  %v873_v28 = vsel %vm456_vm8, %v4461_v53, %v4471_v57  ;;  %v520_v38 = vadd.f32 %v518_v25, %v496_v21 }
 0x1d5   : > { %v4610_v55 = vpop.permute.xlu0 %913  ;;  %v519_v23 = vadd.f32 %v517_v49, %v495_v19  ;;  %v815_v36 = vmul.f32 %v6812_v7, %v800_v14  ;;  %v816_v53 = vmul.f32 %v6813_v58, %v801_v56  ;;  %v6814_v57 = vrot.slane %v4537_v37, %v4234_v5 }
 0x1d6   : > { %v4625_v22 = vpop.permute.xlu1 %915  ;;  %v6815_v2 = vrot.slane %v4537_v37, %v4237_v6  ;;  %v889_v49 = vmul.f32 %v6817_v8, %v873_v28  ;;  %v544_v14 = vadd.f32 %v542_v27, %v520_v38  ;;  %v823_v21 = vsel %vm614_vm15, %v4423_v29, %v4425_v30 }
 0x1d7   : > { %v909_v35 = vmul.f32 %v6814_v57, %v895_v59  ;;  %v543_v25 = vadd.f32 %v541_v33, %v519_v23  ;;  %v917_v62 = vsel %vm501_vm10, %v4610_v55, %v4625_v22  ;;  %v918_v37 = vsel %vm501_vm10, %v4625_v22, %v4610_v55 }
 0x1d8   : > { %v910_v52 = vmul.f32 %v6815_v2, %v894_v40  ;;  %v824_v40 = vsel %vm614_vm15, %v4425_v30, %v4423_v29  ;;  %v6818_v30 = vrot.slane %v4563_v54, %v4234_v5  ;;  %v6819_v28 = vrot.slane %v4563_v54, %v4237_v6 }
 0x1d9   : > { %v4650_v50 = vpop.permute.xlu0 %936  ;;  %v6821_v23 = vrot.slane %v4598_v51, %v4237_v6  ;;  %v6822_v7 = vrot.slane %v4596_v18, %v4234_v5  ;;  %v561_v57 = vadd.f32 %v4511_v44, %v544_v14  ;;  %v560_v54 = vadd.f32 %v4498_v9, %v543_v25 }
 0x1da   : > { %v4662_v60 = vpop.permute.xlu1 %938  ;;  %v912_v59 = vadd.f32 %v910_v52, %v889_v49  ;;  %v932_v27 = vmul.f32 %v6818_v30, %v918_v37  ;;  %v933_v20 = vmul.f32 %v6819_v28, %v917_v62  ;;  %v6824_v2 = vrot.slane %v4627_v61, %v4234_v5 }
 0x1db   : > { %v940_v22 = vsel %vm525_vm11, %v4650_v50, %v4662_v60  ;;  %v941_v55 = vsel %vm525_vm11, %v4662_v60, %v4650_v50  ;;  %v6820_v50 = vrot.slane %v4598_v51, %v4234_v5  ;;  %v6825_v51 = vrot.slane %v4627_v61, %v4237_v6 }
 0x1dc   : > { %v817_v49 = vadd.f32 %v815_v36, %v794_v26  ;;  %v818_v44 = vadd.f32 %v816_v53, %v795_v48  ;;  %v6826_v9 = vrot.slane %v4483_v63, %v4234_v5  ;;  %v6827_v14 = vrot.slane %v4483_v63, %v4237_v6 }
 0x1dd   : > { %v563_v45 = vpop.permute.xlu0 %562  ;;  %v935_v61 = vadd.f32 %v933_v20, %v912_v59  ;;  %v6828_v26 = vrot.slane %v4646_v15, %v4234_v5  ;;  %v6829_v36 = vrot.slane %v4646_v15, %v4237_v6  ;;  %v6830_v15 = vrot.slane %v4629_v47, %v4234_v5 }
 0x1de   : > { %v565_v12 = vpop.permute.xlu1 %564  ;;  %v838_v25 = vmul.f32 %v6826_v9, %v823_v21  ;;  %v839_v62 = vmul.f32 %v6827_v14, %v824_v40  ;;  %v6831_v30 = vrot.slane %v4629_v47, %v4237_v6  ;;  %v6832_v28 = vrot.slane %v4660_v46, %v4234_v5 }
 0x1df   : > { %v567_v56 = vsel %vm566_vm12, %v563_v45, %v565_v12  ;;  %v568_v19 = vsel %vm566_vm12, %v565_v12, %v563_v45  ;;  %v911_v45 = vadd.f32 %v909_v35, %v888_v11  ;;  %v6838_v9 = vrot.slane %v4664_v13, %v4234_v5 }
 0x1e0   : > { %v582_v60 = vmul.f32 %v6820_v50, %v567_v56  ;;  %v583_v38 = vmul.f32 %v6821_v23, %v568_v19  ;;  %v6833_v50 = vrot.slane %v4660_v46, %v4237_v6  ;;  %v846_v23 = vsel %vm638_vm6, %v4427_v31, %v4429_v32 }
 0x1e1   : > { %v587_v1 = vpop.permute.xlu0 %586  ;;  %v934_v37 = vadd.f32 %v932_v27, %v911_v45  ;;  %v6836_v46 = vrot.slane %v4648_v41, %v4234_v5 }
 0x1e2   : > { %v589_v24 = vpop.permute.xlu1 %588  ;;  %v584_v56 = vadd.f32 %v582_v60, %v560_v54  ;;  %v585_v19 = vadd.f32 %v583_v38, %v561_v57  ;;  %v847_v38 = vsel %vm638_vm6, %v4429_v32, %v4427_v31  ;;  %v6835_v57 = vld [vmem:[#allocation18_spill] sm:$0xff] }
 0x1e3   : > { %v591_v33 = vsel %vm590_vm13, %v587_v1, %v589_v24  ;;  %v592_v29 = vsel %vm590_vm13, %v589_v24, %v587_v1  ;;  %v955_v24 = vmul.f32 %v6822_v7, %v941_v55  ;;  %v6823_v1 = vrot.slane %v4596_v18, %v4237_v6 }
 0x1e4   : > { %v606_v52 = vmul.f32 %v6824_v2, %v591_v33  ;;  %v607_v34 = vmul.f32 %v6825_v51, %v592_v29  ;;  %v6837_v2 = vrot.slane %v4648_v41, %v4237_v6 }
 0x1e5   : > { %v977_v16 = vpop.permute.xlu0 %976  ;;  %v956_v58 = vmul.f32 %v6823_v1, %v940_v22  ;;  %v957_v21 = vadd.f32 %v955_v24, %v934_v37  ;;  %v6834_v1 = vld [vmem:[#allocation17_spill] sm:$0xff]  ;;  %v6839_v37 = vrot.slane %v4664_v13, %v4237_v6 }
 0x1e6   : > { %v979_v42 = vpop.permute.xlu1 %978  ;;  %v608_v55 = vadd.f32 %v606_v52, %v584_v56  ;;  %v841_v56 = vadd.f32 %v839_v62, %v818_v44 }
 0x1e7   : > { %v980_v22 = vsel %vm566_vm12, %v977_v16, %v979_v42  ;;  %v958_v40 = vadd.f32 %v956_v58, %v935_v61  ;;  %v974_v58 = vadd.f32 %v6834_v1, %v957_v21  ;;  %v840_v61 = vadd.f32 %v838_v25, %v817_v49  ;;  %v5006_v1 = vld [vmem:[#allocation5 + $0x60] ss:$8 sm:$0x3] }
 0x1e8   : > { %v995_v29 = vmul.f32 %v6830_v15, %v980_v22  ;;  %v6840_v22 = vld [vmem:[#allocation16_spill] sm:$0xff] }
 0x1e9   : > { %v611_v10 = vpop.permute.xlu0 %610  ;;  %v975_v54 = vadd.f32 %v6835_v57, %v958_v40  ;;  %v5010_v57 = vld [vmem:[#allocation5 + $0x61] ss:$8 sm:$0x3] }
 0x1ea   : > { %v613_v12 = vpop.permute.xlu1 %612 }
 0x1eb   : > { %v615_v11 = vsel %vm614_vm15, %v611_v10, %v613_v12  ;;  %v616_v18 = vsel %vm614_vm15, %v613_v12, %v611_v10  ;;  %v981_v10 = vsel %vm566_vm12, %v979_v42, %v977_v16  ;;  %v609_v12 = vadd.f32 %v607_v34, %v585_v19 }
 0x1ec   : > { %v630_v48 = vmul.f32 %v6828_v26, %v615_v11  ;;  %v631_v53 = vmul.f32 %v6829_v36, %v616_v18  ;;  %v996_v27 = vmul.f32 %v6831_v30, %v981_v10  ;;  %v997_v18 = vadd.f32 %v995_v29, %v974_v58  ;;  %v5008_v58 = vld [vmem:[#allocation5 + $0xa6] ss:$8 sm:$0x3] }
 0x1ed   : > { %v1000_v35 = vpop.permute.xlu0 %999  ;;  %v6841_v10 = vrot.slane %v6840_v22, %v4234_v5 }
 0x1ee   : > { %v1002_v8 = vpop.permute.xlu1 %1001  ;;  %v632_v47 = vadd.f32 %v630_v48, %v608_v55  ;;  %v633_v7 = vadd.f32 %v631_v53, %v609_v12  ;;  %v6842_v48 = vrot.slane %v6840_v22, %v4237_v6  ;;  %v1078_v55 = vld [vmem:[#allocation7] ss:$8 sm:$0x3]  ;;  %v5236_v22 = vld [vmem:[#allocation5 + $0x77] ss:$8 sm:$0x3] }
 0x1ef   : > { %v1003_v59 = vsel %vm590_vm13, %v1000_v35, %v1002_v8  ;;  %v1004_v16 = vsel %vm590_vm13, %v1002_v8, %v1000_v35  ;;  %v998_v8 = vadd.f32 %v996_v27, %v975_v54  ;;  %v861_v26 = vmul.f32 %v6841_v10, %v846_v23  ;;  %v1162_v23 = vld [vmem:[#allocation5 + $0x36] ss:$8 sm:$0x3]  ;;  %6864 = vst [vmem:[#allocation35_spill] sm:$0xff] %v5236_v22 }
 0x1f0   : > { %v1018_v35 = vmul.f32 %v6836_v46, %v1003_v59  ;;  %v1019_v52 = vmul.f32 %v6837_v2, %v1004_v16  ;;  %v862_v36 = vmul.f32 %v6842_v48, %v847_v38  ;;  %v6843_v59 = vmov 0.0   ;;  %v1695_v38 = vld [vmem:[#allocation5 + $0x65] ss:$8 sm:$0x3] }
 0x1f1   : > { %v635_v63 = vpop.permute.xlu0 %634  ;;  %v4956_v16 = vsel %vm1070_vm7, 1.0, %v6843_v59  ;;  %v1083_v30 = vrot.slane %v1078_v55, %v4234_v5  ;;  %v1087_v27 = vrot.slane %v1078_v55, %v4237_v6  ;;  %v1167_v54 = vrot.slane %v1162_v23, %v4234_v5  ;;  %v5050_v48 = vld [vmem:[#allocation5 + $0x34] ss:$8 sm:$0x3] }
 0x1f2   : > { %v637_v45 = vpop.permute.xlu1 %636  ;;  %v1020_v53 = vadd.f32 %v1018_v35, %v997_v18  ;;  %6844 = vst [vmem:[#allocation17_spill] sm:$0xff] %v4956_v16  ;;  %v1171_v46 = vrot.slane %v1162_v23, %v4237_v6  ;;  %v1700_v35 = vrot.slane %v1695_v38, %v4234_v5  ;;  %v5077_v55 = vld [vmem:[#allocation5 + $0x35] ss:$8 sm:$0x3] }
 0x1f3   : > { %v639_v42 = vsel %vm638_vm6, %v635_v63, %v637_v45  ;;  %v640_v33 = vsel %vm638_vm6, %v637_v45, %v635_v63  ;;  %v1021_v63 = vadd.f32 %v1019_v52, %v998_v8  ;;  %v5017_v52 = vld [vmem:[#allocation5 + $0xa7] ss:$8 sm:$0x3]  ;;  %v5194_v23 = vld [vmem:[#allocation5 + $0xc1] ss:$8 sm:$0x3] }
 0x1f4   : > { %v654_v20 = vmul.f32 %v6832_v28, %v639_v42  ;;  %v655_v60 = vmul.f32 %v6833_v50, %v640_v33  ;;  %v863_v42 = vadd.f32 %v861_v26, %v840_v61  ;;  %v864_v33 = vadd.f32 %v862_v36, %v841_v56  ;;  %v5038_v61 = vld [vmem:[#allocation5 + $0x33] ss:$8 sm:$0x3]  ;;  %v5040_v56 = vld [vmem:[#allocation5 + $0x62] ss:$8 sm:$0x3] }
 0x1f5   : > { %v1023_v24 = vpop.permute.xlu0 %1022  ;;  %v5048_v26 = vld [vmem:[#allocation5 + $0xb0] ss:$8 sm:$0x3]  ;;  %6855 = vst [vmem:[#allocation26_spill] sm:$0xff] %v5194_v23 }
 0x1f6   : > { %v1025_v51 = vpop.permute.xlu1 %1024  ;;  %v656_v34 = vadd.f32 %v654_v20, %v632_v47  ;;  %v657_v11 = vadd.f32 %v655_v60, %v633_v7  ;;  %v5002_v47 = vld [vmem:[#allocation5 + $0xa4] ss:$8 sm:$0x3]  ;;  %v2434_v7 = vld [vmem:[#allocation5 + $0xb3] ss:$8 sm:$0x3] }
 0x1f7   : > { %v1026_v31 = vsel %vm614_vm15, %v1023_v24, %v1025_v51  ;;  %v1027_v32 = vsel %vm614_vm15, %v1025_v51, %v1023_v24  ;;  %v5004_v24 = vld [vmem:[#allocation5 + $0xa5] ss:$8 sm:$0x3]  ;;  %v1704_v51 = vrot.slane %v1695_v38, %v4237_v6  ;;  %v5158_v38 = vld [vmem:[#allocation5 + $0x71] ss:$8 sm:$0x3] }
 0x1f8   : > { %v1041_v14 = vmul.f32 %v6838_v9, %v1026_v31  ;;  %v1042_v41 = vmul.f32 %v6839_v37, %v1027_v32  ;;  %v664_v40 = vmul.f32 %v4687_v17, %v656_v34  ;;  %v665_v13 = vmul.f32 %v4687_v17, %v657_v11  ;;  %6849 = vst [vmem:[#allocation22_spill] sm:$0xff] %v5158_v38  ;;  %v5227_v31 = vld [vmem:[#allocation5 + $0x76] ss:$8 sm:$0x3] }
 0x1f9   : > { %v1046_v19 = vpop.permute.xlu0 %1045  ;;  %v2439_v34 = vrot.slane %v2434_v7, %v4234_v5  ;;  %v2443_v11 = vrot.slane %v2434_v7, %v4237_v6  ;;  %v5128_v7 = vld [vmem:[#allocation5 + $0xb5] ss:$8 sm:$0x3]  ;;  %6862 = vst [vmem:[#allocation33_spill] sm:$0xff] %v5227_v31 }
 0x1fa   : > { %v1048_v21 = vpop.permute.xlu1 %1047  ;;  %v1043_v25 = vadd.f32 %v1041_v14, %v1020_v53  ;;  %v1044_v62 = vadd.f32 %v1042_v41, %v1021_v63  ;;  %v865_v28 = vadd.f32 %v863_v42, %v664_v40  ;;  %v866_v20 = vadd.f32 %v864_v33, %v665_v13  ;;  %v5055_v53 = vld [vmem:[#allocation5 + $0x63] ss:$8 sm:$0x3]  ;;  %v5057_v63 = vld [vmem:[#allocation5 + $0xb1] ss:$8 sm:$0x3] }
 0x1fb   : > { %v1049_v49 = vsel %vm638_vm6, %v1046_v19, %v1048_v21  ;;  %v1050_v44 = vsel %vm638_vm6, %v1048_v21, %v1046_v19  ;;  %v5180_v42 = vld [vmem:[#allocation5 + $0x72] ss:$8 sm:$0x3]  ;;  %v5205_v19 = vld [vmem:[#allocation5 + $0xc2] ss:$8 sm:$0x3] }
 0x1fc   : > { %v1064_v12 = vmul.f32 %v1057_v0, %v1049_v49  ;;  %v1065_v45 = vmul.f32 %v1061_v43, %v1050_v44  ;;  %v5170_v44 = vld [vmem:[#allocation5 + $0xb7] ss:$8 sm:$0x3]  ;;  %6852 = vst [vmem:[#allocation23_spill] sm:$0xff] %v5180_v42  ;;  %6856 = vst [vmem:[#allocation27_spill] sm:$0xff] %v5205_v19 }
 0x1fd   : > { %v5223_v14 = vld [vmem:[#allocation5 + $0x74] ss:$8 sm:$0x3]  ;;  %v5307_v19 = vld [vmem:[#allocation5 + $0xd1] ss:$8 sm:$0x3] }
 0x1fe   : > { %v1066_v15 = vadd.f32 %v1064_v12, %v1043_v25  ;;  %v1067_v29 = vadd.f32 %v1065_v45, %v1044_v62  ;;  %v5079_v12 = vld [vmem:[#allocation5 + $0x64] ss:$8 sm:$0x3]  ;;  %v5182_v25 = vld [vmem:[#allocation7 + $0x4] ss:$8 sm:$0x3] }
 0x1ff   : > { %6853 = vst [vmem:[#allocation24_spill] sm:$0xff] %v5182_v25  ;;  %v5215_v62 = vld [vmem:[#allocation5 + $0x73] ss:$8 sm:$0x3]  ;;  %6860 = vst [vmem:[#allocation31_spill] sm:$0xff] %v5223_v14 }
 0x200   : > { %v1074_v0 = vmul.f32 %v4956_v16, %v1066_v15  ;;  %v1075_v3 = vmul.f32 %v4956_v16, %v1067_v29  ;;  %v5188_v15 = vld [vmem:[#allocation5 + $0xc0] ss:$8 sm:$0x3]  ;;  %6858 = vst [vmem:[#allocation29_spill] sm:$0xff] %v5215_v62 }
 0x201   : > { %6854 = vst [vmem:[#allocation25_spill] sm:$0xff] %v5188_v15  ;;  %v5252_v16 = vld [vmem:[#allocation5 + $0x82] ss:$8 sm:$0x3] }
 0x202   : > { %v1076_v43 = vadd.f32 %v1074_v0, %v865_v28  ;;  %v1077_v50 = vadd.f32 %v1075_v3, %v866_v20  ;;  %v5138_v3 = vld [vmem:[#allocation5 + $0x41] ss:$8 sm:$0x3]  ;;  %v5152_v20 = vld [vmem:[#allocation5 + $0xb6] ss:$8 sm:$0x3] }
 0x203   : > { %6848 = vst [vmem:[#allocation21_spill] sm:$0xff] %v5152_v20  ;;  %v6850_v28 = vld [vmem:[#allocation12_spill] sm:$0xff]  ;;  %6867 = vst [vmem:[#allocation38_spill] sm:$0xff] %v5252_v16  ;;  %v5311_v23 = vld [vmem:[#allocation5 + $0xe0] ss:$8 sm:$0x3] }
 0x204   : > { %v4962_v60 = vadd.f32 %v1083_v30, %v1076_v43  ;;  %v4964_v39 = vadd.f32 %v1087_v27, %v1077_v50  ;;  %v5092_v30 = vld [vmem:[#allocation5 + $0xb2] ss:$8 sm:$0x3]  ;;  %v5094_v27 = vld [vmem:[#allocation5 + $0x37] ss:$8 sm:$0x3] }
 0x205   : > { %v5104_v43 = vld [vmem:[#allocation5 + $0x66] ss:$8 sm:$0x3]  ;;  %v5106_v50 = vld [vmem:[#allocation5 + $0xb4] ss:$8 sm:$0x3] }
 0x206   : > { %6845 = vst [vmem:[#allocation18_spill] sm:$0xff] %v4962_v60  ;;  %6846 = vst [vmem:[#allocation16_spill] sm:$0xff] %v4964_v39  ;;  %2305 = vrot.lane.b32.xlu1 %v4964_v39, %s3975_s23  ;;  %2303 = vrot.lane.b32.xlu0 %v4962_v60, %s3975_s23  ;;  %s3986_s23 = smov 8   ;;  %v5053_v36 = vmul.f32 %v1171_v46, %v4964_v39  ;;  %v5060_v21 = vmul.f32 %v1704_v51, %v4964_v39  ;;  %v5116_v46 = vld [vmem:[#allocation5 + $0x40] ss:$8 sm:$0x3] }
 0x207   : > { %v5063_v40 = vmul.f32 %v2443_v11, %v4964_v39  ;;  %v5066_v13 = vmul.f32 %v1167_v54, %v4962_v60  ;;  %v5069_v49 = vmul.f32 %v1700_v35, %v4962_v60  ;;  %v5082_v45 = vmul.f32 %v2439_v34, %v4962_v60  ;;  %v5118_v35 = vld [vmem:[#allocation5 + $0x67] ss:$8 sm:$0x3]  ;;  %v5140_v11 = vld [vmem:[#allocation7 + $0x1] ss:$8 sm:$0x3] }
 0x208   : > { %6847 = vst [vmem:[#allocation20_spill] sm:$0xff] %v5140_v11  ;;  %v5150_v51 = vld [vmem:[#allocation5 + $0x70] ss:$8 sm:$0x3]  ;;  %v1281_v0 = vadd.s32 4294967293, %v6850_v28  ;;  %v1306_v33 = vadd.s32 4294967294, %v6850_v28 }
 0x209   : > { %6851 = vst [vmem:[#allocation12_spill] sm:$0xff] %v5170_v44  ;;  %v1392_v29 = vadd.s32 2, %v6850_v28  ;;  %v1419_v9 = vadd.s32 3, %v6850_v28  ;;  %v1842_v8 = vadd.s32 4294967291, %v6850_v28  ;;  %v1867_v10 = vadd.s32 4294967292, %v6850_v28  ;;  %6876 = vst [vmem:[#allocation47_spill] sm:$0xff] %v5311_v23 }
 0x20a   : > { %2326 = vrot.lane.b32.xlu1 %v4964_v39, %s3982_s28  ;;  %2324 = vrot.lane.b32.xlu0 %v4962_v60, %s3982_s28  ;;  %s3987_s28 = smov 120   ;;  %vm1282_vm8 = vcmp.ge.s32.totalorder %v1281_v0, 0  ;;  %vm1307_vm14 = vcmp.ge.s32.totalorder %v1306_v33, 0  ;;  %v5207_v54 = vld [vmem:[#allocation7 + $0x7] ss:$8 sm:$0x3] }
 0x20b   : > { %6857 = vst [vmem:[#allocation28_spill] sm:$0xff] %v5207_v54  ;;  %v5221_v37 = vsel %vm1282_vm8, 1.0, %v6843_v59  ;;  %vm1394_vm6 = vcmp.lt.s32.totalorder %v1392_v29, 8  ;;  %v5225_v0 = vld [vmem:[#allocation5 + $0x75] ss:$8 sm:$0x3] }
 0x20c   : > { %6859 = vst [vmem:[#allocation30_spill] sm:$0xff] %v5221_v37  ;;  %6861 = vst [vmem:[#allocation32_spill] sm:$0xff] %v5225_v0  ;;  %v2033_v41 = vadd.s32 4, %v6850_v28  ;;  %v5234_v2 = vsel %vm1307_vm14, 1.0, %v6843_v59  ;;  %vm1421_vm7 = vcmp.lt.s32.totalorder %v1419_v9, 8  ;;  %vm1843_vm5 = vcmp.ge.s32.totalorder %v1842_v8, 0 }
 0x20d   : > { %6863 = vst [vmem:[#allocation34_spill] sm:$0xff] %v5234_v2  ;;  %v5248_v33 = vld [vmem:[#allocation5 + $0x81] ss:$8 sm:$0x3]  ;;  %vm1868_vm8 = vcmp.ge.s32.totalorder %v1867_v10, 0  ;;  %v2058_v18 = vadd.s32 5, %v6850_v28 }
 0x20e   : > { %1599 = vrot.lane.b32.xlu1 %v4964_v39, %s3983_s29  ;;  %1597 = vrot.lane.b32.xlu0 %v4962_v60, %s3983_s29  ;;  %s3989_s29 = smov 112   ;;  %6866 = vst [vmem:[#allocation37_spill] sm:$0xff] %v5248_v33  ;;  %v2614_v32 = vadd.s32 4294967289, %v6850_v28  ;;  %v5261_v34 = vsel %vm1421_vm7, 1.0, %v6843_v59  ;;  %vm2035_vm14 = vcmp.lt.s32.totalorder %v2033_v41, 8  ;;  %v5281_v17 = vsel %vm1868_vm8, 1.0, %v6843_v59 }
 0x20f   : > { %6869 = vst [vmem:[#allocation40_spill] sm:$0xff] %v5261_v34  ;;  %v5265_v2 = vld [vmem:[#allocation5 + $0x83] ss:$8 sm:$0x3]  ;;  %v5278_v34 = vsel %vm1843_vm5, 1.0, %v6843_v59  ;;  %6873 = vst [vmem:[#allocation44_spill] sm:$0xff] %v5281_v17 }
 0x210   : > { %6870 = vst [vmem:[#allocation41_spill] sm:$0xff] %v5265_v2  ;;  %v5273_v54 = vld [vmem:[#allocation5 + $0x84] ss:$8 sm:$0x3]  ;;  %6872 = vst [vmem:[#allocation43_spill] sm:$0xff] %v5278_v34  ;;  %v5293_v8 = vsel %vm2035_vm14, 1.0, %v6843_v59 }
 0x211   : > { %6871 = vst [vmem:[#allocation42_spill] sm:$0xff] %v5273_v54  ;;  %v5287_v10 = vld [vmem:[#allocation5 + $0x85] ss:$8 sm:$0x3]  ;;  %6875 = vst [vmem:[#allocation46_spill] sm:$0xff] %v5293_v8  ;;  %vm2060_vm5 = vcmp.lt.s32.totalorder %v2058_v18, 8  ;;  %v6886_v54 = vrot.slane %v5004_v24, %v4234_v5 }
 0x212   : > { %1621 = vrot.lane.b32.xlu1 %v4964_v39, %s3984_s7  ;;  %1619 = vrot.lane.b32.xlu0 %v4962_v60, %s3984_s7  ;;  %6874 = vst [vmem:[#allocation45_spill] sm:$0xff] %v5287_v10  ;;  %vm2615_vm7 = vcmp.ge.s32.totalorder %v2614_v32, 0  ;;  %v5309_v8 = vld [vmem:[#allocation5 + $0xd2] ss:$8 sm:$0x3]  ;;  %vm1601_vm14 = vcmp.lt.s32.totalorder %v4231_v4, 20 }
 0x213   : > { %v5319_v34 = vld [vmem:[#allocation5 + $0xd3] ss:$8 sm:$0x3]  ;;  %v5321_v15 = vld [vmem:[#allocation5 + $0xd4] ss:$8 sm:$0x3] }
 0x214   : > { %v5323_v29 = vld [vmem:[#allocation5 + $0xd5] ss:$8 sm:$0x3]  ;;  %v5325_v62 = vld [vmem:[#allocation5 + $0xd6] ss:$8 sm:$0x3] }
 0x215   : > { %v5330_v25 = vsel %vm2060_vm5, 1.0, %v6843_v59  ;;  %v5332_v42 = vld [vmem:[#allocation7 + $0x5] ss:$8 sm:$0x3]  ;;  %v2906_v16 = vadd.s32 7, %v6850_v28  ;;  %vm1096_vm5 = vcmp.lt.s32.totalorder %v4231_v4, 12 }
 0x216   : > { %1094 = vrot.lane.b32.xlu1 %v4964_v39, %s3985_s21  ;;  %1092 = vrot.lane.b32.xlu0 %v4962_v60, %s3985_s21  ;;  %s3988_s21 = smov 116   ;;  %6877 = vst [vmem:[#allocation48_spill] sm:$0xff] %v5330_v25  ;;  %6878 = vst [vmem:[#allocation49_spill] sm:$0xff] %v5332_v42  ;;  %v5351_v0 = vld [vmem:[#allocation5 + $0xd7] ss:$8 sm:$0x3] }
 0x217   : > { %v5353_v41 = vld [vmem:[#allocation5 + $0xe1] ss:$8 sm:$0x3]  ;;  %v5361_v18 = vld [vmem:[#allocation5 + $0xe2] ss:$8 sm:$0x3] }
 0x218   : > { %6881 = vst [vmem:[#allocation52_spill] sm:$0xff] %v5361_v18  ;;  %v2881_v25 = vadd.s32 6, %v6850_v28  ;;  %v5373_v31 = vld [vmem:[#allocation5 + $0xe3] ss:$8 sm:$0x3] }
 0x219   : > { %6882 = vst [vmem:[#allocation53_spill] sm:$0xff] %v5373_v31  ;;  %v5386_v10 = vld [vmem:[#allocation5 + $0xe5] ss:$8 sm:$0x3] }
 0x21a   : > { %1116 = vrot.lane.b32.xlu1 %v4964_v39, %s3986_s23  ;;  %1114 = vrot.lane.b32.xlu0 %v4962_v60, %s3986_s23  ;;  %v5398_v2 = vld [vmem:[#allocation5 + $0xe7] ss:$8 sm:$0x3]  ;;  %v5400_v44 = vld [vmem:[#allocation5 + $0x42] ss:$8 sm:$0x3] }
 0x21b   : > { %6883 = vst [vmem:[#allocation54_spill] sm:$0xff] %v5398_v2 }
 0x21e   : > { %1140 = vrot.lane.b32.xlu1 %v4964_v39, %s3976_s5  ;;  %1138 = vrot.lane.b32.xlu0 %v4962_v60, %s3976_s5  ;;  %s3990_s5 = smov 108  }
 0x222   : > { %1180 = vrot.lane.b32.xlu1 %v4964_v39, %s3977_s10  ;;  %1178 = vrot.lane.b32.xlu0 %v4962_v60, %s3977_s10  ;;  %s3991_s10 = smov 104  }
 0x226   : > { %1203 = vrot.lane.b32.xlu1 %v4964_v39, %s3987_s28  ;;  %1201 = vrot.lane.b32.xlu0 %v4962_v60, %s3987_s28 }
 0x22a   : > { %1227 = vrot.lane.b32.xlu1 %v4964_v39, %s3988_s21  ;;  %1225 = vrot.lane.b32.xlu0 %v4962_v60, %s3988_s21 }
 0x22e   : > { %1764 = vrot.lane.b32.xlu1 %v4964_v39, %s3989_s29  ;;  %1762 = vrot.lane.b32.xlu0 %v4962_v60, %s3989_s29 }
 0x232   : > { %1788 = vrot.lane.b32.xlu1 %v4964_v39, %s3990_s5  ;;  %1786 = vrot.lane.b32.xlu0 %v4962_v60, %s3990_s5 }
 0x236   : > { %2537 = vrot.lane.b32.xlu1 %v4964_v39, %s3991_s10  ;;  %2535 = vrot.lane.b32.xlu0 %v4962_v60, %s3991_s10 }
 0x23a   : > { %2561 = vrot.lane.b32.xlu1 %v4964_v39, %s3978_s11  ;;  %2559 = vrot.lane.b32.xlu0 %v4962_v60, %s3978_s11  ;;  %v5246_v60 = vld [vmem:[#allocation5 + $0x80] ss:$8 sm:$0x3]  ;;  %v5258_v39 = vsel %vm1394_vm6, 1.0, %v6843_v59  ;;  %vm2328_vm6 = vcmp.lt.s32.totalorder %v4231_v4, 24  ;;  %s3992_s11 = smov 64  }
 0x23b   : > { %6865 = vst [vmem:[#allocation36_spill] sm:$0xff] %v5246_v60  ;;  %6868 = vst [vmem:[#allocation39_spill] sm:$0xff] %v5258_v39  ;;  %v2639_v39 = vadd.s32 4294967290, %v6850_v28  ;;  %v5340_v60 = vsel %vm2615_vm7, 1.0, %v6843_v59  ;;  %vm2883_vm7 = vcmp.lt.s32.totalorder %v2881_v25, 8 }
 0x23c   : > { %6879 = vst [vmem:[#allocation50_spill] sm:$0xff] %v5340_v60  ;;  %v5428_v38 = vsel %vm2883_vm7, 1.0, %v6843_v59 }
 0x23d   : > { %vm2640_vm8 = vcmp.ge.s32.totalorder %v2639_v39, 0  ;;  %v5388_v39 = vld [vmem:[#allocation5 + $0xe6] ss:$8 sm:$0x3]  ;;  %6884 = vst [vmem:[#allocation55_spill] sm:$0xff] %v5428_v38 }
 0x23e   : > { %v5359_v14 = vsel %vm2640_vm8, 1.0, %v6843_v59  ;;  %vm2908_vm8 = vcmp.lt.s32.totalorder %v2906_v16, 8 }
 0x23f   : > { %6880 = vst [vmem:[#allocation51_spill] sm:$0xff] %v5359_v14  ;;  %v5375_v14 = vld [vmem:[#allocation5 + $0xe4] ss:$8 sm:$0x3]  ;;  %v5431_v28 = vsel %vm2908_vm8, 1.0, %v6843_v59 }
 0x240   : > { %6885 = vst [vmem:[#allocation56_spill] sm:$0xff] %v5431_v28 }
 0x278   : > { %v5295_v37 = vpop.permute.xlu1 %2305  ;;  %v5297_v17 = vpop.permute.xlu0 %2303 }
 0x279   : > { %v2308_v16 = vsel %vm501_vm10, %v5295_v37, %v5297_v17  ;;  %v2307_v59 = vsel %vm501_vm10, %v5297_v17, %v5295_v37  ;;  %v6890_v37 = vrot.slane %v5008_v58, %v4234_v5  ;;  %vm1766_vm10 = vcmp.lt.s32.totalorder %v4231_v4, 112 }
 0x27c   : > { %v2327_v32 = vpop.permute.xlu1 %2326  ;;  %v2325_v60 = vpop.permute.xlu0 %2324 }
 0x27d   : > { %v2330_v20 = vsel %vm2328_vm6, %v2327_v32, %v2325_v60  ;;  %v2329_v22 = vsel %vm2328_vm6, %v2325_v60, %v2327_v32  ;;  %v6887_v60 = vrot.slane %v5004_v24, %v4237_v6 }
 0x27e   : > { %v2344_v28 = vmul.f32 %v6886_v54, %v2330_v20  ;;  %v6888_v20 = vrot.slane %v5002_v47, %v4234_v5 }
 0x27f   : > { %v2345_v42 = vmul.f32 %v6887_v60, %v2329_v22  ;;  %v6892_v22 = vrot.slane %v5010_v57, %v4234_v5 }
 0x280   : > { %v1600_v33 = vpop.permute.xlu1 %1599  ;;  %v1598_v11 = vpop.permute.xlu0 %1597  ;;  %v2322_v54 = vmul.f32 %v6888_v20, %v2308_v16  ;;  %v6891_v16 = vrot.slane %v5008_v58, %v4237_v6  ;;  %v6893_v58 = vrot.slane %v5010_v57, %v4237_v6 }
 0x281   : > { %v1602_v38 = vsel %vm1601_vm14, %v1598_v11, %v1600_v33  ;;  %v1603_v9 = vsel %vm1601_vm14, %v1600_v33, %v1598_v11  ;;  %v6889_v33 = vrot.slane %v5002_v47, %v4237_v6 }
 0x282   : > { %v2361_v17 = vmul.f32 %v6890_v37, %v1603_v9  ;;  %v2362_v20 = vmul.f32 %v6891_v16, %v1602_v38  ;;  %v2346_v24 = vadd.f32 %v2344_v28, %v2322_v54  ;;  %v6894_v16 = vrot.slane %v5017_v52, %v4234_v5 }
 0x283   : > { %v2323_v60 = vmul.f32 %v6889_v33, %v2307_v59  ;;  %v6895_v28 = vrot.slane %v5017_v52, %v4237_v6  ;;  %v6898_v52 = vrot.slane %v5040_v56, %v4234_v5 }
 0x284   : > { %v1622_v25 = vpop.permute.xlu1 %1621  ;;  %v1620_v2 = vpop.permute.xlu0 %1619 }
 0x285   : > { %v1625_v32 = vsel %vm1623_vm4, %v1622_v25, %v1620_v2  ;;  %v1624_v11 = vsel %vm1623_vm4, %v1620_v2, %v1622_v25  ;;  %v2347_v37 = vadd.f32 %v2345_v42, %v2323_v60  ;;  %vm1205_vm4 = vcmp.lt.s32.totalorder %v4231_v4, 120 }
 0x286   : > { %v1639_v18 = vmul.f32 %v6892_v22, %v1625_v32  ;;  %v1640_v33 = vmul.f32 %v6893_v58, %v1624_v11  ;;  %v2378_v25 = vmul.f32 %v6894_v16, %v1625_v32  ;;  %v2379_v54 = vmul.f32 %v6895_v28, %v1624_v11 }
 0x287   : > { %v6896_v22 = vrot.slane %v5006_v1, %v4234_v5  ;;  %v2364_v32 = vadd.f32 %v2362_v20, %v2347_v37  ;;  %v6899_v58 = vrot.slane %v5040_v56, %v4237_v6 }
 0x288   : > { %v1095_v23 = vpop.permute.xlu1 %1094  ;;  %v1093_v2 = vpop.permute.xlu0 %1092 }
 0x289   : > { %v1097_v47 = vsel %vm1096_vm5, %v1093_v2, %v1095_v23  ;;  %v1098_v59 = vsel %vm1096_vm5, %v1095_v23, %v1093_v2  ;;  %v1617_v31 = vmul.f32 %v6896_v22, %v1603_v9  ;;  %v6897_v23 = vrot.slane %v5006_v1, %v4237_v6 }
 0x28a   : > { %v2363_v2 = vadd.f32 %v2361_v17, %v2346_v24  ;;  %v1656_v11 = vmul.f32 %v6898_v52, %v1098_v59  ;;  %v1657_v9 = vmul.f32 %v6899_v58, %v1097_v47  ;;  %v2381_v37 = vadd.f32 %v2379_v54, %v2364_v32 }
 0x28b   : > { %v1618_v42 = vmul.f32 %v6897_v23, %v1602_v38  ;;  %v1641_v1 = vadd.f32 %v1639_v18, %v1617_v31  ;;  %v6900_v23 = vrot.slane %v5050_v48, %v4234_v5  ;;  %v6901_v31 = vrot.slane %v5038_v61, %v4234_v5 }
 0x28c   : > { %v1117_v16 = vpop.permute.xlu1 %1116  ;;  %v1115_v28 = vpop.permute.xlu0 %1114  ;;  %v2380_v20 = vadd.f32 %v2378_v25, %v2363_v2  ;;  %v6902_v52 = vrot.slane %v5038_v61, %v4237_v6  ;;  %v6904_v25 = vrot.slane %v5050_v48, %v4237_v6  ;;  %v6905_v32 = vrot.slane %v5048_v26, %v4237_v6 }
 0x28d   : > { %v1119_v38 = vsel %vm1118_vm3, %v1115_v28, %v1117_v16  ;;  %v1120_v22 = vsel %vm1118_vm3, %v1117_v16, %v1115_v28  ;;  %v1642_v24 = vadd.f32 %v1640_v33, %v1618_v42  ;;  %v1112_v18 = vmul.f32 %v6901_v31, %v1098_v59 }
 0x28e   : > { %v1134_v56 = vmul.f32 %v6900_v23, %v1120_v22  ;;  %v1113_v58 = vmul.f32 %v6902_v52, %v1097_v47  ;;  %v6903_v16 = vrot.slane %v5048_v26, %v4234_v5  ;;  %v1135_v54 = vmul.f32 %v6904_v25, %v1119_v38 }
 0x28f   : > { %v1658_v42 = vadd.f32 %v1656_v11, %v1641_v1  ;;  %v1659_v2 = vadd.f32 %v1657_v9, %v1642_v24  ;;  %v2396_v28 = vmul.f32 %v6905_v32, %v1097_v47  ;;  %v6906_v23 = vrot.slane %v5055_v53, %v4234_v5 }
 0x290   : > { %v2395_v33 = vmul.f32 %v6903_v16, %v1098_v59  ;;  %v1141_v61 = vpop.permute.xlu1 %1140  ;;  %v1139_v52 = vpop.permute.xlu0 %1138  ;;  %v6907_v17 = vrot.slane %v5055_v53, %v4237_v6  ;;  %v6908_v48 = vrot.slane %v5057_v63, %v4234_v5  ;;  %v1136_v47 = vadd.f32 %v1134_v56, %v1112_v18  ;;  %v5569_v18 = vld [vmem:[#allocation5 + $0x45] ss:$8 sm:$0x3] }
 0x291   : > { %v1673_v31 = vmul.f32 %v6906_v23, %v1120_v22  ;;  %v1142_v11 = vsel %vm525_vm11, %v1139_v52, %v1141_v61  ;;  %v1143_v26 = vsel %vm525_vm11, %v1141_v61, %v1139_v52  ;;  %v6909_v9 = vrot.slane %v5057_v63, %v4237_v6  ;;  %6914 = vst [vmem:[#allocation57_spill] sm:$0xff] %v5569_v18 }
 0x292   : > { %v1674_v59 = vmul.f32 %v6907_v17, %v1119_v38  ;;  %v2412_v16 = vmul.f32 %v6908_v48, %v1120_v22  ;;  %v6910_v24 = vrot.slane %v5077_v55, %v4234_v5  ;;  %v6911_v17 = vrot.slane %v5077_v55, %v4237_v6 }
 0x293   : > { %v2413_v1 = vmul.f32 %v6909_v9, %v1119_v38  ;;  %vm1229_vm3 = vcmp.lt.s32.totalorder %v4231_v4, 116  ;;  %v2397_v22 = vadd.f32 %v2395_v33, %v2380_v20  ;;  %v1137_v32 = vadd.f32 %v1135_v54, %v1113_v58  ;;  %v5577_v9 = vld [vmem:[#allocation5 + $0x43] ss:$8 sm:$0x3] }
 0x294   : > { %v1157_v53 = vmul.f32 %v6910_v24, %v1143_v26  ;;  %v1158_v25 = vmul.f32 %v6911_v17, %v1142_v11  ;;  %v6912_v23 = vrot.slane %v5079_v12, %v4234_v5  ;;  %v6913_v63 = vrot.slane %v5079_v12, %v4237_v6  ;;  %v1181_v33 = vpop.permute.xlu1 %1180  ;;  %v1179_v54 = vpop.permute.xlu0 %1178  ;;  %6917 = vst [vmem:[#allocation58_spill] sm:$0xff] %v5577_v9  ;;  %v5579_v24 = vld [vmem:[#allocation5 + $0x44] ss:$8 sm:$0x3]  ;;  %v7006_v9 = vld [vmem:[#allocation48_spill] sm:$0xff] }
 0x295   : > { %v2398_v61 = vadd.f32 %v2396_v28, %v2381_v37  ;;  %v6915_v55 = vrot.slane %v5092_v30, %v4234_v5  ;;  %v6916_v20 = vrot.slane %v5092_v30, %v4237_v6  ;;  %6918 = vst [vmem:[#allocation59_spill] sm:$0xff] %v5579_v24  ;;  %v1675_v12 = vadd.f32 %v1673_v31, %v1658_v42  ;;  %v5594_v31 = vld [vmem:[#allocation5 + $0x47] ss:$8 sm:$0x3] }
 0x296   : > { %v1690_v56 = vmul.f32 %v6912_v23, %v1143_v26  ;;  %v1691_v38 = vmul.f32 %v6913_v63, %v1142_v11  ;;  %v1159_v52 = vadd.f32 %v1157_v53, %v1136_v47  ;;  %v1676_v17 = vadd.f32 %v1674_v59, %v1659_v2  ;;  %6920 = vst [vmem:[#allocation61_spill] sm:$0xff] %v5594_v31  ;;  %v5596_v59 = vld [vmem:[#allocation5 + $0x50] ss:$8 sm:$0x3] }
 0x297   : > { %v2429_v48 = vmul.f32 %v6915_v55, %v1143_v26  ;;  %v2430_v58 = vmul.f32 %v6916_v20, %v1142_v11  ;;  %v1160_v23 = vadd.f32 %v1158_v25, %v1137_v32  ;;  %v1182_v37 = vsel %vm566_vm12, %v1179_v54, %v1181_v33  ;;  %v5587_v11 = vld [vmem:[#allocation5 + $0x46] ss:$8 sm:$0x3]  ;;  %6921 = vst [vmem:[#allocation62_spill] sm:$0xff] %v5596_v59  ;;  %v7002_v31 = vld [vmem:[#allocation40_spill] sm:$0xff] }
 0x298   : > { %v2414_v28 = vadd.f32 %v2412_v16, %v2397_v22  ;;  %v2415_v47 = vadd.f32 %v2413_v1, %v2398_v61  ;;  %v1183_v26 = vsel %vm566_vm12, %v1181_v33, %v1179_v54  ;;  %v1347_v30 = vrot.slane %v5569_v18, %v4237_v6  ;;  %6919 = vst [vmem:[#allocation60_spill] sm:$0xff] %v5587_v11  ;;  %v7005_v11 = vld [vmem:[#allocation39_spill] sm:$0xff] }
 0x299   : > { %v1692_v53 = vadd.f32 %v1690_v56, %v1675_v12  ;;  %v1693_v63 = vadd.f32 %v1691_v38, %v1676_v17  ;;  %v1176_v25 = vadd.f32 %v5066_v13, %v1159_v52  ;;  %v6922_v22 = vrot.slane %v5094_v27, %v4234_v5  ;;  %v1204_v56 = vpop.permute.xlu1 %1203  ;;  %v1202_v38 = vpop.permute.xlu0 %1201 }
 0x29a   : > { %v2431_v16 = vadd.f32 %v2429_v48, %v2414_v28  ;;  %v2432_v1 = vadd.f32 %v2430_v58, %v2415_v47  ;;  %v1177_v61 = vadd.f32 %v5053_v36, %v1160_v23  ;;  %v6923_v55 = vrot.slane %v5094_v27, %v4237_v6  ;;  %v6976_v27 = vld [vmem:[#allocation44_spill] sm:$0xff]  ;;  %v6977_v48 = vld [vmem:[#allocation35_spill] sm:$0xff] }
 0x29b   : > { %v1197_v32 = vmul.f32 %v6922_v22, %v1182_v37  ;;  %v1206_v33 = vsel %vm1205_vm4, %v1202_v38, %v1204_v56  ;;  %v1207_v13 = vsel %vm1205_vm4, %v1204_v56, %v1202_v38  ;;  %vm1790_vm11 = vcmp.lt.s32.totalorder %v4231_v4, 108 }
 0x29c   : > { %v1198_v20 = vmul.f32 %v6923_v55, %v1183_v26  ;;  %v1710_v58 = vadd.f32 %v5060_v21, %v1693_v63  ;;  %v1709_v54 = vadd.f32 %v5069_v49, %v1692_v53  ;;  %v6924_v12 = vrot.slane %v5104_v43, %v4234_v5 }
 0x29d   : > { %v6925_v23 = vrot.slane %v5116_v46, %v4234_v5  ;;  %v2449_v47 = vadd.f32 %v5063_v40, %v2432_v1  ;;  %v1199_v22 = vadd.f32 %v1197_v32, %v1176_v25  ;;  %v6926_v56 = vrot.slane %v5104_v43, %v4237_v6  ;;  %v1228_v21 = vpop.permute.xlu1 %1227  ;;  %v1226_v63 = vpop.permute.xlu0 %1225 }
 0x29e   : > { %v1724_v17 = vmul.f32 %v6924_v12, %v1182_v37  ;;  %v2448_v55 = vadd.f32 %v5082_v45, %v2431_v16  ;;  %v1200_v49 = vadd.f32 %v1198_v20, %v1177_v61  ;;  %v6927_v53 = vrot.slane %v5106_v50, %v4234_v5 }
 0x29f   : > { %v1221_v28 = vmul.f32 %v6925_v23, %v1206_v33  ;;  %v1725_v38 = vmul.f32 %v6926_v56, %v1183_v26  ;;  %v6928_v36 = vrot.slane %v5116_v46, %v4237_v6  ;;  %v1230_v40 = vsel %vm1229_vm3, %v1226_v63, %v1228_v21 }
 0x2a0   : > { %v2463_v12 = vmul.f32 %v6927_v53, %v1182_v37  ;;  %v6929_v43 = vrot.slane %v5106_v50, %v4237_v6  ;;  %v6930_v45 = vrot.slane %v5118_v35, %v4234_v5  ;;  %v1231_v25 = vsel %vm1229_vm3, %v1228_v21, %v1226_v63 }
 0x2a1   : > { %v1222_v23 = vmul.f32 %v6928_v36, %v1207_v13  ;;  %v6931_v37 = vrot.slane %v5138_v3, %v4234_v5  ;;  %v1726_v46 = vadd.f32 %v1724_v17, %v1709_v54  ;;  %v1223_v61 = vadd.f32 %v1221_v28, %v1199_v22  ;;  %v1765_v28 = vpop.permute.xlu1 %1764 }
 0x2a2   : > { %v2464_v1 = vmul.f32 %v6929_v43, %v1183_v26  ;;  %v1741_v16 = vmul.f32 %v6930_v45, %v1206_v33  ;;  %v6932_v20 = vrot.slane %v5118_v35, %v4237_v6  ;;  %v6933_v50 = vrot.slane %v5138_v3, %v4237_v6  ;;  %v1763_v35 = vpop.permute.xlu0 %1762 }
 0x2a3   : > { %v1245_v32 = vmul.f32 %v6931_v37, %v1230_v40  ;;  %v1727_v56 = vadd.f32 %v1725_v38, %v1710_v58  ;;  %v6934_v53 = vrot.slane %v5128_v7, %v4234_v5  ;;  %v6935_v21 = vrot.slane %v5128_v7, %v4237_v6 }
 0x2a4   : > { %v1742_v36 = vmul.f32 %v6932_v20, %v1207_v13  ;;  %v1246_v26 = vmul.f32 %v6933_v50, %v1231_v25  ;;  %v6936_v54 = vrot.slane %v5150_v51, %v4234_v5  ;;  %v2465_v22 = vadd.f32 %v2463_v12, %v2448_v55 }
 0x2a5   : > { %v2480_v43 = vmul.f32 %v6934_v53, %v1206_v33  ;;  %v2481_v63 = vmul.f32 %v6935_v21, %v1207_v13  ;;  %v1224_v45 = vadd.f32 %v1222_v23, %v1200_v49  ;;  %v1247_v37 = vadd.f32 %v1245_v32, %v1223_v61  ;;  %v6938_v53 = vld [vmem:[#allocation22_spill] sm:$0xff]  ;;  %v1789_v61 = vpop.permute.xlu1 %1788 }
 0x2a6   : > { %v1758_v17 = vmul.f32 %v6936_v54, %v1230_v40  ;;  %v6937_v3 = vrot.slane %v5150_v51, %v4237_v6  ;;  %vm2539_vm12 = vcmp.lt.s32.totalorder %v4231_v4, 104  ;;  %v2466_v33 = vadd.f32 %v2464_v1, %v2449_v47  ;;  %v6941_v1 = vld [vmem:[#allocation21_spill] sm:$0xff]  ;;  %v1787_v21 = vpop.permute.xlu0 %1786  ;;  %v6943_v54 = vld [vmem:[#allocation20_spill] sm:$0xff]  ;;  %v6984_v4 = vld [vmem:[#allocation34_spill] sm:$0xff] }
 0x2a7   : > { %v1743_v38 = vadd.f32 %v1741_v16, %v1726_v46  ;;  %v1767_v7 = vsel %vm1766_vm10, %v1763_v35, %v1765_v28  ;;  %v1768_v13 = vsel %vm1766_vm10, %v1765_v28, %v1763_v35  ;;  %v1744_v20 = vadd.f32 %v1742_v36, %v1727_v56 }
 0x2a8   : > { %v1759_v58 = vmul.f32 %v6937_v3, %v1231_v25  ;;  %v1248_v50 = vadd.f32 %v1246_v26, %v1224_v45  ;;  %v6939_v55 = vrot.slane %v6938_v53, %v4234_v5  ;;  %v6940_v51 = vrot.slane %v6938_v53, %v4237_v6  ;;  %v6949_v3 = vld [vmem:[#allocation23_spill] sm:$0xff] }
 0x2a9   : > { %v2482_v23 = vadd.f32 %v2480_v43, %v2465_v22  ;;  %v2483_v32 = vadd.f32 %v2481_v63, %v2466_v33  ;;  %v1760_v47 = vadd.f32 %v1758_v17, %v1743_v38  ;;  %v6942_v16 = vrot.slane %v6941_v1, %v4234_v5  ;;  %v6947_v17 = vld [vmem:[#allocation12_spill] sm:$0xff] }
 0x2aa   : > { %v1782_v49 = vmul.f32 %v6939_v55, %v1767_v7  ;;  %v1783_v12 = vmul.f32 %v6940_v51, %v1768_v13  ;;  %v6944_v36 = vrot.slane %v6943_v54, %v4234_v5  ;;  %v1761_v56 = vadd.f32 %v1759_v58, %v1744_v20  ;;  %v5701_v58 = vld [vmem:[#allocation7 + $0x10] ss:$8 sm:$0x3] }
 0x2ab   : > { %v2497_v46 = vmul.f32 %v6942_v16, %v1230_v40  ;;  %v6946_v28 = vrot.slane %v6941_v1, %v4237_v6  ;;  %v1791_v43 = vsel %vm1790_vm11, %v1787_v21, %v1789_v61  ;;  %v6948_v22 = vrot.slane %v6947_v17, %v4234_v5  ;;  %6951 = vst [vmem:[#allocation21_spill] sm:$0xff] %v5701_v58  ;;  %v2538_v1 = vpop.permute.xlu1 %2537  ;;  %v2536_v16 = vpop.permute.xlu0 %2535 }
 0x2ac   : > { %v5686_v26 = vadd.f32 %v6944_v36, %v1247_v37  ;;  %v1784_v63 = vadd.f32 %v1782_v49, %v1760_v47  ;;  %v1792_v45 = vsel %vm1790_vm11, %v1789_v61, %v1787_v21  ;;  %v6950_v37 = vrot.slane %v6949_v3, %v4234_v5  ;;  %v6973_v61 = vld [vmem:[#allocation43_spill] sm:$0xff] }
 0x2ad   : > { %v2498_v35 = vmul.f32 %v6946_v28, %v1231_v25  ;;  %v2514_v40 = vmul.f32 %v6948_v22, %v1767_v7  ;;  %v6952_v25 = vrot.slane %v6943_v54, %v4237_v6  ;;  %v1785_v20 = vadd.f32 %v1783_v12, %v1761_v56  ;;  %v6955_v54 = vld [vmem:[#allocation25_spill] sm:$0xff]  ;;  %v6957_v22 = vld [vmem:[#allocation24_spill] sm:$0xff] }
 0x2ae   : > { %6945 = vst [vmem:[#allocation22_spill] sm:$0xff] %v5686_v26  ;;  %v1806_v33 = vmul.f32 %v6950_v37, %v1791_v43  ;;  %v6953_v53 = vrot.slane %v6947_v17, %v4237_v6  ;;  %v6954_v7 = vrot.slane %v6949_v3, %v4237_v6  ;;  %v2499_v51 = vadd.f32 %v2497_v46, %v2482_v23 }
 0x2af   : > { %v5706_v38 = vadd.f32 %v6952_v25, %v1248_v50  ;;  %v2500_v21 = vadd.f32 %v2498_v35, %v2483_v32  ;;  %v6956_v36 = vrot.slane %v6955_v54, %v4234_v5  ;;  %v6958_v3 = vrot.slane %v6957_v22, %v4237_v6  ;;  %v6966_v50 = vld [vmem:[#allocation31_spill] sm:$0xff] }
 0x2b0   : > { %v2515_v55 = vmul.f32 %v6953_v53, %v1768_v13  ;;  %v1807_v49 = vmul.f32 %v6954_v7, %v1792_v45  ;;  %v1808_v47 = vadd.f32 %v1806_v33, %v1784_v63  ;;  %v2516_v28 = vadd.f32 %v2514_v40, %v2499_v51  ;;  %v2562_v53 = vpop.permute.xlu1 %2561 }
 0x2b1   : > { %v2531_v13 = vmul.f32 %v6956_v36, %v1791_v43  ;;  %v6959_v35 = vrot.slane %v6955_v54, %v4237_v6  ;;  %v6960_v40 = vrot.slane %v6957_v22, %v4234_v5  ;;  %v2540_v25 = vsel %vm2539_vm12, %v2536_v16, %v2538_v1  ;;  %v6961_v22 = vld [vmem:[#allocation26_spill] sm:$0xff] }
 0x2b2   : > { %v1809_v12 = vadd.f32 %v1807_v49, %v1785_v20  ;;  %v2517_v17 = vadd.f32 %v2515_v55, %v2500_v21  ;;  %v2541_v20 = vsel %vm2539_vm12, %v2538_v1, %v2536_v16  ;;  %v2560_v55 = vpop.permute.xlu0 %2559  ;;  %v6962_v1 = vrot.slane %v6961_v22, %v4234_v5 }
 0x2b3   : > { %v2532_v37 = vmul.f32 %v6959_v35, %v1792_v45  ;;  %v5736_v33 = vadd.f32 %v6960_v40, %v1808_v47  ;;  %v2533_v51 = vadd.f32 %v2531_v13, %v2516_v28  ;;  %v2564_v47 = vsel %vm590_vm13, %v2562_v53, %v2560_v55  ;;  %v6964_v13 = vld [vmem:[#allocation29_spill] sm:$0xff] }
 0x2b4   : > { %v1824_v32 = vadd.f32 %v6958_v3, %v1809_v12  ;;  %v2563_v12 = vsel %vm590_vm13, %v2560_v55, %v2562_v53  ;;  %v2555_v16 = vmul.f32 %v6962_v1, %v2540_v25  ;;  %v6963_v3 = vrot.slane %v6961_v22, %v4237_v6  ;;  %v6968_v55 = vld [vmem:[#allocation32_spill] sm:$0xff]  ;;  %v6970_v1 = vld [vmem:[#allocation27_spill] sm:$0xff] }
 0x2b5   : > { %v6965_v28 = vrot.slane %v6964_v13, %v4237_v6  ;;  %v2534_v60 = vadd.f32 %v2532_v37, %v2517_v17  ;;  %v6967_v63 = vrot.slane %v6966_v50, %v4237_v6  ;;  %v6969_v52 = vrot.slane %v6968_v55, %v4237_v6  ;;  %v6974_v37 = vld [vmem:[#allocation33_spill] sm:$0xff] }
 0x2b6   : > { %v1899_v49 = vrot.slane %v1824_v32, 6  ;;  %v1826_v45 = vrot.slane %v1824_v32, 3  ;;  %v1851_v54 = vrot.slane %v1824_v32, 4  ;;  %v1878_v36 = vrot.slane %v1824_v32, 5 }
 0x2b7   : > { %v2556_v35 = vmul.f32 %v6963_v3, %v2541_v20  ;;  %v1920_v56 = vrot.slane %v1824_v32, 7  ;;  %v6766_v25 = vrot.slane %v5736_v33, 3  ;;  %v6971_v22 = vrot.slane %v6970_v1, %v4234_v5 }
 0x2b8   : > { %v1841_v40 = vmul.f32 %v6965_v28, %v1826_v45  ;;  %v1866_v53 = vmul.f32 %v6967_v63, %v1851_v54  ;;  %v1893_v57 = vmul.f32 %v6969_v52, %v1878_v36  ;;  %v6972_v3 = vrot.slane %v6970_v1, %v4237_v6 }
 0x2b9   : > { %v2578_v20 = vmul.f32 %v6971_v22, %v2563_v12  ;;  %v6975_v46 = vrot.slane %v6974_v37, %v4237_v6  ;;  %v6978_v52 = vrot.slane %v6977_v48, %v4237_v6  ;;  %v1958_v21 = vrot.slane %v1824_v32, 1  ;;  %v6980_v22 = vld [vmem:[#allocation36_spill] sm:$0xff] }
 0x2ba   : > { %v2579_v28 = vmul.f32 %v6972_v3, %v2564_v47  ;;  %v1849_v17 = vmul.f32 %v6973_v61, %v1841_v40  ;;  %v1874_v23 = vmul.f32 %v6976_v27, %v1866_v53  ;;  %v5782_v12 = vmul.f32 %v1347_v30, %v5706_v38  ;;  %v6982_v3 = vld [vmem:[#allocation30_spill] sm:$0xff] }
 0x2bb   : > { %v1914_v63 = vmul.f32 %v6975_v46, %v1899_v49  ;;  %v1935_v2 = vmul.f32 %v6978_v52, %v1920_v56  ;;  %v1898_v47 = vrot.slane %v5736_v33, 6  ;;  %v2557_v40 = vadd.f32 %v2555_v16, %v2533_v51 }
 0x2bc   : > { %6979 = vst [vmem:[#allocation20_spill] sm:$0xff] %v5782_v12  ;;  %v2558_v1 = vadd.f32 %v2556_v35, %v2534_v60  ;;  %v6981_v46 = vrot.slane %v6980_v22, %v4237_v6  ;;  %v1876_v53 = vadd.f32 %v1874_v23, %v1849_v17  ;;  %v1895_v42 = vmul.f32 %v6982_v3, %v1893_v57  ;;  %v6985_v35 = vld [vmem:[#allocation19_spill] sm:$0xff]  ;;  %v6986_v23 = vld [vmem:[#allocation37_spill] sm:$0xff]  ;;  %v7003_v12 = vld [vmem:[#allocation46_spill] sm:$0xff] }
 0x2bd   : > { %v1979_v7 = vrot.slane %v1824_v32, 2  ;;  %v6983_v56 = vrot.slane %v6964_v13, %v4234_v5  ;;  %v5794_v30 = vadd.f32 %v2578_v20, %v2557_v40  ;;  %v1916_v51 = vmul.f32 %v6984_v4, %v1914_v63  ;;  %v6988_v17 = vld [vmem:[#allocation41_spill] sm:$0xff]  ;;  %v6990_v13 = vld [vmem:[#allocation42_spill] sm:$0xff] }
 0x2be   : > { %v1954_v49 = vmul.f32 %v6981_v46, %v1824_v32  ;;  %v2581_v43 = vadd.f32 %v2579_v28, %v2558_v1  ;;  %v1850_v60 = vrot.slane %v5736_v33, 4  ;;  %v1897_v16 = vadd.f32 %v1895_v42, %v1876_v53  ;;  %v6993_v53 = vld [vmem:[#allocation38_spill] sm:$0xff] }
 0x2bf   : > { %v1840_v52 = vmul.f32 %v6983_v56, %v6766_v25  ;;  %v1937_v46 = vmul.f32 %v6985_v35, %v1935_v2  ;;  %v6987_v57 = vrot.slane %v6986_v23, %v4237_v6  ;;  %v6989_v59 = vrot.slane %v6988_v17, %v4237_v6 }
 0x2c0   : > { %v6991_v20 = vrot.slane %v6990_v13, %v4237_v6  ;;  %v6992_v63 = vrot.slane %v6966_v50, %v4234_v5  ;;  %v1877_v2 = vrot.slane %v5736_v33, 5  ;;  %v1918_v1 = vadd.f32 %v1916_v51, %v1897_v16 }
 0x2c1   : > { %v1973_v32 = vmul.f32 %v6987_v57, %v1958_v21  ;;  %v2013_v58 = vmul.f32 %v6989_v59, %v1826_v45  ;;  %v1848_v28 = vmul.f32 %v6973_v61, %v1840_v52  ;;  %v6994_v21 = vrot.slane %v6993_v53, %v4237_v6  ;;  %v6995_v57 = vld [vmem:[#allocation45_spill] sm:$0xff] }
 0x2c2   : > { %v2032_v40 = vmul.f32 %v6991_v20, %v1851_v54  ;;  %v1865_v42 = vmul.f32 %v6992_v63, %v1850_v60  ;;  %v6996_v59 = vrot.slane %v6995_v57, %v4237_v6  ;;  %v1919_v25 = vrot.slane %v5736_v33, 7  ;;  %v6999_v63 = vld [vmem:[#allocation28_spill] sm:$0xff] }
 0x2c3   : > { %v1994_v56 = vmul.f32 %v6994_v21, %v1979_v7  ;;  %v6997_v52 = vrot.slane %v6968_v55, %v4234_v5  ;;  %v6998_v20 = vrot.slane %v6974_v37, %v4234_v5  ;;  %v1957_v16 = vrot.slane %v5736_v33, 1 }
 0x2c4   : > { %v2057_v45 = vmul.f32 %v6996_v59, %v1878_v36  ;;  %v1873_v54 = vmul.f32 %v6976_v27, %v1865_v42  ;;  %v7000_v7 = vrot.slane %v6999_v63, %v4237_v6  ;;  %v1939_v36 = vadd.f32 %v1937_v46, %v1918_v1  ;;  %v7001_v59 = vld [vmem:[#allocation17_spill] sm:$0xff] }
 0x2c5   : > { %v1892_v50 = vmul.f32 %v6997_v52, %v1877_v2  ;;  %v1913_v51 = vmul.f32 %v6998_v20, %v1898_v47  ;;  %v1975_v18 = vmul.f32 %v7001_v59, %v1973_v32  ;;  %v2015_v42 = vmul.f32 %v7002_v31, %v2013_v58 }
 0x2c6   : > { %v5831_v21 = vadd.f32 %v7000_v7, %v2581_v43  ;;  %v2040_v26 = vmul.f32 %v7003_v12, %v2032_v40  ;;  %v1875_v55 = vadd.f32 %v1873_v54, %v1848_v28  ;;  %v7004_v37 = vrot.slane %v6977_v48, %v4234_v5 }
 0x2c7   : > { %v1894_v52 = vmul.f32 %v6982_v3, %v1892_v50  ;;  %v1956_v20 = vadd.f32 %v1954_v49, %v1939_v36  ;;  %v1996_v24 = vmul.f32 %v7005_v11, %v1994_v56  ;;  %v2065_v43 = vmul.f32 %v7006_v9, %v2057_v45 }
 0x2c8   : > { %v1934_v47 = vmul.f32 %v7004_v37, %v1919_v25  ;;  %v7007_v46 = vrot.slane %v6980_v22, %v4234_v5  ;;  %v1915_v40 = vmul.f32 %v6984_v4, %v1913_v51  ;;  %v7008_v28 = vrot.slane %v6986_v23, %v4234_v5 }
 0x2c9   : > { %v1896_v58 = vadd.f32 %v1894_v52, %v1875_v55  ;;  %v1978_v48 = vrot.slane %v5736_v33, 2  ;;  %v1977_v25 = vadd.f32 %v1975_v18, %v1956_v20  ;;  %v2598_v49 = vrot.slane %v5831_v21, 1 }
 0x2ca   : > { %v1953_v32 = vmul.f32 %v7007_v46, %v5736_v33  ;;  %v1972_v1 = vmul.f32 %v7008_v28, %v1957_v16  ;;  %v2623_v56 = vrot.slane %v5831_v21, 2  ;;  %v2650_v45 = vrot.slane %v5831_v21, 3 }
 0x2cb   : > { %v1917_v54 = vadd.f32 %v1915_v40, %v1896_v58  ;;  %v1936_v22 = vmul.f32 %v6985_v35, %v1934_v47  ;;  %v2671_v50 = vrot.slane %v5831_v21, 4  ;;  %v1998_v7 = vadd.f32 %v1996_v24, %v1977_v25  ;;  %v7015_v25 = vld [vmem:[#allocation50_spill] sm:$0xff] }
 0x2cc   : > { %v7009_v23 = vrot.slane %v5307_v19, %v4237_v6  ;;  %v7010_v18 = vrot.slane %v5309_v8, %v4237_v6  ;;  %v7011_v55 = vrot.slane %v5319_v34, %v4237_v6  ;;  %v7012_v47 = vrot.slane %v6993_v53, %v4234_v5 }
 0x2cd   : > { %v1938_v37 = vadd.f32 %v1936_v22, %v1917_v54  ;;  %v7013_v46 = vrot.slane %v5736_v33, 3  ;;  %v7014_v24 = vrot.slane %v6988_v17, %v4234_v5  ;;  %v2713_v40 = vrot.slane %v5831_v21, 6 }
 0x2ce   : > { %v2613_v16 = vmul.f32 %v7009_v23, %v2598_v49  ;;  %v2638_v36 = vmul.f32 %v7010_v18, %v2623_v56  ;;  %v2665_v52 = vmul.f32 %v7011_v55, %v2650_v45  ;;  %v1993_v20 = vmul.f32 %v7012_v47, %v1978_v48  ;;  %v7016_v18 = vld [vmem:[#allocation51_spill] sm:$0xff] }
 0x2cf   : > { %v2012_v58 = vmul.f32 %v7014_v24, %v7013_v46  ;;  %v2017_v28 = vadd.f32 %v2015_v42, %v1998_v7  ;;  %v7017_v54 = vrot.slane %v5321_v15, %v4237_v6  ;;  %v1955_v48 = vadd.f32 %v1953_v32, %v1938_v37 }
 0x2d0   : > { %v2621_v23 = vmul.f32 %v7015_v25, %v2613_v16  ;;  %v2646_v51 = vmul.f32 %v7016_v18, %v2638_v36  ;;  %v1974_v33 = vmul.f32 %v7001_v59, %v1972_v1  ;;  %v7018_v17 = vrot.slane %v6990_v13, %v4234_v5 }
 0x2d1   : > { %v2686_v53 = vmul.f32 %v7017_v54, %v2671_v50  ;;  %v7019_v55 = vrot.slane %v5831_v21, 5  ;;  %v7020_v42 = vrot.slane %v5323_v29, %v4237_v6  ;;  %v2042_v16 = vadd.f32 %v2040_v26, %v2017_v28 }
 0x2d2   : > { %v2031_v22 = vmul.f32 %v7018_v17, %v1850_v60  ;;  %v2648_v36 = vadd.f32 %v2646_v51, %v2621_v23  ;;  %v2667_v47 = vmul.f32 %v6973_v61, %v2665_v52  ;;  %v2734_v46 = vrot.slane %v5831_v21, 7 }
 0x2d3   : > { %v2707_v7 = vmul.f32 %v7020_v42, %v7019_v55  ;;  %v1976_v24 = vadd.f32 %v1974_v33, %v1955_v48  ;;  %v1995_v32 = vmul.f32 %v7005_v11, %v1993_v20  ;;  %v7021_v1 = vrot.slane %v6995_v57, %v4234_v5  ;;  %v7025_v33 = vld [vmem:[#allocation49_spill] sm:$0xff] }
 0x2d4   : > { %v7022_v60 = vrot.slane %v5325_v62, %v4237_v6  ;;  %v7023_v26 = vrot.slane %v6999_v63, %v4234_v5  ;;  %v2067_v52 = vadd.f32 %v2065_v43, %v2042_v16  ;;  %v2669_v28 = vadd.f32 %v2667_v47, %v2648_v36  ;;  %v7028_v16 = vld [vmem:[#allocation47_spill] sm:$0xff] }
 0x2d5   : > { %v2056_v13 = vmul.f32 %v7021_v1, %v1877_v2  ;;  %v2688_v20 = vmul.f32 %v6976_v27, %v2686_v53  ;;  %v1997_v23 = vadd.f32 %v1995_v32, %v1976_v24  ;;  %v2014_v57 = vmul.f32 %v7002_v31, %v2012_v58  ;;  %v7030_v24 = vld [vmem:[#allocation52_spill] sm:$0xff] }
 0x2d6   : > { %v2728_v37 = vmul.f32 %v7022_v60, %v2713_v40  ;;  %v5906_v51 = vadd.f32 %v7023_v26, %v5794_v30  ;;  %v2039_v2 = vmul.f32 %v7003_v12, %v2031_v22  ;;  %v7024_v54 = vrot.slane %v5353_v41, %v4237_v6  ;;  %v7032_v26 = vld [vmem:[#allocation53_spill] sm:$0xff] }
 0x2d7   : > { %v7026_v17 = vrot.slane %v7025_v33, %v4237_v6  ;;  %v2690_v30 = vadd.f32 %v2688_v20, %v2669_v28  ;;  %v2709_v63 = vmul.f32 %v6982_v3, %v2707_v7  ;;  %v7027_v43 = vrot.slane %v5351_v0, %v4237_v6 }
 0x2d8   : > { %v2785_v48 = vmul.f32 %v7024_v54, %v2598_v49  ;;  %v2016_v42 = vadd.f32 %v2014_v57, %v1997_v23  ;;  %v2064_v58 = vmul.f32 %v7006_v9, %v2056_v13  ;;  %v2730_v22 = vmul.f32 %v6984_v4, %v2728_v37 }
 0x2d9   : > { %v5917_v55 = vadd.f32 %v7026_v17, %v2067_v52  ;;  %v2749_v53 = vmul.f32 %v7027_v43, %v2734_v46  ;;  %v7029_v49 = vrot.slane %v7028_v16, %v4237_v6  ;;  %v2711_v47 = vadd.f32 %v2709_v63, %v2690_v30 }
 0x2da   : > { %v7031_v7 = vrot.slane %v7030_v24, %v4237_v6  ;;  %v2597_v1 = vrot.slane %v5906_v51, 1  ;;  %v2622_v60 = vrot.slane %v5906_v51, 2  ;;  %v2041_v13 = vadd.f32 %v2039_v2, %v2016_v42 }
 0x2db   : > { %v2768_v36 = vmul.f32 %v7029_v49, %v5831_v21  ;;  %2085 = vrot.lane.b32.xlu1 %v5917_v55, %s3974_s30  ;;  %v2787_v37 = vmul.f32 %v7001_v59, %v2785_v48  ;;  %v7033_v52 = vrot.slane %v7032_v26, %v4237_v6  ;;  %v2649_v20 = vrot.slane %v5906_v51, 3 }
 0x2dc   : > { %v2804_v32 = vmul.f32 %v7031_v7, %v2623_v56  ;;  %v2732_v23 = vadd.f32 %v2730_v22, %v2711_v47  ;;  %v2751_v57 = vmul.f32 %v6985_v35, %v2749_v53  ;;  %v7034_v54 = vrot.slane %v5307_v19, %v4234_v5 }
 0x2dd   : > { %v2823_v28 = vmul.f32 %v7033_v52, %v2650_v45  ;;  %v7035_v17 = vrot.slane %v5309_v8, %v4234_v5  ;;  %v2066_v2 = vadd.f32 %v2064_v58, %v2041_v13  ;;  %v7036_v48 = vrot.slane %v5319_v34, %v4234_v5 }
 0x2de   : > { %v2612_v56 = vmul.f32 %v7034_v54, %v2597_v1  ;;  %v2670_v63 = vrot.slane %v5906_v51, 4  ;;  %v2691_v43 = vrot.slane %v5906_v51, 5  ;;  %v2753_v19 = vadd.f32 %v2751_v57, %v2732_v23  ;;  %v7044_v54 = vld [vmem:[#allocation54_spill] sm:$0xff] }
 0x2df   : > { %v2637_v30 = vmul.f32 %v7035_v17, %v2622_v60  ;;  %v2664_v45 = vmul.f32 %v7036_v48, %v2649_v20  ;;  %2123 = vrot.lane.b32.xlu1 %v5917_v55, %s3979_s25  ;;  %v2712_v42 = vrot.slane %v5906_v51, 6  ;;  %v7037_v58 = vrot.slane %v7025_v33, %v4234_v5 }
 0x2e0   : > { %v2620_v53 = vmul.f32 %v7015_v25, %v2612_v56  ;;  %v2806_v34 = vmul.f32 %v7005_v11, %v2804_v32  ;;  %v7038_v47 = vrot.slane %v5321_v15, %v4234_v5  ;;  %v2770_v13 = vadd.f32 %v2768_v36, %v2753_v19 }
 0x2e1   : > { %v2645_v8 = vmul.f32 %v7016_v18, %v2637_v30  ;;  %v5963_v22 = vadd.f32 %v7037_v58, %v2066_v2  ;;  %v2666_v49 = vmul.f32 %v6973_v61, %v2664_v45  ;;  %v7039_v25 = vrot.slane %v5323_v29, %v4234_v5 }
 0x2e2   : > { %v2685_v7 = vmul.f32 %v7038_v47, %v2670_v63  ;;  %v2733_v33 = vrot.slane %v5906_v51, 7  ;;  %v7040_v61 = vrot.slane %v5375_v14, %v4237_v6  ;;  %v7041_v36 = vrot.slane %v5831_v21, 5 }
 0x2e3   : > { %v2647_v52 = vadd.f32 %v2645_v8, %v2620_v53  ;;  %v2706_v18 = vmul.f32 %v7039_v25, %v2691_v43  ;;  %2083 = vrot.lane.b32.xlu0 %v5963_v22, %s3974_s30  ;;  %v7042_v32 = vrot.slane %v5386_v10, %v4237_v6  ;;  %v7043_v29 = vrot.slane %v5388_v39, %v4237_v6 }
 0x2e4   : > { %v2842_v15 = vmul.f32 %v7040_v61, %v2671_v50  ;;  %v7045_v56 = vrot.slane %v7044_v54, %v4237_v6  ;;  %2146 = vrot.lane.b32.xlu1 %v5917_v55, %s3992_s11  ;;  %v2789_v50 = vadd.f32 %v2787_v37, %v2770_v13  ;;  %v2687_v2 = vmul.f32 %v6976_v27, %v2685_v7  ;;  %v7050_v37 = vld [vmem:[#allocation58_spill] sm:$0xff] }
 0x2e5   : > { %v2861_v23 = vmul.f32 %v7042_v32, %v7041_v36  ;;  %v2880_v57 = vmul.f32 %v7043_v29, %v2713_v40  ;;  %v2668_v30 = vadd.f32 %v2666_v49, %v2647_v52  ;;  %v7046_v21 = vrot.slane %v5325_v62, %v4234_v5  ;;  %v7053_v49 = vld [vmem:[#allocation59_spill] sm:$0xff] }
 0x2e6   : > { %v2905_v17 = vmul.f32 %v7045_v56, %v2734_v46  ;;  %v2825_v40 = vmul.f32 %v7002_v31, %v2823_v28  ;;  %v7047_v45 = vrot.slane %v5706_v38, 5  ;;  %v7048_v46 = vrot.slane %v5400_v44, %v4237_v6  ;;  %v7056_v32 = vld [vmem:[#allocation55_spill] sm:$0xff] }
 0x2e7   : > { %v2727_v48 = vmul.f32 %v7046_v21, %v2712_v42  ;;  %v7049_v53 = vrot.slane %v5706_v38, 6  ;;  %v7051_v8 = vrot.slane %v7050_v37, %v4237_v6  ;;  %v7052_v58 = vrot.slane %v5706_v38, 7  ;;  %2121 = vrot.lane.b32.xlu0 %v5963_v22, %s3979_s25 }
 0x2e8   : > { %v1280_v19 = vmul.f32 %v7048_v46, %v7047_v45  ;;  %v7054_v62 = vrot.slane %v7053_v49, %v4237_v6  ;;  %v2808_v7 = vadd.f32 %v2806_v34, %v2789_v50  ;;  %v2689_v28 = vadd.f32 %v2687_v2, %v2668_v30  ;;  %v7057_v50 = vld [vmem:[#allocation56_spill] sm:$0xff] }
 0x2e9   : > { %v1305_v27 = vmul.f32 %v7051_v8, %v7049_v53  ;;  %v2708_v13 = vmul.f32 %v6982_v3, %v2706_v18  ;;  %v7055_v52 = vrot.slane %v5351_v0, %v4234_v5  ;;  %v2844_v61 = vmul.f32 %v7003_v12, %v2842_v15 }
 0x2ea   : > { %v1332_v47 = vmul.f32 %v7054_v62, %v7052_v58  ;;  %v2863_v36 = vmul.f32 %v7006_v9, %v2861_v23  ;;  %v2888_v29 = vmul.f32 %v7056_v32, %v2880_v57  ;;  %v1355_v34 = vrot.slane %v5706_v38, 1  ;;  %v7063_v58 = vld [vmem:[#allocation22_spill] sm:$0xff] }
 0x2eb   : > { %v2748_v25 = vmul.f32 %v7055_v52, %v2733_v33  ;;  %v2827_v56 = vadd.f32 %v2825_v40, %v2808_v7  ;;  %v2913_v18 = vmul.f32 %v7057_v50, %v2905_v17  ;;  %v2710_v30 = vadd.f32 %v2708_v13, %v2689_v28  ;;  %2144 = vrot.lane.b32.xlu0 %v5963_v22, %s3992_s11 }
 0x2ec   : > { %v2729_v2 = vmul.f32 %v6984_v4, %v2727_v48  ;;  %v7058_v0 = vrot.slane %v7028_v16, %v4234_v5  ;;  %v7059_v15 = vrot.slane %v5353_v41, %v4234_v5  ;;  %v1288_v23 = vmul.f32 %v6982_v3, %v1280_v19  ;;  %v7061_v41 = vld [vmem:[#allocation60_spill] sm:$0xff] }
 0x2ed   : > { %v1313_v57 = vmul.f32 %v6984_v4, %v1305_v27  ;;  %v2846_v46 = vadd.f32 %v2844_v61, %v2827_v56  ;;  %v2750_v17 = vmul.f32 %v6985_v35, %v2748_v25  ;;  %v7060_v48 = vrot.slane %v7030_v24, %v4234_v5 }
 0x2ee   : > { %v2767_v21 = vmul.f32 %v7058_v0, %v5906_v51  ;;  %v2784_v45 = vmul.f32 %v7059_v15, %v2597_v1  ;;  %v2731_v40 = vadd.f32 %v2729_v2, %v2710_v30  ;;  %v1334_v8 = vmul.f32 %v6985_v35, %v1332_v47 }
 0x2ef   : > { %v2803_v53 = vmul.f32 %v7060_v48, %v2622_v60  ;;  %v1315_v16 = vadd.f32 %v1313_v57, %v1288_v23  ;;  %v7062_v1 = vrot.slane %v7061_v41, %v4237_v6  ;;  %v7064_v27 = vrot.slane %v7063_v58, 5  ;;  %v7076_v48 = vld [vmem:[#allocation57_spill] sm:$0xff] }
 0x2f0   : > { %v7065_v62 = vrot.slane %v5400_v44, %v4234_v5  ;;  %v2865_v28 = vadd.f32 %v2863_v36, %v2846_v46  ;;  %v2752_v13 = vadd.f32 %v2750_v17, %v2731_v40  ;;  %v1376_v24 = vrot.slane %v5706_v38, 2  ;;  %v7071_v40 = vld [vmem:[#allocation61_spill] sm:$0xff] }
 0x2f1   : > { %v1370_v19 = vmul.f32 %v7062_v1, %v1355_v34  ;;  %v7066_v60 = vrot.slane %v7063_v58, 6  ;;  %v7067_v52 = vrot.slane %v7050_v37, %v4234_v5  ;;  %v2786_v25 = vmul.f32 %v7001_v59, %v2784_v45  ;;  %v7070_v45 = vld [vmem:[#allocation20_spill] sm:$0xff] }
 0x2f2   : > { %v1279_v7 = vmul.f32 %v7065_v62, %v7064_v27  ;;  %v7068_v61 = vrot.slane %v7032_v26, %v4234_v5  ;;  %v7069_v44 = vrot.slane %v5375_v14, %v4234_v5  ;;  %v1336_v56 = vadd.f32 %v1334_v8, %v1315_v16  ;;  %v7077_v16 = vld [vmem:[#allocation21_spill] sm:$0xff] }
 0x2f3   : > { %v1304_v47 = vmul.f32 %v7067_v52, %v7066_v60  ;;  %v2890_v30 = vadd.f32 %v2888_v29, %v2865_v28  ;;  %v2769_v2 = vadd.f32 %v2767_v21, %v2752_v13  ;;  %v2805_v15 = vmul.f32 %v7005_v11, %v2803_v53 }
 0x2f4   : > { %v2822_v34 = vmul.f32 %v7068_v61, %v2649_v20  ;;  %v2841_v36 = vmul.f32 %v7069_v44, %v2670_v63  ;;  %v1287_v0 = vmul.f32 %v6982_v3, %v1279_v7  ;;  %v1353_v23 = vadd.f32 %v7070_v45, %v1336_v56  ;;  %v1430_v61 = vld [vmem:[#allocation7 + $0x2] ss:$8 sm:$0x3] }
 0x2f5   : > { %v1312_v37 = vmul.f32 %v6984_v4, %v1304_v47  ;;  %v1372_v57 = vmul.f32 %v7001_v59, %v1370_v19  ;;  %v1403_v26 = vrot.slane %v5706_v38, 3  ;;  %v2915_v20 = vadd.f32 %v2913_v18, %v2890_v30 }
 0x2f6   : > { %v2788_v46 = vadd.f32 %v2786_v25, %v2769_v2  ;;  %v7072_v14 = vrot.slane %v7071_v40, %v4237_v6  ;;  %v7073_v29 = vrot.slane %v7063_v58, 7  ;;  %v7074_v3 = vrot.slane %v7053_v49, %v4234_v5 }
 0x2f7   : > { %v2824_v21 = vmul.f32 %v7002_v31, %v2822_v34  ;;  %v7075_v17 = vrot.slane %v5386_v10, %v4234_v5  ;;  %v2897_v18 = vrot.slane %v7044_v54, %v4234_v5  ;;  %v1343_v53 = vrot.slane %v7076_v48, %v4234_v5  ;;  %v7080_v54 = vld [vmem:[#allocation62_spill] sm:$0xff] }
 0x2f8   : > { %v1391_v63 = vmul.f32 %v7072_v14, %v1376_v24  ;;  %v1331_v4 = vmul.f32 %v7074_v3, %v7073_v29  ;;  %v7078_v8 = vrot.slane %v7077_v16, %v4237_v6  ;;  %v2807_v49 = vadd.f32 %v2805_v15, %v2788_v46  ;;  %v2090_v3 = vld [vmem:[#allocation5 + $0x86] ss:$8 sm:$0x3] }
 0x2f9   : > { %v2860_v38 = vmul.f32 %v7075_v17, %v2691_v43  ;;  %v1374_v19 = vadd.f32 %v1372_v57, %v1353_v23  ;;  %v1314_v27 = vadd.f32 %v1312_v37, %v1287_v0  ;;  %v2843_v62 = vmul.f32 %v7003_v12, %v2841_v36 }
 0x2fa   : > { %v6100_v1 = vadd.f32 %v7078_v8, %v2915_v20  ;;  %v7079_v10 = vrot.slane %v5388_v39, %v4234_v5  ;;  %v7081_v7 = vrot.slane %v7080_v54, %v4237_v6  ;;  %v1362_v13 = vrot.slane %v7061_v41, %v4234_v5  ;;  %v7082_v8 = vld [vmem:[#allocation13_spill] sm:$0xff] }
 0x2fb   : > { %v2826_v24 = vadd.f32 %v2824_v21, %v2807_v49  ;;  %v1399_v60 = vmul.f32 %v7005_v11, %v1391_v63  ;;  %v1333_v12 = vmul.f32 %v6985_v35, %v1331_v4  ;;  %v1354_v52 = vrot.slane %v7063_v58, 1  ;;  %v2105_v4 = vld [vmem:[#allocation5 + $0x87] ss:$8 sm:$0x3] }
 0x2fc   : > { %v2879_v43 = vmul.f32 %v7079_v10, %v2712_v42  ;;  %v1418_v28 = vmul.f32 %v7081_v7, %v1403_v26  ;;  %2933 = vrot.lane.b32.xlu1 %v6100_v1, %s3979_s25  ;;  %v2862_v39 = vmul.f32 %v7006_v9, %v2860_v38  ;;  %v2904_v47 = vmul.f32 %v2897_v18, %v2733_v33  ;;  %v2128_v21 = vld [vmem:[#allocation5 + $0x90] ss:$8 sm:$0x3]  ;;  %v2151_v10 = vld [vmem:[#allocation5 + $0x91] ss:$8 sm:$0x3] }
 0x2fd   : > { %v2845_v42 = vadd.f32 %v2843_v62, %v2826_v24  ;;  %v1401_v25 = vadd.f32 %v1399_v60, %v1374_v19  ;;  %v1335_v34 = vadd.f32 %v1333_v12, %v1314_v27  ;;  %v1383_v36 = vrot.slane %v7071_v40, %v4234_v5 }
 0x2fe   : > { %v2887_v41 = vmul.f32 %v7056_v32, %v2879_v43  ;;  %v1426_v44 = vmul.f32 %v7002_v31, %v1418_v28  ;;  %v1350_v9 = vmul.f32 %v1343_v53, %v7063_v58  ;;  %v1369_v35 = vmul.f32 %v1362_v13, %v1354_v52  ;;  %v2168_v13 = vld [vmem:[#allocation5 + $0x92] ss:$8 sm:$0x3] }
 0x2ff   : > { %v2864_v56 = vadd.f32 %v2862_v39, %v2845_v42  ;;  %v1375_v51 = vrot.slane %v7063_v58, 2  ;;  %v2922_v33 = vrot.slane %v7077_v16, %v4234_v5  ;;  %v1439_v30 = vrot.slane %v1430_v61, %v4237_v6 }
 0x300   : > { %2954 = vrot.lane.b32.xlu1 %v6100_v1, %s3992_s11  ;;  %v2912_v2 = vmul.f32 %v7057_v50, %v2904_v47  ;;  %v1428_v0 = vadd.f32 %v1426_v44, %v1401_v25  ;;  %v1352_v37 = vadd.f32 %v1350_v9, %v1335_v34  ;;  %v1410_v15 = vrot.slane %v7080_v54, %v4234_v5 }
 0x301   : > { %v2889_v32 = vadd.f32 %v2887_v41, %v2864_v56  ;;  %v1371_v23 = vmul.f32 %v7001_v59, %v1369_v35  ;;  %v1390_v57 = vmul.f32 %v1383_v36, %v1375_v51  ;;  %v1402_v26 = vrot.slane %v7063_v58, 3  ;;  %v2202_v56 = vld [vmem:[#allocation5 + $0x94] ss:$8 sm:$0x3] }
 0x302   : > { %v6141_v46 = vadd.f32 %v1439_v30, %v1428_v0  ;;  %v1435_v29 = vrot.slane %v1430_v61, %v4234_v5  ;;  %v2095_v17 = vrot.slane %v2090_v3, %v4234_v5  ;;  %v2099_v38 = vrot.slane %v2090_v3, %v4237_v6  ;;  %v2185_v61 = vld [vmem:[#allocation5 + $0x93] ss:$8 sm:$0x3]  ;;  %v2219_v0 = vld [vmem:[#allocation5 + $0x95] ss:$8 sm:$0x3] }
 0x303   : > { %v2914_v45 = vadd.f32 %v2912_v2, %v2889_v32  ;;  %v1373_v40 = vadd.f32 %v1371_v23, %v1352_v37  ;;  %v1398_v50 = vmul.f32 %v7005_v11, %v1390_v57  ;;  %v1417_v14 = vmul.f32 %v1410_v15, %v1402_v26  ;;  %v2236_v57 = vld [vmem:[#allocation5 + $0x96] ss:$8 sm:$0x3] }
 0x304   : > { %2977 = vrot.lane.b32.xlu1 %v6100_v1, %s3974_s30  ;;  %v2110_v18 = vrot.slane %v2105_v4, %v4234_v5  ;;  %v2114_v16 = vrot.slane %v2105_v4, %v4237_v6  ;;  %v2133_v27 = vrot.slane %v2128_v21, %v4234_v5  ;;  %v2137_v62 = vrot.slane %v2128_v21, %v4237_v6 }
 0x305   : > { %v6139_v20 = vadd.f32 %v2922_v33, %v2914_v45  ;;  %v1400_v63 = vadd.f32 %v1398_v50, %v1373_v40  ;;  %v1425_v59 = vmul.f32 %v7002_v31, %v1417_v14  ;;  %vm1469_vm13 = vcmp.lt.s32.totalorder %v7082_v8, 64 }
 0x306   : > { %v2117_v43 = vmul.f32 %v2110_v18, %v5917_v55  ;;  %v2118_v24 = vmul.f32 %v2114_v16, %v5963_v22  ;;  %v2156_v47 = vrot.slane %v2151_v10, %v4234_v5  ;;  %v2160_v25 = vrot.slane %v2151_v10, %v4237_v6 }
 0x307   : > { %2931 = vrot.lane.b32.xlu0 %v6139_v20, %s3979_s25  ;;  %v1427_v58 = vadd.f32 %v1425_v59, %v1400_v63  ;;  %v2173_v34 = vrot.slane %v2168_v13, %v4234_v5  ;;  %v2177_v41 = vrot.slane %v2168_v13, %v4237_v6  ;;  %v2190_v35 = vrot.slane %v2185_v61, %v4234_v5 }
 0x308   : > { %1446 = vrot.lane.b32.xlu1 %v6141_v46, %s3979_s25  ;;  %v2194_v51 = vrot.slane %v2185_v61, %v4237_v6  ;;  %v2207_v45 = vrot.slane %v2202_v56, %v4234_v5  ;;  %v2211_v23 = vrot.slane %v2202_v56, %v4237_v6  ;;  %v2224_v59 = vrot.slane %v2219_v0, %v4234_v5  ;;  %v6215_v61 = vld [vmem:[#allocation5 + $0x54] ss:$8 sm:$0x3] }
 0x309   : > { %v6158_v11 = vadd.f32 %v1435_v29, %v1427_v58  ;;  %v2228_v58 = vrot.slane %v2219_v0, %v4237_v6  ;;  %v2253_v29 = vld [vmem:[#allocation5 + $0x97] ss:$8 sm:$0x3]  ;;  %v2197_v4 = vmul.f32 %v2190_v35, %v5963_v22  ;;  %v2241_v21 = vrot.slane %v2236_v57, %v4234_v5  ;;  %v6225_v35 = vld [vmem:[#allocation5 + $0x102] ss:$8 sm:$0x3] }
 0x30a   : > { %v2198_v63 = vmul.f32 %v2194_v51, %v5917_v55  ;;  %v2258_v16 = vrot.slane %v2253_v29, %v4234_v5  ;;  %v6229_v51 = vld [vmem:[#allocation5 + $0x112] ss:$8 sm:$0x3]  ;;  %v2959_v0 = vld [vmem:[#allocation5 + $0xf7] ss:$8 sm:$0x3] }
 0x30b   : > { %2952 = vrot.lane.b32.xlu0 %v6139_v20, %s3992_s11  ;;  %vm7102_vm6 = vcmp.lt.s32.totalorder %v7082_v8, 126  ;;  %vm7104_vm5 = vcmp.lt.s32.totalorder %v7082_v8, 125 }
 0x30c   : > { %1467 = vrot.lane.b32.xlu1 %v6141_v46, %s3992_s11  ;;  %vm7103_vm14 = vmmov %vm7102_vm6 }
 0x30d   : > { %vm7105_vm7 = vmmov %vm7104_vm5 }
 0x30e   : > { %vm7112_vm4 = vmmov %vm7104_vm5 }
 0x30f   : > { %2975 = vrot.lane.b32.xlu0 %v6139_v20, %s3974_s30  ;;  %vm7113_vm3 = vmmov %vm7112_vm4 }
 0x310   : > { %1491 = vrot.lane.b32.xlu1 %v6141_v46, %s3974_s30 }
 0x313   : > { %1444 = vrot.lane.b32.xlu0 %v6158_v11, %s3979_s25 }
 0x317   : > { %1465 = vrot.lane.b32.xlu0 %v6158_v11, %s3992_s11 }
 0x31b   : > { %1489 = vrot.lane.b32.xlu0 %v6158_v11, %s3974_s30 }
 0x34d   : > { %v2086_v31 = vpop.permute.xlu1 %2085 }
 0x351   : > { %v2124_v53 = vpop.permute.xlu1 %2123 }
 0x355   : > { %v2084_v48 = vpop.permute.xlu0 %2083 }
 0x356   : > { %v2087_v49 = vsel %vm477_vm9, %v2084_v48, %v2086_v31  ;;  %v2088_v19 = vsel %vm477_vm9, %v2086_v31, %v2084_v48  ;;  %v2147_v42 = vpop.permute.xlu1 %2146 }
 0x357   : > { %v2102_v54 = vmul.f32 %v2095_v17, %v2087_v49  ;;  %v2103_v7 = vmul.f32 %v2099_v38, %v2088_v19  ;;  %v2180_v26 = vmul.f32 %v2173_v34, %v2088_v19  ;;  %v2181_v40 = vmul.f32 %v2177_v41, %v2087_v49  ;;  %v2999_v41 = vld [vmem:[#allocation5 + $0x101] ss:$8 sm:$0x3] }
 0x358   : > { %v2245_v17 = vrot.slane %v2236_v57, %v4237_v6  ;;  %v6337_v57 = vld [vmem:[#allocation5 + $0x55] ss:$8 sm:$0x3] }
 0x359   : > { %v2122_v28 = vpop.permute.xlu0 %2121  ;;  %v2119_v44 = vadd.f32 %v2117_v43, %v2102_v54  ;;  %v2120_v36 = vadd.f32 %v2118_v24, %v2103_v7 }
 0x35a   : > { %v6180_v60 = vsel %vm614_vm15, %v2122_v28, %v2124_v53  ;;  %v6184_v12 = vsel %vm614_vm15, %v2124_v53, %v2122_v28  ;;  %v2248_v28 = vmul.f32 %v2241_v21, %v2087_v49  ;;  %v2249_v13 = vmul.f32 %v2245_v17, %v2088_v19  ;;  %v6223_v49 = vld [vmem:[#allocation5 + $0x111] ss:$8 sm:$0x3]  ;;  %v2938_v19 = vld [vmem:[#allocation5 + $0xf6] ss:$8 sm:$0x3] }
 0x35b   : > { %v2140_v52 = vmul.f32 %v2133_v27, %v6184_v12  ;;  %v2141_v39 = vmul.f32 %v2137_v62, %v6180_v60  ;;  %v2214_v38 = vmul.f32 %v2207_v45, %v6180_v60  ;;  %v2215_v18 = vmul.f32 %v2211_v23, %v6184_v12  ;;  %v2982_v21 = vld [vmem:[#allocation5 + $0x100] ss:$8 sm:$0x3] }
 0x35c   : > { %v2262_v27 = vrot.slane %v2253_v29, %v4237_v6  ;;  %v3140_v23 = vrot.slane %v6223_v49, %v4234_v5 }
 0x35d   : > { %v2145_v9 = vpop.permute.xlu0 %2144  ;;  %v2142_v32 = vadd.f32 %v2140_v52, %v2119_v44  ;;  %v2143_v2 = vadd.f32 %v2141_v39, %v2120_v36  ;;  %v2265_v39 = vmul.f32 %v2258_v16, %v5917_v55  ;;  %v3067_v44 = vld [vmem:[#allocation5 + $0x105] ss:$8 sm:$0x3]  ;;  %v6217_v36 = vld [vmem:[#allocation5 + $0xa0] ss:$8 sm:$0x3] }
 0x35e   : > { %v2148_v33 = vsel %vm1469_vm13, %v2145_v9, %v2147_v42  ;;  %v2149_v30 = vsel %vm1469_vm13, %v2147_v42, %v2145_v9  ;;  %v6227_v55 = vld [vmem:[#allocation5 + $0x106] ss:$8 sm:$0x3]  ;;  %v3076_v45 = vrot.slane %v3067_v44, %v4237_v6 }
 0x35f   : > { %v2163_v37 = vmul.f32 %v2156_v47, %v2149_v30  ;;  %v2164_v15 = vmul.f32 %v2160_v25, %v2148_v33  ;;  %v2231_v54 = vmul.f32 %v2224_v59, %v2148_v33  ;;  %v2232_v7 = vmul.f32 %v2228_v58, %v2149_v30 }
 0x360   : > { %v2266_v25 = vmul.f32 %v2262_v27, %v5963_v22  ;;  %v3004_v22 = vrot.slane %v2999_v41, %v4234_v5  ;;  %v3008_v33 = vrot.slane %v2999_v41, %v4237_v6  ;;  %v1518_v30 = vrot.slane %v6215_v61, %v4234_v5  ;;  %v6293_v41 = vld [vmem:[#allocation5 + $0x114] ss:$8 sm:$0x3] }
 0x361   : > { %v2165_v50 = vadd.f32 %v2163_v37, %v2142_v32  ;;  %v2166_v14 = vadd.f32 %v2164_v15, %v2143_v2  ;;  %v1522_v32 = vrot.slane %v6215_v61, %v4237_v6  ;;  %v6239_v37 = vld [vmem:[#allocation5 + $0x103] ss:$8 sm:$0x3]  ;;  %v3072_v15 = vrot.slane %v3067_v44, %v4234_v5  ;;  %v1496_v2 = vld [vmem:[#allocation5 + $0x53] ss:$8 sm:$0x3] }
 0x362   : > { %v3025_v59 = vrot.slane %v6225_v35, %v4237_v6  ;;  %v3089_v58 = vrot.slane %v6227_v55, %v4234_v5  ;;  %v3093_v29 = vrot.slane %v6227_v55, %v4237_v6  ;;  %v3042_v16 = vrot.slane %v6239_v37, %v4237_v6 }
 0x363   : > { %v2182_v31 = vadd.f32 %v2180_v26, %v2165_v50  ;;  %v2183_v3 = vadd.f32 %v2181_v40, %v2166_v14  ;;  %v2943_v26 = vrot.slane %v2938_v19, %v4234_v5  ;;  %v2947_v40 = vrot.slane %v2938_v19, %v4237_v6  ;;  %v6251_v14 = vld [vmem:[#allocation5 + $0x107] ss:$8 sm:$0x3] }
 0x364   : > { %v3021_v50 = vrot.slane %v6225_v35, %v4234_v5  ;;  %v3106_v27 = vrot.slane %v6251_v14, %v4234_v5 }
 0x365   : > { %v2199_v48 = vadd.f32 %v2197_v4, %v2182_v31  ;;  %v2200_v53 = vadd.f32 %v2198_v63, %v2183_v3  ;;  %v6253_v63 = vld [vmem:[#allocation5 + $0x113] ss:$8 sm:$0x3]  ;;  %v1451_v31 = vld [vmem:[#allocation5 + $0x51] ss:$8 sm:$0x3] }
 0x367   : > { %v2216_v10 = vadd.f32 %v2214_v38, %v2199_v48  ;;  %v2217_v43 = vadd.f32 %v2215_v18, %v2200_v53  ;;  %v2964_v38 = vrot.slane %v2959_v0, %v4234_v5  ;;  %v2968_v18 = vrot.slane %v2959_v0, %v4237_v6  ;;  %v6269_v53 = vld [vmem:[#allocation5 + $0x104] ss:$8 sm:$0x3] }
 0x368   : > { %v3038_v48 = vrot.slane %v6239_v37, %v4234_v5 }
 0x369   : > { %v2233_v24 = vadd.f32 %v2231_v54, %v2216_v10  ;;  %v2234_v52 = vadd.f32 %v2232_v7, %v2217_v43  ;;  %v3110_v10 = vrot.slane %v6251_v14, %v4237_v6  ;;  %v2987_v7 = vrot.slane %v2982_v21, %v4234_v5 }
 0x36a   : > { %v6319_v54 = vmul.f32 %v3076_v45, %v6100_v1  ;;  %v1456_v43 = vrot.slane %v1451_v31, %v4234_v5  ;;  %v7084_v14 = vrot.slane %v6337_v57, %v4234_v5 }
 0x36b   : > { %v2250_v42 = vadd.f32 %v2248_v28, %v2233_v24  ;;  %v2251_v47 = vadd.f32 %v2249_v13, %v2234_v52  ;;  %v2991_v28 = vrot.slane %v2982_v21, %v4237_v6  ;;  %v3011_v13 = vmul.f32 %v3004_v22, %v6100_v1 }
 0x36c   : > { %v3012_v52 = vmul.f32 %v3008_v33, %v6139_v20  ;;  %v6316_v21 = vmul.f32 %v3072_v15, %v6139_v20 }
 0x36d   : > { %v6219_v56 = vadd.f32 %v2265_v39, %v2250_v42  ;;  %v6221_v9 = vadd.f32 %v2266_v25, %v2251_v47  ;;  %v3055_v39 = vrot.slane %v6269_v53, %v4234_v5  ;;  %v3059_v42 = vrot.slane %v6269_v53, %v4237_v6  ;;  %v6289_v47 = vld [vmem:[#allocation5 + $0x110] ss:$8 sm:$0x3] }
 0x36e   : > { %v6211_v62 = vpop.permute.xlu1 %2933  ;;  %v3144_v25 = vrot.slane %v6223_v49, %v4237_v6 }
 0x370   : > { %v6333_v45 = vmul.f32 %v3144_v25, %v6139_v20  ;;  %v6351_v20 = vmul.f32 %v1522_v32, %v6141_v46  ;;  %v1460_v46 = vrot.slane %v1451_v31, %v4237_v6  ;;  %v1501_v32 = vrot.slane %v1496_v2, %v4234_v5 }
 0x372   : > { %v2955_v34 = vpop.permute.xlu1 %2954 }
 0x376   : > { %v2978_v4 = vpop.permute.xlu1 %2977 }
 0x379   : > { %v2932_v3 = vpop.permute.xlu0 %2931 }
 0x37a   : > { %v6298_v44 = vsel %vm614_vm15, %v2932_v3, %v6211_v62  ;;  %v6303_v19 = vsel %vm614_vm15, %v6211_v62, %v2932_v3  ;;  %v1447_v62 = vpop.permute.xlu1 %1446  ;;  %v3123_v3 = vrot.slane %v6289_v47, %v4234_v5 }
 0x37b   : > { %v2951_v15 = vmul.f32 %v2947_v40, %v6303_v19  ;;  %v6357_v40 = vmul.f32 %v1518_v30, %v6158_v11  ;;  %v1505_v11 = vrot.slane %v1496_v2, %v4237_v6 }
 0x37d   : > { %v2953_v24 = vpop.permute.xlu0 %2952 }
 0x37e   : > { %v6307_v22 = vsel %vm1469_vm13, %v2953_v24, %v2955_v34  ;;  %v6311_v33 = vsel %vm1469_vm13, %v2955_v34, %v2953_v24  ;;  %v6326_v34 = vmul.f32 %v3140_v23, %v6100_v1 }
 0x37f   : > { %v2971_v49 = vmul.f32 %v2964_v38, %v6307_v22  ;;  %v2972_v0 = vmul.f32 %v2968_v18, %v6311_v33  ;;  %v2950_v18 = vmul.f32 %v2943_v26, %v6298_v44  ;;  %v1473_v26 = vld [vmem:[#allocation5 + $0x52] ss:$8 sm:$0x3]  ;;  %v3046_v2 = vmul.f32 %v3042_v16, %v6307_v22 }
 0x380   : > { %v3113_v55 = vmul.f32 %v3106_v27, %v6307_v22  ;;  %v7083_v27 = vrot.slane %v6289_v47, %v4237_v6 }
 0x381   : > { %v2976_v17 = vpop.permute.xlu0 %2975  ;;  %v2973_v25 = vadd.f32 %v2971_v49, %v2950_v18  ;;  %v2974_v24 = vadd.f32 %v2972_v0, %v2951_v15  ;;  %v1468_v0 = vpop.permute.xlu1 %1467  ;;  %v6371_v18 = vld [vmem:[#allocation5 + $0x57] ss:$8 sm:$0x3] }
 0x382   : > { %v6341_v1 = vsel %vm477_vm9, %v2976_v17, %v2978_v4  ;;  %v6345_v23 = vsel %vm477_vm9, %v2978_v4, %v2976_v17  ;;  %v6361_v17 = vld [vmem:[#allocation5 + $0x56] ss:$8 sm:$0x3]  ;;  %v1573_v31 = vrot.slane %v6371_v18, %v4237_v6 }
 0x383   : > { %v2994_v38 = vmul.f32 %v2987_v7, %v6341_v1  ;;  %v2995_v4 = vmul.f32 %v2991_v28, %v6345_v23  ;;  %v1478_v7 = vrot.slane %v1473_v26, %v4234_v5  ;;  %v1482_v28 = vrot.slane %v1473_v26, %v4237_v6 }
 0x384   : > { %v3062_v37 = vmul.f32 %v3055_v39, %v6345_v23  ;;  %v3063_v16 = vmul.f32 %v3059_v42, %v6341_v1  ;;  %v3096_v42 = vmul.f32 %v3089_v58, %v6298_v44 }
 0x385   : > { %v2996_v61 = vadd.f32 %v2994_v38, %v2973_v25  ;;  %v2997_v30 = vadd.f32 %v2995_v4, %v2974_v24  ;;  %v1445_v49 = vpop.permute.xlu0 %1444  ;;  %v3028_v38 = vmul.f32 %v3021_v50, %v6303_v19  ;;  %v3029_v24 = vmul.f32 %v3025_v59, %v6298_v44 }
 0x386   : > { %v3045_v4 = vmul.f32 %v3038_v48, %v6311_v33  ;;  %v1569_v50 = vrot.slane %v6371_v18, %v4234_v5 }
 0x387   : > { %v3013_v26 = vadd.f32 %v3011_v13, %v2996_v61  ;;  %v3014_v25 = vadd.f32 %v3012_v52, %v2997_v30  ;;  %v1448_v13 = vsel %vm614_vm15, %v1445_v49, %v1447_v62  ;;  %v1449_v52 = vsel %vm614_vm15, %v1447_v62, %v1445_v49  ;;  %v6403_v61 = vld [vmem:[#allocation7 + $0x3] ss:$8 sm:$0x3] }
 0x388   : > { %v1464_v15 = vmul.f32 %v1460_v46, %v1448_v13 }
 0x389   : > { %v3030_v35 = vadd.f32 %v3028_v38, %v3013_v26  ;;  %v3031_v59 = vadd.f32 %v3029_v24, %v3014_v25  ;;  %v1466_v48 = vpop.permute.xlu0 %1465  ;;  %v1492_v26 = vpop.permute.xlu1 %1491  ;;  %v1463_v25 = vmul.f32 %v1456_v43, %v1449_v52  ;;  %v2287_v43 = vld [vmem:[#allocation7 + $0x6] ss:$8 sm:$0x3] }
 0x38a   : > { %v1470_v30 = vsel %vm1469_vm13, %v1466_v48, %v1468_v0  ;;  %v1471_v18 = vsel %vm1469_vm13, %v1468_v0, %v1466_v48  ;;  %v3097_v0 = vmul.f32 %v3093_v29, %v6303_v19  ;;  %v3114_v29 = vmul.f32 %v3110_v10, %v6311_v33 }
 0x38b   : > { %v3047_v62 = vadd.f32 %v3045_v4, %v3030_v35  ;;  %v3048_v49 = vadd.f32 %v3046_v2, %v3031_v59  ;;  %v1485_v38 = vmul.f32 %v1478_v7, %v1471_v18  ;;  %v1486_v24 = vmul.f32 %v1482_v28, %v1470_v30 }
 0x38c   : > { %v1542_v10 = vmul.f32 %v7084_v14, %v1448_v13 }
 0x38d   : > { %v3064_v7 = vadd.f32 %v3062_v37, %v3047_v62  ;;  %v3065_v28 = vadd.f32 %v3063_v16, %v3048_v49  ;;  %v1490_v46 = vpop.permute.xlu0 %1489  ;;  %v1487_v4 = vadd.f32 %v1485_v38, %v1463_v25  ;;  %v1488_v2 = vadd.f32 %v1486_v24, %v1464_v15 }
 0x38e   : > { %v1493_v35 = vsel %vm477_vm9, %v1490_v46, %v1492_v26  ;;  %v1494_v59 = vsel %vm477_vm9, %v1492_v26, %v1490_v46  ;;  %v2292_v15 = vrot.slane %v2287_v43, %v4234_v5  ;;  %v2296_v37 = vrot.slane %v2287_v43, %v4237_v6 }
 0x38f   : > { %v3081_v48 = vadd.f32 %v6316_v21, %v3064_v7  ;;  %v3082_v58 = vadd.f32 %v6319_v54, %v3065_v28  ;;  %v1508_v53 = vmul.f32 %v1501_v32, %v1494_v59  ;;  %v1509_v39 = vmul.f32 %v1505_v11, %v1493_v35 }
 0x390   : > { %v3130_v32 = vmul.f32 %v3123_v3, %v6341_v1  ;;  %v3131_v11 = vmul.f32 %v7083_v27, %v6345_v23  ;;  %v7085_v49 = vrot.slane %v6337_v57, %v4237_v6  ;;  %v7086_v3 = vrot.slane %v6217_v36, %v4234_v5 }
 0x391   : > { %v3098_v16 = vadd.f32 %v3096_v42, %v3081_v48  ;;  %v3099_v21 = vadd.f32 %v3097_v0, %v3082_v58  ;;  %v1510_v62 = vadd.f32 %v1508_v53, %v1487_v4  ;;  %v1511_v54 = vadd.f32 %v1509_v39, %v1488_v2  ;;  %v3203_v4 = vld [vmem:[#allocation7 + $0x11] ss:$8 sm:$0x3] }
 0x392   : > { %v1543_v38 = vmul.f32 %v7085_v49, %v1449_v52  ;;  %v2282_v47 = vmul.f32 %v7086_v3, %v6184_v12  ;;  %v7087_v53 = vrot.slane %v6217_v36, %v4237_v6  ;;  %v7088_v57 = vrot.slane %v6361_v17, %v4234_v5 }
 0x393   : > { %v3115_v24 = vadd.f32 %v3113_v55, %v3098_v16  ;;  %v3116_v26 = vadd.f32 %v3114_v29, %v3099_v21  ;;  %v1527_v25 = vadd.f32 %v6357_v40, %v1510_v62  ;;  %v1528_v39 = vadd.f32 %v6351_v20, %v1511_v54 }
 0x394   : > { %v2283_v13 = vmul.f32 %v7087_v53, %v6180_v60  ;;  %v1559_v52 = vmul.f32 %v7088_v57, %v1470_v30  ;;  %v7089_v42 = vrot.slane %v6361_v17, %v4237_v6  ;;  %v7090_v12 = vrot.slane %v6229_v51, %v4234_v5  ;;  %v3270_v57 = vld [vmem:[#allocation5 + $0x131] ss:$8 sm:$0x3] }
 0x395   : > { %v3132_v0 = vadd.f32 %v3130_v32, %v3115_v24  ;;  %v3133_v20 = vadd.f32 %v3131_v11, %v3116_v26  ;;  %v1544_v7 = vadd.f32 %v1542_v10, %v1527_v25  ;;  %v1545_v28 = vadd.f32 %v1543_v38, %v1528_v39  ;;  %v7099_v38 = vld [vmem:[#allocation16_spill] sm:$0xff] }
 0x396   : > { %v1560_v40 = vmul.f32 %v7089_v42, %v1471_v18  ;;  %v3164_v43 = vmul.f32 %v7090_v12, %v6303_v19  ;;  %v7091_v60 = vrot.slane %v6229_v51, %v4237_v6  ;;  %v1576_v46 = vmul.f32 %v1569_v50, %v1493_v35 }
 0x397   : > { %v1577_v30 = vmul.f32 %v1573_v31, %v1494_v59  ;;  %v3149_v17 = vadd.f32 %v6326_v34, %v3132_v0  ;;  %v3150_v18 = vadd.f32 %v6333_v45, %v3133_v20  ;;  %v1561_v2 = vadd.f32 %v1559_v52, %v1544_v7 }
 0x398   : > { %v3165_v36 = vmul.f32 %v7091_v60, %v6298_v44  ;;  %v1562_v48 = vadd.f32 %v1560_v40, %v1545_v28  ;;  %v2284_v58 = vadd.f32 %v2282_v47, %v6219_v56  ;;  %v2285_v55 = vadd.f32 %v2283_v13, %v6221_v9  ;;  %v3226_v47 = vld [vmem:[#allocation5 + $0x127] ss:$8 sm:$0x3] }
 0x399   : > { %v7092_v19 = vrot.slane %v6253_v63, %v4234_v5  ;;  %v7093_v51 = vrot.slane %v6253_v63, %v4237_v6  ;;  %v3166_v31 = vadd.f32 %v3164_v43, %v3149_v17  ;;  %v1578_v50 = vadd.f32 %v1576_v46, %v1561_v2 }
 0x39a   : > { %v3167_v34 = vadd.f32 %v3165_v36, %v3150_v18  ;;  %v1579_v45 = vadd.f32 %v1577_v30, %v1562_v48  ;;  %v3208_v35 = vrot.slane %v3203_v4, %v4234_v5  ;;  %v3212_v56 = vrot.slane %v3203_v4, %v4237_v6  ;;  %v3287_v30 = vld [vmem:[#allocation5 + $0x132] ss:$8 sm:$0x3] }
 0x39b   : > { %v3181_v29 = vmul.f32 %v7092_v19, %v6311_v33  ;;  %v3182_v44 = vmul.f32 %v7093_v51, %v6307_v22  ;;  %v7094_v9 = vrot.slane %v6293_v41, %v4234_v5  ;;  %v7095_v33 = vrot.slane %v6293_v41, %v4237_v6 }
 0x39c   : > { %v7096_v21 = vrot.slane %v6403_v61, %v4234_v5  ;;  %v7097_v54 = vrot.slane %v6403_v61, %v4237_v6  ;;  %v2299_v27 = vadd.f32 %v2292_v15, %v2284_v58  ;;  %v2300_v11 = vadd.f32 %v2296_v37, %v2285_v55  ;;  %v3247_v61 = vld [vmem:[#allocation5 + $0x130] ss:$8 sm:$0x3] }
 0x39d   : > { %v3198_v59 = vmul.f32 %v7094_v9, %v6345_v23  ;;  %v3199_v16 = vmul.f32 %v7095_v33, %v6341_v1  ;;  %v3183_v63 = vadd.f32 %v3181_v29, %v3166_v31  ;;  %v3184_v22 = vadd.f32 %v3182_v44, %v3167_v34  ;;  %v7098_v23 = vld [vmem:[#allocation18_spill] sm:$0xff]  ;;  %v3310_v29 = vld [vmem:[#allocation5 + $0x133] ss:$8 sm:$0x3] }
 0x39e   : > { %v1593_v62 = vadd.f32 %v7096_v21, %v1578_v50  ;;  %v1594_v32 = vadd.f32 %v7097_v54, %v1579_v45  ;;  %v3252_v53 = vrot.slane %v3247_v61, %v4234_v5  ;;  %v3256_v13 = vrot.slane %v3247_v61, %v4237_v6  ;;  %v3333_v50 = vld [vmem:[#allocation5 + $0x134] ss:$8 sm:$0x3] }
 0x39f   : > { %v3200_v14 = vadd.f32 %v3198_v59, %v3183_v63  ;;  %v3201_v10 = vadd.f32 %v3199_v16, %v3184_v22  ;;  %v3231_v52 = vrot.slane %v3226_v47, %v4234_v5  ;;  %v3235_v42 = vrot.slane %v3226_v47, %v4237_v6 }
 0x3a0   : > { %v1595_v49 = vadd.f32 %v1593_v62, %v7098_v23  ;;  %v1596_v24 = vadd.f32 %v1594_v32, %v7099_v38  ;;  %v3275_v36 = vrot.slane %v3270_v57, %v4234_v5  ;;  %v3279_v46 = vrot.slane %v3270_v57, %v4237_v6  ;;  %v3356_v32 = vld [vmem:[#allocation5 + $0x135] ss:$8 sm:$0x3] }
 0x3a1   : > { %v3215_v41 = vadd.f32 %v3208_v35, %v3200_v14  ;;  %v3216_v1 = vadd.f32 %v3212_v56, %v3201_v10  ;;  %v3292_v55 = vrot.slane %v3287_v30, %v4234_v5  ;;  %v3296_v19 = vrot.slane %v3287_v30, %v4237_v6  ;;  %v3417_v30 = vld [vmem:[#allocation5 + $0x137] ss:$8 sm:$0x3] }
 0x3a2   : > { %v2301_v26 = vadd.f32 %v2299_v27, %v1595_v49  ;;  %v2302_v25 = vadd.f32 %v2300_v11, %v1596_v24  ;;  %v3315_v9 = vrot.slane %v3310_v29, %v4234_v5  ;;  %v3319_v59 = vrot.slane %v3310_v29, %v4237_v6 }
 0x3a3   : > { %vm7100_vm9 = vcmp.lt.s32.totalorder %v7082_v8, 127  ;;  %v3338_v62 = vrot.slane %v3333_v50, %v4234_v5  ;;  %v3342_v54 = vrot.slane %v3333_v50, %v4237_v6 }
 0x3a4   : > { %v3217_v39 = vadd.f32 %v3215_v41, %v2301_v26  ;;  %v3218_v3 = vadd.f32 %v3216_v1, %v2302_v25  ;;  %vm7101_vm15 = vmmov %vm7100_vm9  ;;  %v3361_v26 = vrot.slane %v3356_v32, %v4234_v5  ;;  %v3365_v25 = vrot.slane %v3356_v32, %v4237_v6 }
 0x3a6   : > { %3221 = vrot.lane.b32.xlu1 %v3218_v3, %s3968_s17  ;;  %3219 = vrot.lane.b32.xlu0 %v3217_v39, %s3968_s17  ;;  %v3300_v22 = vmul.f32 %v3296_v19, %v3218_v3  ;;  %v3299_v21 = vmul.f32 %v3292_v55, %v3217_v39 }
 0x3aa   : > { %3242 = vrot.lane.b32.xlu1 %v3218_v3, %s3967_s20  ;;  %3240 = vrot.lane.b32.xlu0 %v3217_v39, %s3967_s20 }
 0x3ae   : > { %3265 = vrot.lane.b32.xlu1 %v3218_v3, %s3969_s18  ;;  %3263 = vrot.lane.b32.xlu0 %v3217_v39, %s3969_s18 }
 0x3b2   : > { %3305 = vrot.lane.b32.xlu1 %v3218_v3, %s3970_s24  ;;  %3303 = vrot.lane.b32.xlu0 %v3217_v39, %s3970_s24 }
 0x3b6   : > { %3328 = vrot.lane.b32.xlu1 %v3218_v3, %s3971_s26  ;;  %3326 = vrot.lane.b32.xlu0 %v3217_v39, %s3971_s26 }
 0x3ba   : > { %3351 = vrot.lane.b32.xlu1 %v3218_v3, %s3972_s27  ;;  %3349 = vrot.lane.b32.xlu0 %v3217_v39, %s3972_s27  ;;  %v3373_v39 = vld [vmem:[#allocation7 + $0x13] ss:$8 sm:$0x3] }
 0x3bb   : > { %v3378_v47 = vrot.slane %v3373_v39, %v4234_v5 }
 0x418   : > { %v3222_v15 = vpop.permute.xlu1 %3221  ;;  %v3220_v37 = vpop.permute.xlu0 %3219 }
 0x419   : > { %v3223_v20 = vsel %vm226_vm1, %v3220_v37, %v3222_v15  ;;  %v3224_v7 = vsel %vm226_vm1, %v3222_v15, %v3220_v37 }
 0x41a   : > { %v3238_v4 = vmul.f32 %v3231_v52, %v3224_v7  ;;  %v3239_v17 = vmul.f32 %v3235_v42, %v3223_v20 }
 0x41c   : > { %v3243_v40 = vpop.permute.xlu1 %3242  ;;  %v3241_v0 = vpop.permute.xlu0 %3240 }
 0x41d   : > { %v3244_v28 = vsel %vm248_vm0, %v3241_v0, %v3243_v40  ;;  %v3245_v12 = vsel %vm248_vm0, %v3243_v40, %v3241_v0 }
 0x41e   : > { %v3259_v43 = vmul.f32 %v3252_v53, %v3245_v12  ;;  %v3260_v60 = vmul.f32 %v3256_v13, %v3244_v28  ;;  %v3382_v53 = vrot.slane %v3373_v39, %v4237_v6 }
 0x420   : > { %v3266_v18 = vpop.permute.xlu1 %3265  ;;  %v3264_v2 = vpop.permute.xlu0 %3263  ;;  %v3261_v51 = vadd.f32 %v3259_v43, %v3238_v4  ;;  %v3262_v44 = vadd.f32 %v3260_v60, %v3239_v17  ;;  %v7106_v43 = vld [vmem:[#allocation14_spill] sm:$0xff] }
 0x421   : > { %v3267_v48 = vsel %vm272_vm2, %v3264_v2, %v3266_v18  ;;  %v3268_v58 = vsel %vm272_vm2, %v3266_v18, %v3264_v2  ;;  %v3396_v18 = vld [vmem:[#allocation5 + $0x136] ss:$8 sm:$0x3]  ;;  %v3422_v2 = vrot.slane %v3417_v30, %v4234_v5 }
 0x422   : > { %v3282_v31 = vmul.f32 %v3275_v36, %v3268_v58  ;;  %v3283_v34 = vmul.f32 %v3279_v46, %v3267_v48  ;;  %v7107_v36 = vld [vmem:[#allocation15_spill] sm:$0xff]  ;;  %v3426_v48 = vrot.slane %v3417_v30, %v4237_v6  ;;  %v3401_v55 = vrot.slane %v3396_v18, %v4234_v5 }
 0x423   : > { %v3440_v58 = vld [vmem:[#allocation5 + $0x140] ss:$8 sm:$0x3]  ;;  %v3405_v19 = vrot.slane %v3396_v18, %v4237_v6 }
 0x424   : > { %v3284_v45 = vadd.f32 %v3282_v31, %v3261_v51  ;;  %v3285_v35 = vadd.f32 %v3283_v34, %v3262_v44  ;;  %v3306_v56 = vpop.permute.xlu1 %3305  ;;  %v3304_v33 = vpop.permute.xlu0 %3303 }
 0x425   : > { %v3307_v16 = vsel %vm7100_vm9, %v3304_v33, %v3306_v56  ;;  %v3308_v63 = vsel %vm7101_vm15, %v3306_v56, %v3304_v33  ;;  %v3445_v56 = vrot.slane %v3440_v58, %v4234_v5 }
 0x426   : > { %v3302_v27 = vadd.f32 %v3300_v22, %v3285_v35  ;;  %v3301_v11 = vadd.f32 %v3299_v21, %v3284_v45  ;;  %v3322_v14 = vmul.f32 %v3315_v9, %v3307_v16  ;;  %v3323_v10 = vmul.f32 %v3319_v59, %v3308_v63  ;;  %v3457_v59 = vld [vmem:[#allocation5 + $0x141] ss:$8 sm:$0x3] }
 0x427   : > { %v3449_v9 = vrot.slane %v3440_v58, %v4237_v6  ;;  %v3466_v32 = vrot.slane %v3457_v59, %v4237_v6 }
 0x428   : > { %v3329_v23 = vpop.permute.xlu1 %3328  ;;  %v3327_v49 = vpop.permute.xlu0 %3326  ;;  %v3324_v3 = vadd.f32 %v3322_v14, %v3301_v11  ;;  %v3325_v61 = vadd.f32 %v3323_v10, %v3302_v27  ;;  %v3480_v27 = vld [vmem:[#allocation5 + $0x142] ss:$8 sm:$0x3] }
 0x429   : > { %v3330_v38 = vsel %vm7102_vm6, %v3327_v49, %v3329_v23  ;;  %v3331_v24 = vsel %vm7103_vm14, %v3329_v23, %v3327_v49  ;;  %v3503_v49 = vld [vmem:[#allocation5 + $0x143] ss:$8 sm:$0x3] }
 0x42a   : > { %v3345_v41 = vmul.f32 %v3338_v62, %v3330_v38  ;;  %v3346_v1 = vmul.f32 %v3342_v54, %v3331_v24  ;;  %v3462_v54 = vrot.slane %v3457_v59, %v4234_v5 }
 0x42c   : > { %v3352_v15 = vpop.permute.xlu1 %3351  ;;  %v3350_v37 = vpop.permute.xlu0 %3349  ;;  %v3347_v52 = vadd.f32 %v3345_v41, %v3324_v3  ;;  %v3348_v42 = vadd.f32 %v3346_v1, %v3325_v61  ;;  %v3485_v1 = vrot.slane %v3480_v27, %v4234_v5 }
 0x42d   : > { %v3353_v13 = vsel %vm7104_vm5, %v3350_v37, %v3352_v15  ;;  %v3354_v57 = vsel %vm7105_vm7, %v3352_v15, %v3350_v37  ;;  %v3508_v37 = vrot.slane %v3503_v49, %v4234_v5 }
 0x42e   : > { %v3368_v40 = vmul.f32 %v3361_v26, %v3353_v13  ;;  %v3369_v0 = vmul.f32 %v3365_v25, %v3354_v57  ;;  %v3489_v26 = vrot.slane %v3480_v27, %v4237_v6 }
 0x430   : > { %v3370_v20 = vadd.f32 %v3368_v40, %v3347_v52  ;;  %v3371_v7 = vadd.f32 %v3369_v0, %v3348_v42 }
 0x432   : > { %v3385_v28 = vadd.f32 %v3378_v47, %v3370_v20  ;;  %v3386_v12 = vadd.f32 %v3382_v53, %v3371_v7  ;;  %v3512_v47 = vrot.slane %v3503_v49, %v4237_v6  ;;  %v3526_v53 = vld [vmem:[#allocation5 + $0x144] ss:$8 sm:$0x3] }
 0x434   : > { %v3387_v60 = vmul.f32 %v3385_v28, %v7106_v43  ;;  %v3388_v46 = vmul.f32 %v3386_v12, %v7107_v36  ;;  %v3531_v43 = vrot.slane %v3526_v53, %v4234_v5  ;;  %v3543_v36 = vld [vmem:[#allocation7 + $0x14] ss:$8 sm:$0x3] }
 0x435   : > { %v3548_v18 = vrot.slane %v3543_v36, %v4234_v5 }
 0x436   : > { %3391 = vrot.lane.b32.xlu1 %v3388_v46, %s3968_s17  ;;  %3389 = vrot.lane.b32.xlu0 %v3387_v60, %s3968_s17  ;;  %v3470_v61 = vmul.f32 %v3466_v32, %v3388_v46  ;;  %v3469_v15 = vmul.f32 %v3462_v54, %v3387_v60  ;;  %s7114_s17 = sshll.u32 %s4183_s8, 4 }
 0x43a   : > { %3412 = vrot.lane.b32.xlu1 %v3388_v46, %s3967_s20  ;;  %3410 = vrot.lane.b32.xlu0 %v3387_v60, %s3967_s20  ;;  %s3698_s20 = sshll.u32 %s4035_s16, 8  ;;  %s3562_s16 = scalar_lea.sflag [#allocation4], %s4183_s8 }
 0x43b   : > { %s6627_s30 = scalar_lea.hbm %s6674_s3, %s3698_s20 }
 0x43e   : > { %3435 = vrot.lane.b32.xlu1 %v3388_v46, %s3969_s18  ;;  %3433 = vrot.lane.b32.xlu0 %v3387_v60, %s3969_s18  ;;  %s215_s18 = scalar_lea.vmem [#allocation8], %s7114_s17 }
 0x442   : > { %3475 = vrot.lane.b32.xlu1 %v3388_v46, %s3970_s24  ;;  %3473 = vrot.lane.b32.xlu0 %v3387_v60, %s3970_s24  ;;  %s3576_s24 = sshll.u32 %s215_s18, 4  ;;  %s6629_s24 = int_to_ptr.vmem [resolvable:$true] %s3576_s24 }
 0x443   : > { %s3890_s25 = scalar_lea.vmem %s6629_s24, 256 }
 0x444   : > { %p3891_p11 = scmp.ne.s32.totalorder %s6629_s24, %s3890_s25 }
 0x446   : > { %3498 = vrot.lane.b32.xlu1 %v3388_v46, %s3971_s26  ;;  %3496 = vrot.lane.b32.xlu0 %v3387_v60, %s3971_s26  ;;  %p3892_p1 = pnand %p3891_p11, %p7115_p0 }
 0x448   : > { %p3893_p3 = pneg %p3892_p1 }
 0x44a   : > { %3521 = vrot.lane.b32.xlu1 %v3388_v46, %s3972_s27  ;;  %3519 = vrot.lane.b32.xlu0 %v3387_v60, %s3972_s27  ;;  %v3535_v60 = vrot.slane %v3526_v53, %v4237_v6 }
 0x4a8   : > { %v3392_v4 = vpop.permute.xlu1 %3391  ;;  %v3390_v17 = vpop.permute.xlu0 %3389 }
 0x4a9   : > { %v3393_v44 = vsel %vm226_vm1, %v3390_v17, %v3392_v4  ;;  %v3394_v31 = vsel %vm226_vm1, %v3392_v4, %v3390_v17 }
 0x4aa   : > { %v3408_v33 = vmul.f32 %v3401_v55, %v3394_v31  ;;  %v3409_v16 = vmul.f32 %v3405_v19, %v3393_v44 }
 0x4ac   : > { %v3413_v29 = vpop.permute.xlu1 %3412  ;;  %v3411_v51 = vpop.permute.xlu0 %3410 }
 0x4ad   : > { %v3414_v34 = vsel %vm248_vm0, %v3411_v51, %v3413_v29  ;;  %v3415_v50 = vsel %vm248_vm0, %v3413_v29, %v3411_v51  ;;  %vm7108_vm0 = vmmov %vm7100_vm9 }
 0x4ae   : > { %v3429_v45 = vmul.f32 %v3422_v2, %v3415_v50  ;;  %v3430_v35 = vmul.f32 %v3426_v48, %v3414_v34  ;;  %vm7109_vm1 = vmmov %vm7108_vm0  ;;  %v3552_v2 = vrot.slane %v3543_v36, %v4237_v6  ;;  %v3802_v34 = vld [vmem:[%s4189_s22] sm:$0xff] }
 0x4b0   : > { %v3436_v63 = vpop.permute.xlu1 %3435  ;;  %v3434_v22 = vpop.permute.xlu0 %3433  ;;  %v3431_v11 = vadd.f32 %v3429_v45, %v3408_v33  ;;  %v3432_v14 = vadd.f32 %v3430_v35, %v3409_v16  ;;  %v3803_v45 = vld [vmem:[%s4189_s22 + $0x8] sm:$0xff]  ;;  %s3993_s22 = smov [#allocation8]  }
 0x4b1   : > { %v3437_v21 = vsel %vm272_vm2, %v3434_v22, %v3436_v63  ;;  %v3438_v62 = vsel %vm272_vm2, %v3436_v63, %v3434_v22  ;;  %vm7110_vm2 = vmmov %vm7102_vm6  ;;  %s3894_s7 = sshll.u32 %s3993_s22, 4  ;;  %s3895_s7 = int_to_ptr.vmem [resolvable:$false] %s3894_s7 }
 0x4b2   : > { %v3452_v10 = vmul.f32 %v3445_v56, %v3438_v62  ;;  %v3453_v23 = vmul.f32 %v3449_v9, %v3437_v21  ;;  %vm7111_vm8 = vmmov %vm7110_vm2  ;;  %s3896_s23 = scalar_lea.vmem %s3895_s7, 512  ;;  %p3897_p7 = scmp.lt.s32.totalorder %s6629_s24, %s3895_s7 }
 0x4b3   : > { %p3898_p9 = scmp.lt.s32.totalorder %s3896_s23, %s3890_s25 }
 0x4b4   : > { %v3454_v38 = vadd.f32 %v3452_v10, %v3431_v11  ;;  %v3455_v24 = vadd.f32 %v3453_v23, %v3432_v14  ;;  %v3476_v41 = vpop.permute.xlu1 %3475  ;;  %v3474_v25 = vpop.permute.xlu0 %3473 }
 0x4b5   : > { %v3477_v39 = vsel %vm7108_vm0, %v3474_v25, %v3476_v41  ;;  %v3478_v3 = vsel %vm7109_vm1, %v3476_v41, %v3474_v25  ;;  %p3899_p12 = por %p3898_p9, %p3897_p7 }
 0x4b6   : > { %v3472_v13 = vadd.f32 %v3470_v61, %v3455_v24  ;;  %v3471_v57 = vadd.f32 %v3469_v15, %v3454_v38  ;;  %v3492_v52 = vmul.f32 %v3485_v1, %v3477_v39  ;;  %v3493_v42 = vmul.f32 %v3489_v26, %v3478_v3 }
 0x4b7   : > { %p3900_p2 = pnand %p3899_p12, %p3893_p3 }
 0x4b8   : > { %v3499_v40 = vpop.permute.xlu1 %3498  ;;  %v3497_v0 = vpop.permute.xlu0 %3496  ;;  %v3494_v46 = vadd.f32 %v3492_v52, %v3471_v57  ;;  %v3495_v30 = vadd.f32 %v3493_v42, %v3472_v13 }
 0x4b9   : > { %v3500_v20 = vsel %vm7110_vm2, %v3497_v0, %v3499_v40  ;;  %v3501_v7 = vsel %vm7111_vm8, %v3499_v40, %v3497_v0 }
 0x4ba   : > { %v3515_v28 = vmul.f32 %v3508_v37, %v3500_v20  ;;  %v3516_v12 = vmul.f32 %v3512_v47, %v3501_v7 }
 0x4bc   : > { %v3522_v4 = vpop.permute.xlu1 %3521  ;;  %v3520_v17 = vpop.permute.xlu0 %3519  ;;  %v3517_v55 = vadd.f32 %v3515_v28, %v3494_v46  ;;  %v3518_v19 = vadd.f32 %v3516_v12, %v3495_v30 }
 0x4bd   : > { %v3523_v48 = vsel %vm7112_vm4, %v3520_v17, %v3522_v4  ;;  %v3524_v58 = vsel %vm7113_vm3, %v3522_v4, %v3520_v17 }
 0x4be   : > { %v3538_v29 = vmul.f32 %v3531_v43, %v3523_v48  ;;  %v3539_v51 = vmul.f32 %v3535_v60, %v3524_v58 }
 0x4c0   : > { %v3540_v44 = vadd.f32 %v3538_v29, %v3517_v55  ;;  %v3541_v31 = vadd.f32 %v3539_v51, %v3518_v19 }
 0x4c2   : > { %v3555_v5 = vadd.f32 %v3548_v18, %v3540_v44  ;;  %v3556_v6 = vadd.f32 %v3552_v2, %v3541_v31 }
 0x4c4   : > { %v3557_v50 = vadd.f32 %v3802_v34, %v3555_v5  ;;  %v3558_v35 = vadd.f32 %v3803_v45, %v3556_v6 }
 0x4c6   : > { %3559 = vst [vmem:[%s215_s18] sm:$0xff] %v3557_v50  ;;  %3560 = vst [vmem:[%s215_s18 + $0x8] sm:$0xff] %v3558_v35 }
 0x4c7   : > { %3903 = shalt.err (!%p3900_p2)
}
 0x4c8   : > { %s3904_s8 = scalar_lea.hbm %s6627_s30, 256  ;;  %s3908_s29 = scalar_lea.hbm %s6674_s3, 512 }
 0x4c9   : > { %p3905_p13 = scmp.ne.s32.totalorder %s6627_s30, %s3904_s8  ;;  %p3909_p4 = scmp.lt.u32.totalorder %s6627_s30, %s6674_s3 }
 0x4ca   : > { %p3910_p5 = scmp.lt.u32.totalorder %s3908_s29, %s3904_s8  ;;  %p3912_p11 = scmp.lt.u32.totalorder %s3904_s8, %s6627_s30 }
 0x4cb   : > { %p3906_p6 = pnand %p3905_p13, %p7115_p0 }
 0x4cc   : > { %p3911_p8 = por %p3910_p5, %p3909_p4 }
 0x4cd   : > { %p3907_p10 = pneg %p3906_p6 }
 0x4ce   : > { %p3913_p1 = por %p3912_p11, %p3911_p8 }
 0x4d0   : > { %p3914_p3 = pnand %p3913_p1, %p3907_p10 }
 0x4d2   : > { %3917 = shalt.err (!%p3914_p3)
}
 0x4d3   : > { %3709 = dma.vmem_to_hbm [thread:$0]  (%p7115_p0), %s6629_s24, 256, %s6627_s30, %s3562_s16  }
 0x4d4 PF: > { %s3588_s11 = sand.u32 1, %s3948_s12   ;;  %p7116_p7 = scmp.ne.s32.totalorder %s6779_s19, 0 }
 0x4d5   : > { %p7117_p9 = scmp.ge.s32.totalorder %s3960_s15, 2  ;;  %s3589_s20 = scalar_lea.sflag [#allocation4], %s3588_s11 }
 0x4d7   : > { %p3723_p12 = pnand %p7117_p9, %p7116_p7 }
 0x4d9   : > { %3943 = dma.done.wait (!%p3723_p12), %s3589_s20, 256  }
 0x4da   : > { %3945 = vsyncadd (!%p3723_p12), %s3589_s20, 4294967040  ;;  %p17_p2 = scmp.ge.s32.totalorder %s4124_s4, 4   ;;  %s7118_s12 = smov %s3952_s13 }
 0x4db   : > { %s7119_s13 = smov %s3956_s14  ;;  %s7120_s14 = smov %s4140_s9 }
 0x4dc   : > { %s7121_s15 = smov %s4124_s4  ;;  %19 = sbr.rel (!%p17_p2) target bundleno = 6 (0x6), region = 243 }
 0x4e3   :  { %3594 = vsyncpa [#allocation3], 1 }
 0x4e4   :  { %3596 = vsyncpa [#allocation3 + $0x1], 1 }
 0x4e5   :  { %3597 = vsyncpa [#allocation6], 1 }
 0x4e6   :  { %3598 = vsyncpa [#allocation4], 1 }
 0x4e7   :  { %3600 = vsyncpa [#allocation4 + $0x1], 1 }

</bundles_post_ra>
